<compile_context>
chip_gen: v7x
topology: tpu7x:2x2x1
jax: 0.10.0
libtpu: 0.0.40
codegen_flags: <defaults>
</compile_context>

<pallas_src>
import jax
import jax.numpy as jnp
from jax.experimental import pallas as pl
from jax.experimental.pallas import tpu as pltpu

N_CHAN = 32                 # conv output channels
N_TAP = 9                   # 3x3 conv taps
N_POOL = 4                  # 2x2 pool positions
N_PIX = 169                 # 13*13 pooled pixels
FEAT = N_CHAN * N_PIX       # 5408
N_OUT = 10                  # logits
OUT_PAD = 128               # lane-dense padded output width
TILE_B = 128                # images per grid step (128 on v5e, 128-256 on v6e/v7x;
                            # pick batch >= 2*TILE_B so v7x can split the grid
                            # across its two TensorCores)
_CONV_UNROLL_MAX = 16       # static-unroll the conv image loop only for tiny tiles


def _round_up(n, m):
    return ((n + m - 1) // m) * m


def _resident_spec(block_shape, index_map):
    """BlockSpec for weights whose block index never changes: single-buffer them."""
    try:
        return pl.BlockSpec(block_shape, index_map, pipeline_mode=pl.Buffered(1))
    except (TypeError, AttributeError):   # fallback if pipeline_mode is unavailable
        return pl.BlockSpec(block_shape, index_map)


def fused_cnn_kernel(patches_ref, wbd_ref, bconv_ref, w1_ref, b1_ref,
                     w2_ref, b2_ref, out_ref, pool_ref, h_ref):
    # patches_ref: (TB, 36, 169) bf16     wbd_ref: (128, 36) bf16
    # bconv_ref:   (32, 1)  f32           w1_ref:  (32, 169, 128) bf16
    # b1_ref:      (1, 128) f32           w2_ref:  (128, 128) bf16 (zero-padded)
    # b2_ref:      (1, 128) f32 (padded)  out_ref: (TB, 128) f32
    # pool_ref (scratch): (32, TB, 169) f32   h_ref (scratch): (TB, 128) f32
    tb = patches_ref.shape[0]
    wbd = wbd_ref[...]                         # rows = pool_pos*32 + channel
    bconv = bconv_ref[...]                     # (32, 1) f32

    # --- conv (all 4 pool positions in one matmul) + max-pool + bias + ReLU ---------
    # Writes the result channel-major (pool_ref[c, b, :]) so the FC1 loop below reads
    # contiguous (TB, 169) blocks; the per-image scatter overlaps with the conv MXU.
    def conv_one_image(b):
        convt = jnp.dot(wbd, patches_ref[b],
                        preferred_element_type=jnp.float32)          # (128, 169) f32
        pooled = jnp.maximum(jnp.maximum(convt[0:32], convt[32:64]),
                             jnp.maximum(convt[64:96], convt[96:128]))  # (32, 169)
        # bias + ReLU once after the max: max_k(relu(z_k + b)) == relu(max_k(z_k) + b)
        pool_ref[:, b, :] = jnp.maximum(pooled + bconv, 0.0)

    if tb <= _CONV_UNROLL_MAX:
        for b in range(tb):                    # tiny tile: fully static indices
            conv_one_image(b)
    else:
        @pl.loop(0, tb)                        # large tile: scf.for, bounded live ranges
        def _(b):
            conv_one_image(b)

    # --- fc1: 5408 = 32 channels x 169 pixels, accumulated in a VMEM scratch --------
    h_ref[...] = jnp.zeros_like(h_ref)

    @pl.loop(0, N_CHAN)
    def _(c):
        h_ref[...] += jnp.dot(pool_ref[c].astype(jnp.bfloat16), w1_ref[c],
                              preferred_element_type=jnp.float32)    # (TB,169)@(169,128)

    h = jnp.maximum(h_ref[...] + b1_ref[...], 0.0)                   # f32 bias + ReLU

    # --- fc2 (output padded to 128 lanes -> unmasked full-lane stores) --------------
    out_ref[...] = jnp.dot(h.astype(jnp.bfloat16), w2_ref[...],
                           preferred_element_type=jnp.float32) + b2_ref[...]


def prepare_params(params):
    """One-time (hoisted) weight preparation; NOT part of the forward path."""
    conv_w, conv_b, fc1_w, fc1_b, fc2_w, fc2_b = params
    w9 = conv_w.reshape(N_CHAN, N_TAP)                                # (32, 9): [c, dy*3+dx]
    # block-diagonal conv weight, transposed: rows k*32+c, cols k*9+t  (k = pool pos)
    wbd = jax.scipy.linalg.block_diag(w9, w9, w9, w9).astype(jnp.bfloat16)   # (128, 36)
    bconv = conv_b.reshape(N_CHAN, 1).astype(jnp.float32)             # (32, 1)
    # fc1: torch flatten index is c*169+p  ->  w1r[c, p, j] = fc1_w[j, c*169+p]
    w1r = (fc1_w.reshape(128, N_CHAN, N_PIX).transpose(1, 2, 0)
           .astype(jnp.bfloat16))                                     # (32, 169, 128)
    b1 = fc1_b.reshape(1, 128).astype(jnp.float32)
    # fc2 padded to 128 output lanes (sliced back to 10 in the wrapper)
    w2p = (jnp.zeros((128, OUT_PAD), jnp.float32).at[:, :N_OUT].set(fc2_w.T)
           .astype(jnp.bfloat16))                                     # (128, 128)
    b2p = jnp.zeros((1, OUT_PAD), jnp.float32).at[:, :N_OUT].set(fc2_b)
    return wbd, bconv, w1r, b1, w2p, b2p


def simple_cnn_forward(x_nchw, prepared, *, tile_b=TILE_B):
    wbd, bconv, w1r, b1, w2p, b2p = prepared
    B = x_nchw.shape[0]
    tb = min(tile_b, _round_up(B, 8))           # don't pad tiny batches to 128
    Bp = _round_up(B, tb)
    x2 = x_nchw[:, 0].astype(jnp.float32)       # (B, 28, 28)
    if Bp != B:
        x2 = jnp.pad(x2, ((0, Bp - B), (0, 0), (0, 0)))

    # im2col + pool-window grouping (XLA-side glue; see TODO(synk) at top):
    # patches[b, (py*2+px)*9 + (dy*3+dx), h13*13+w13] = x[b, 2*h13+py+dy, 2*w13+px+dx]
    taps = jnp.stack([x2[:, dy:dy + 26, dx:dx + 26]
                      for dy in range(3) for dx in range(3)], axis=1)     # (Bp, 9, 26, 26)
    patches = (taps.reshape(Bp, 9, 13, 2, 13, 2)
               .transpose(0, 3, 5, 1, 2, 4)
               .reshape(Bp, N_POOL * N_TAP, N_PIX)
               .astype(jnp.bfloat16))                                     # (Bp, 36, 169)

    grid = (Bp // tb,)
    flops = 2 * Bp * (128 * 36 * N_PIX + N_CHAN * N_PIX * 128 + 128 * OUT_PAD)
    bytes_accessed = (2 * (patches.size + wbd.size + w1r.size + w2p.size)
                      + 4 * (bconv.size + b1.size + b2p.size + Bp * OUT_PAD))

    out = pl.pallas_call(
        fused_cnn_kernel,
        out_shape=jax.ShapeDtypeStruct((Bp, OUT_PAD), jnp.float32),
        grid_spec=pltpu.PrefetchScalarGridSpec(
            num_scalar_prefetch=0,
            grid=grid,
            in_specs=[
                pl.BlockSpec((tb, N_POOL * N_TAP, N_PIX), lambda i: (i, 0, 0)),  # patches
                _resident_spec((128, N_POOL * N_TAP), lambda i: (0, 0)),         # conv weight
                _resident_spec((N_CHAN, 1), lambda i: (0, 0)),                   # conv bias
                _resident_spec((N_CHAN, N_PIX, 128), lambda i: (0, 0, 0)),       # fc1 weight
                _resident_spec((1, 128), lambda i: (0, 0)),                      # fc1 bias
                _resident_spec((128, OUT_PAD), lambda i: (0, 0)),                # fc2 weight
                _resident_spec((1, OUT_PAD), lambda i: (0, 0)),                  # fc2 bias
            ],
            out_specs=pl.BlockSpec((tb, OUT_PAD), lambda i: (i, 0)),
            scratch_shapes=[
                pltpu.VMEM((N_CHAN, tb, N_PIX), jnp.float32),   # channel-major pool
                pltpu.VMEM((tb, 128), jnp.float32),             # fc1 accumulator
            ]),
        compiler_params=pltpu.CompilerParams(
            dimension_semantics=("parallel",),
            vmem_limit_bytes=48 * 1024 * 1024),
        cost_estimate=pl.CostEstimate(flops=flops, transcendentals=0,
                                      bytes_accessed=bytes_accessed),
    )(patches, wbd, bconv, w1r, b1, w2p, b2p)
    return out[:B, :N_OUT]


def init_params(key):
    ks = jax.random.split(key, 6)
    conv_w = jax.random.normal(ks[0], (32, 1, 3, 3), jnp.float32) * (1.0 / 3.0)
    conv_b = jax.random.normal(ks[1], (32,), jnp.float32) * 0.1
    fc1_w = jax.random.normal(ks[2], (128, FEAT), jnp.float32) * (1.0 / jnp.sqrt(float(FEAT)))
    fc1_b = jax.random.normal(ks[3], (128,), jnp.float32) * 0.1
    fc2_w = jax.random.normal(ks[4], (10, 128), jnp.float32) * (1.0 / jnp.sqrt(128.0))
    fc2_b = jax.random.normal(ks[5], (10,), jnp.float32) * 0.1
    return conv_w, conv_b, fc1_w, fc1_b, fc2_w, fc2_b


def reference_forward(x_nchw, params):
    # Pure-JAX/XLA reference matching the PyTorch forward semantics exactly (f32).
    conv_w, conv_b, fc1_w, fc1_b, fc2_w, fc2_b = params
    y = jax.lax.conv_general_dilated(
        x_nchw, conv_w, window_strides=(1, 1), padding="VALID",
        dimension_numbers=("NCHW", "OIHW", "NCHW"))
    y = y + conv_b.reshape(1, 32, 1, 1)
    y = jnp.maximum(y, 0.0)
    y = jax.lax.reduce_window(y, -jnp.inf, jax.lax.max,
                              (1, 1, 2, 2), (1, 1, 2, 2), "VALID")
    f = y.reshape(y.shape[0], -1)                              # torch's (C, H, W) flatten order
    h = jnp.maximum(f @ fc1_w.T + fc1_b, 0.0)
    return h @ fc2_w.T + fc2_b


if __name__ == "__main__":
    key = jax.random.PRNGKey(0)
    kx, kp = jax.random.split(key)
    x = jax.random.normal(kx, (2, 1, 28, 28), jnp.float32)     # 28x28/1ch so 32*13*13 == 5408
    params = init_params(kp)

    prepared = prepare_params(params)                          # hoisted one-time weight prep
    fwd = jax.jit(simple_cnn_forward)

    out = jax.block_until_ready(fwd(x, prepared))
    ref = jax.block_until_ready(reference_forward(x, params))
    assert out.shape == (2, 10)
    assert jnp.allclose(out, ref, atol=2e-2, rtol=2e-2), float(jnp.max(jnp.abs(out - ref)))
    print("KERNEL_OK")
</pallas_src>

<mosaic_0001>
module attributes {stable_mosaic.version = 11 : i64} {
  func.func @fused_cnn_kernel(%arg0: i32, %arg1: memref<8x36x169xbf16, #tpu.memory_space<vmem>>, %arg2: memref<128x36xbf16, #tpu.memory_space<vmem>>, %arg3: memref<32x1xf32, #tpu.memory_space<vmem>>, %arg4: memref<32x169x128xbf16, #tpu.memory_space<vmem>>, %arg5: memref<1x128xf32, #tpu.memory_space<vmem>>, %arg6: memref<128x128xbf16, #tpu.memory_space<vmem>>, %arg7: memref<1x128xf32, #tpu.memory_space<vmem>>, %arg8: memref<8x128xf32, #tpu.memory_space<vmem>>, %arg9: memref<32x8x169xf32, #tpu.memory_space<vmem>>, %arg10: memref<8x128xf32, #tpu.memory_space<vmem>>) attributes {dimension_semantics = [#tpu.dimension_semantics<parallel>], iteration_bounds = array<i64: 1>, scalar_prefetch = 0 : i64, scratch_operands = 2 : i64, tpu.core_type = #tpu.core_type<tc>, window_params = [{transform_indices = @transform_0, window_bounds = array<i64: 8, 36, 169>}, {pipeline_mode = #tpu.pipeline_mode<synchronous>, transform_indices = @transform_1, window_bounds = array<i64: 128, 36>}, {pipeline_mode = #tpu.pipeline_mode<synchronous>, transform_indices = @transform_2, window_bounds = array<i64: 32, 1>}, {pipeline_mode = #tpu.pipeline_mode<synchronous>, transform_indices = @transform_3, window_bounds = array<i64: 32, 169, 128>}, {pipeline_mode = #tpu.pipeline_mode<synchronous>, transform_indices = @transform_4, window_bounds = array<i64: 1, 128>}, {pipeline_mode = #tpu.pipeline_mode<synchronous>, transform_indices = @transform_5, window_bounds = array<i64: 128, 128>}, {pipeline_mode = #tpu.pipeline_mode<synchronous>, transform_indices = @transform_6, window_bounds = array<i64: 1, 128>}, {transform_indices = @transform_7, window_bounds = array<i64: 8, 128>}]} {
    %c0 = arith.constant 0 : index
    %c0_0 = arith.constant 0 : index
    %0 = vector.load %arg2[%c0, %c0_0] : memref<128x36xbf16, #tpu.memory_space<vmem>>, vector<128x36xbf16>
    %c0_1 = arith.constant 0 : index
    %c0_2 = arith.constant 0 : index
    %1 = vector.load %arg3[%c0_1, %c0_2] : memref<32x1xf32, #tpu.memory_space<vmem>>, vector<32x1xf32>
    %c0_3 = arith.constant 0 : index
    %c0_4 = arith.constant 0 : index
    %c0_5 = arith.constant 0 : index
    %2 = vector.load %arg1[%c0_3, %c0_4, %c0_5] : memref<8x36x169xbf16, #tpu.memory_space<vmem>>, vector<1x36x169xbf16>
    %3 = vector.shape_cast %2 : vector<1x36x169xbf16> to vector<36x169xbf16>
    %cst = arith.constant dense<0.000000e+00> : vector<128x169xf32>
    %4 = tpu.matmul %0, %3, %cst {dimension_numbers = #tpu.dot_dimension_numbers<[1], [0], [0], [1], [0, 0, 1, 1], [], []>} : vector<128x36xbf16>, vector<36x169xbf16>, vector<128x169xf32> -> vector<128x169xf32>
    %5 = vector.extract_strided_slice %4 {offsets = [0, 0], sizes = [32, 169], strides = [1, 1]} : vector<128x169xf32> to vector<32x169xf32>
    %6 = vector.extract_strided_slice %4 {offsets = [32, 0], sizes = [32, 169], strides = [1, 1]} : vector<128x169xf32> to vector<32x169xf32>
    %7 = arith.maximumf %5, %6 : vector<32x169xf32>
    %8 = vector.extract_strided_slice %4 {offsets = [64, 0], sizes = [32, 169], strides = [1, 1]} : vector<128x169xf32> to vector<32x169xf32>
    %9 = vector.extract_strided_slice %4 {offsets = [96, 0], sizes = [32, 169], strides = [1, 1]} : vector<128x169xf32> to vector<32x169xf32>
    %10 = arith.maximumf %8, %9 : vector<32x169xf32>
    %11 = arith.maximumf %7, %10 : vector<32x169xf32>
    %12 = vector.broadcast %1 : vector<32x1xf32> to vector<32x169xf32>
    %13 = arith.addf %11, %12 : vector<32x169xf32>
    %cst_6 = arith.constant 0.000000e+00 : f32
    %14 = vector.broadcast %cst_6 : f32 to vector<32x169xf32>
    %15 = arith.maximumf %13, %14 : vector<32x169xf32>
    %c0_7 = arith.constant 0 : index
    %c0_8 = arith.constant 0 : index
    %c0_9 = arith.constant 0 : index
    %16 = vector.load %arg9[%c0_7, %c0_8, %c0_9] : memref<32x8x169xf32, #tpu.memory_space<vmem>>, vector<32x1x169xf32>
    %17 = vector.shape_cast %16 : vector<32x1x169xf32> to vector<32x169xf32>
    %18 = vector.shape_cast %15 : vector<32x169xf32> to vector<32x1x169xf32>
    tpu.vector_store %arg9[%c0_7, %c0_8, %c0_9], %18 {strides = array<i32>} : memref<32x8x169xf32, #tpu.memory_space<vmem>>, vector<32x1x169xf32>,
    %c1 = arith.constant 1 : index
    %c0_10 = arith.constant 0 : index
    %c0_11 = arith.constant 0 : index
    %19 = vector.load %arg1[%c1, %c0_10, %c0_11] : memref<8x36x169xbf16, #tpu.memory_space<vmem>>, vector<1x36x169xbf16>
    %20 = vector.shape_cast %19 : vector<1x36x169xbf16> to vector<36x169xbf16>
    %cst_12 = arith.constant dense<0.000000e+00> : vector<128x169xf32>
    %21 = tpu.matmul %0, %20, %cst_12 {dimension_numbers = #tpu.dot_dimension_numbers<[1], [0], [0], [1], [0, 0, 1, 1], [], []>} : vector<128x36xbf16>, vector<36x169xbf16>, vector<128x169xf32> -> vector<128x169xf32>
    %22 = vector.extract_strided_slice %21 {offsets = [0, 0], sizes = [32, 169], strides = [1, 1]} : vector<128x169xf32> to vector<32x169xf32>
    %23 = vector.extract_strided_slice %21 {offsets = [32, 0], sizes = [32, 169], strides = [1, 1]} : vector<128x169xf32> to vector<32x169xf32>
    %24 = arith.maximumf %22, %23 : vector<32x169xf32>
    %25 = vector.extract_strided_slice %21 {offsets = [64, 0], sizes = [32, 169], strides = [1, 1]} : vector<128x169xf32> to vector<32x169xf32>
    %26 = vector.extract_strided_slice %21 {offsets = [96, 0], sizes = [32, 169], strides = [1, 1]} : vector<128x169xf32> to vector<32x169xf32>
    %27 = arith.maximumf %25, %26 : vector<32x169xf32>
    %28 = arith.maximumf %24, %27 : vector<32x169xf32>
    %29 = vector.broadcast %1 : vector<32x1xf32> to vector<32x169xf32>
    %30 = arith.addf %28, %29 : vector<32x169xf32>
    %cst_13 = arith.constant 0.000000e+00 : f32
    %31 = vector.broadcast %cst_13 : f32 to vector<32x169xf32>
    %32 = arith.maximumf %30, %31 : vector<32x169xf32>
    %c0_14 = arith.constant 0 : index
    %c1_15 = arith.constant 1 : index
    %c0_16 = arith.constant 0 : index
    %33 = vector.load %arg9[%c0_14, %c1_15, %c0_16] : memref<32x8x169xf32, #tpu.memory_space<vmem>>, vector<32x1x169xf32>
    %34 = vector.shape_cast %33 : vector<32x1x169xf32> to vector<32x169xf32>
    %35 = vector.shape_cast %32 : vector<32x169xf32> to vector<32x1x169xf32>
    tpu.vector_store %arg9[%c0_14, %c1_15, %c0_16], %35 {strides = array<i32>} : memref<32x8x169xf32, #tpu.memory_space<vmem>>, vector<32x1x169xf32>,
    %c2 = arith.constant 2 : index
    %c0_17 = arith.constant 0 : index
    %c0_18 = arith.constant 0 : index
    %36 = vector.load %arg1[%c2, %c0_17, %c0_18] : memref<8x36x169xbf16, #tpu.memory_space<vmem>>, vector<1x36x169xbf16>
    %37 = vector.shape_cast %36 : vector<1x36x169xbf16> to vector<36x169xbf16>
    %cst_19 = arith.constant dense<0.000000e+00> : vector<128x169xf32>
    %38 = tpu.matmul %0, %37, %cst_19 {dimension_numbers = #tpu.dot_dimension_numbers<[1], [0], [0], [1], [0, 0, 1, 1], [], []>} : vector<128x36xbf16>, vector<36x169xbf16>, vector<128x169xf32> -> vector<128x169xf32>
    %39 = vector.extract_strided_slice %38 {offsets = [0, 0], sizes = [32, 169], strides = [1, 1]} : vector<128x169xf32> to vector<32x169xf32>
    %40 = vector.extract_strided_slice %38 {offsets = [32, 0], sizes = [32, 169], strides = [1, 1]} : vector<128x169xf32> to vector<32x169xf32>
    %41 = arith.maximumf %39, %40 : vector<32x169xf32>
    %42 = vector.extract_strided_slice %38 {offsets = [64, 0], sizes = [32, 169], strides = [1, 1]} : vector<128x169xf32> to vector<32x169xf32>
    %43 = vector.extract_strided_slice %38 {offsets = [96, 0], sizes = [32, 169], strides = [1, 1]} : vector<128x169xf32> to vector<32x169xf32>
    %44 = arith.maximumf %42, %43 : vector<32x169xf32>
    %45 = arith.maximumf %41, %44 : vector<32x169xf32>
    %46 = vector.broadcast %1 : vector<32x1xf32> to vector<32x169xf32>
    %47 = arith.addf %45, %46 : vector<32x169xf32>
    %cst_20 = arith.constant 0.000000e+00 : f32
    %48 = vector.broadcast %cst_20 : f32 to vector<32x169xf32>
    %49 = arith.maximumf %47, %48 : vector<32x169xf32>
    %c0_21 = arith.constant 0 : index
    %c2_22 = arith.constant 2 : index
    %c0_23 = arith.constant 0 : index
    %50 = vector.load %arg9[%c0_21, %c2_22, %c0_23] : memref<32x8x169xf32, #tpu.memory_space<vmem>>, vector<32x1x169xf32>
    %51 = vector.shape_cast %50 : vector<32x1x169xf32> to vector<32x169xf32>
    %52 = vector.shape_cast %49 : vector<32x169xf32> to vector<32x1x169xf32>
    tpu.vector_store %arg9[%c0_21, %c2_22, %c0_23], %52 {strides = array<i32>} : memref<32x8x169xf32, #tpu.memory_space<vmem>>, vector<32x1x169xf32>,
    %c3 = arith.constant 3 : index
    %c0_24 = arith.constant 0 : index
    %c0_25 = arith.constant 0 : index
    %53 = vector.load %arg1[%c3, %c0_24, %c0_25] : memref<8x36x169xbf16, #tpu.memory_space<vmem>>, vector<1x36x169xbf16>
    %54 = vector.shape_cast %53 : vector<1x36x169xbf16> to vector<36x169xbf16>
    %cst_26 = arith.constant dense<0.000000e+00> : vector<128x169xf32>
    %55 = tpu.matmul %0, %54, %cst_26 {dimension_numbers = #tpu.dot_dimension_numbers<[1], [0], [0], [1], [0, 0, 1, 1], [], []>} : vector<128x36xbf16>, vector<36x169xbf16>, vector<128x169xf32> -> vector<128x169xf32>
    %56 = vector.extract_strided_slice %55 {offsets = [0, 0], sizes = [32, 169], strides = [1, 1]} : vector<128x169xf32> to vector<32x169xf32>
    %57 = vector.extract_strided_slice %55 {offsets = [32, 0], sizes = [32, 169], strides = [1, 1]} : vector<128x169xf32> to vector<32x169xf32>
    %58 = arith.maximumf %56, %57 : vector<32x169xf32>
    %59 = vector.extract_strided_slice %55 {offsets = [64, 0], sizes = [32, 169], strides = [1, 1]} : vector<128x169xf32> to vector<32x169xf32>
    %60 = vector.extract_strided_slice %55 {offsets = [96, 0], sizes = [32, 169], strides = [1, 1]} : vector<128x169xf32> to vector<32x169xf32>
    %61 = arith.maximumf %59, %60 : vector<32x169xf32>
    %62 = arith.maximumf %58, %61 : vector<32x169xf32>
    %63 = vector.broadcast %1 : vector<32x1xf32> to vector<32x169xf32>
    %64 = arith.addf %62, %63 : vector<32x169xf32>
    %cst_27 = arith.constant 0.000000e+00 : f32
    %65 = vector.broadcast %cst_27 : f32 to vector<32x169xf32>
    %66 = arith.maximumf %64, %65 : vector<32x169xf32>
    %c0_28 = arith.constant 0 : index
    %c3_29 = arith.constant 3 : index
    %c0_30 = arith.constant 0 : index
    %67 = vector.load %arg9[%c0_28, %c3_29, %c0_30] : memref<32x8x169xf32, #tpu.memory_space<vmem>>, vector<32x1x169xf32>
    %68 = vector.shape_cast %67 : vector<32x1x169xf32> to vector<32x169xf32>
    %69 = vector.shape_cast %66 : vector<32x169xf32> to vector<32x1x169xf32>
    tpu.vector_store %arg9[%c0_28, %c3_29, %c0_30], %69 {strides = array<i32>} : memref<32x8x169xf32, #tpu.memory_space<vmem>>, vector<32x1x169xf32>,
    %c4 = arith.constant 4 : index
    %c0_31 = arith.constant 0 : index
    %c0_32 = arith.constant 0 : index
    %70 = vector.load %arg1[%c4, %c0_31, %c0_32] : memref<8x36x169xbf16, #tpu.memory_space<vmem>>, vector<1x36x169xbf16>
    %71 = vector.shape_cast %70 : vector<1x36x169xbf16> to vector<36x169xbf16>
    %cst_33 = arith.constant dense<0.000000e+00> : vector<128x169xf32>
    %72 = tpu.matmul %0, %71, %cst_33 {dimension_numbers = #tpu.dot_dimension_numbers<[1], [0], [0], [1], [0, 0, 1, 1], [], []>} : vector<128x36xbf16>, vector<36x169xbf16>, vector<128x169xf32> -> vector<128x169xf32>
    %73 = vector.extract_strided_slice %72 {offsets = [0, 0], sizes = [32, 169], strides = [1, 1]} : vector<128x169xf32> to vector<32x169xf32>
    %74 = vector.extract_strided_slice %72 {offsets = [32, 0], sizes = [32, 169], strides = [1, 1]} : vector<128x169xf32> to vector<32x169xf32>
    %75 = arith.maximumf %73, %74 : vector<32x169xf32>
    %76 = vector.extract_strided_slice %72 {offsets = [64, 0], sizes = [32, 169], strides = [1, 1]} : vector<128x169xf32> to vector<32x169xf32>
    %77 = vector.extract_strided_slice %72 {offsets = [96, 0], sizes = [32, 169], strides = [1, 1]} : vector<128x169xf32> to vector<32x169xf32>
    %78 = arith.maximumf %76, %77 : vector<32x169xf32>
    %79 = arith.maximumf %75, %78 : vector<32x169xf32>
    %80 = vector.broadcast %1 : vector<32x1xf32> to vector<32x169xf32>
    %81 = arith.addf %79, %80 : vector<32x169xf32>
    %cst_34 = arith.constant 0.000000e+00 : f32
    %82 = vector.broadcast %cst_34 : f32 to vector<32x169xf32>
    %83 = arith.maximumf %81, %82 : vector<32x169xf32>
    %c0_35 = arith.constant 0 : index
    %c4_36 = arith.constant 4 : index
    %c0_37 = arith.constant 0 : index
    %84 = vector.load %arg9[%c0_35, %c4_36, %c0_37] : memref<32x8x169xf32, #tpu.memory_space<vmem>>, vector<32x1x169xf32>
    %85 = vector.shape_cast %84 : vector<32x1x169xf32> to vector<32x169xf32>
    %86 = vector.shape_cast %83 : vector<32x169xf32> to vector<32x1x169xf32>
    tpu.vector_store %arg9[%c0_35, %c4_36, %c0_37], %86 {strides = array<i32>} : memref<32x8x169xf32, #tpu.memory_space<vmem>>, vector<32x1x169xf32>,
    %c5 = arith.constant 5 : index
    %c0_38 = arith.constant 0 : index
    %c0_39 = arith.constant 0 : index
    %87 = vector.load %arg1[%c5, %c0_38, %c0_39] : memref<8x36x169xbf16, #tpu.memory_space<vmem>>, vector<1x36x169xbf16>
    %88 = vector.shape_cast %87 : vector<1x36x169xbf16> to vector<36x169xbf16>
    %cst_40 = arith.constant dense<0.000000e+00> : vector<128x169xf32>
    %89 = tpu.matmul %0, %88, %cst_40 {dimension_numbers = #tpu.dot_dimension_numbers<[1], [0], [0], [1], [0, 0, 1, 1], [], []>} : vector<128x36xbf16>, vector<36x169xbf16>, vector<128x169xf32> -> vector<128x169xf32>
    %90 = vector.extract_strided_slice %89 {offsets = [0, 0], sizes = [32, 169], strides = [1, 1]} : vector<128x169xf32> to vector<32x169xf32>
    %91 = vector.extract_strided_slice %89 {offsets = [32, 0], sizes = [32, 169], strides = [1, 1]} : vector<128x169xf32> to vector<32x169xf32>
    %92 = arith.maximumf %90, %91 : vector<32x169xf32>
    %93 = vector.extract_strided_slice %89 {offsets = [64, 0], sizes = [32, 169], strides = [1, 1]} : vector<128x169xf32> to vector<32x169xf32>
    %94 = vector.extract_strided_slice %89 {offsets = [96, 0], sizes = [32, 169], strides = [1, 1]} : vector<128x169xf32> to vector<32x169xf32>
    %95 = arith.maximumf %93, %94 : vector<32x169xf32>
    %96 = arith.maximumf %92, %95 : vector<32x169xf32>
    %97 = vector.broadcast %1 : vector<32x1xf32> to vector<32x169xf32>
    %98 = arith.addf %96, %97 : vector<32x169xf32>
    %cst_41 = arith.constant 0.000000e+00 : f32
    %99 = vector.broadcast %cst_41 : f32 to vector<32x169xf32>
    %100 = arith.maximumf %98, %99 : vector<32x169xf32>
    %c0_42 = arith.constant 0 : index
    %c5_43 = arith.constant 5 : index
    %c0_44 = arith.constant 0 : index
    %101 = vector.load %arg9[%c0_42, %c5_43, %c0_44] : memref<32x8x169xf32, #tpu.memory_space<vmem>>, vector<32x1x169xf32>
    %102 = vector.shape_cast %101 : vector<32x1x169xf32> to vector<32x169xf32>
    %103 = vector.shape_cast %100 : vector<32x169xf32> to vector<32x1x169xf32>
    tpu.vector_store %arg9[%c0_42, %c5_43, %c0_44], %103 {strides = array<i32>} : memref<32x8x169xf32, #tpu.memory_space<vmem>>, vector<32x1x169xf32>,
    %c6 = arith.constant 6 : index
    %c0_45 = arith.constant 0 : index
    %c0_46 = arith.constant 0 : index
    %104 = vector.load %arg1[%c6, %c0_45, %c0_46] : memref<8x36x169xbf16, #tpu.memory_space<vmem>>, vector<1x36x169xbf16>
    %105 = vector.shape_cast %104 : vector<1x36x169xbf16> to vector<36x169xbf16>
    %cst_47 = arith.constant dense<0.000000e+00> : vector<128x169xf32>
    %106 = tpu.matmul %0, %105, %cst_47 {dimension_numbers = #tpu.dot_dimension_numbers<[1], [0], [0], [1], [0, 0, 1, 1], [], []>} : vector<128x36xbf16>, vector<36x169xbf16>, vector<128x169xf32> -> vector<128x169xf32>
    %107 = vector.extract_strided_slice %106 {offsets = [0, 0], sizes = [32, 169], strides = [1, 1]} : vector<128x169xf32> to vector<32x169xf32>
    %108 = vector.extract_strided_slice %106 {offsets = [32, 0], sizes = [32, 169], strides = [1, 1]} : vector<128x169xf32> to vector<32x169xf32>
    %109 = arith.maximumf %107, %108 : vector<32x169xf32>
    %110 = vector.extract_strided_slice %106 {offsets = [64, 0], sizes = [32, 169], strides = [1, 1]} : vector<128x169xf32> to vector<32x169xf32>
    %111 = vector.extract_strided_slice %106 {offsets = [96, 0], sizes = [32, 169], strides = [1, 1]} : vector<128x169xf32> to vector<32x169xf32>
    %112 = arith.maximumf %110, %111 : vector<32x169xf32>
    %113 = arith.maximumf %109, %112 : vector<32x169xf32>
    %114 = vector.broadcast %1 : vector<32x1xf32> to vector<32x169xf32>
    %115 = arith.addf %113, %114 : vector<32x169xf32>
    %cst_48 = arith.constant 0.000000e+00 : f32
    %116 = vector.broadcast %cst_48 : f32 to vector<32x169xf32>
    %117 = arith.maximumf %115, %116 : vector<32x169xf32>
    %c0_49 = arith.constant 0 : index
    %c6_50 = arith.constant 6 : index
    %c0_51 = arith.constant 0 : index
    %118 = vector.load %arg9[%c0_49, %c6_50, %c0_51] : memref<32x8x169xf32, #tpu.memory_space<vmem>>, vector<32x1x169xf32>
    %119 = vector.shape_cast %118 : vector<32x1x169xf32> to vector<32x169xf32>
    %120 = vector.shape_cast %117 : vector<32x169xf32> to vector<32x1x169xf32>
    tpu.vector_store %arg9[%c0_49, %c6_50, %c0_51], %120 {strides = array<i32>} : memref<32x8x169xf32, #tpu.memory_space<vmem>>, vector<32x1x169xf32>,
    %c7 = arith.constant 7 : index
    %c0_52 = arith.constant 0 : index
    %c0_53 = arith.constant 0 : index
    %121 = vector.load %arg1[%c7, %c0_52, %c0_53] : memref<8x36x169xbf16, #tpu.memory_space<vmem>>, vector<1x36x169xbf16>
    %122 = vector.shape_cast %121 : vector<1x36x169xbf16> to vector<36x169xbf16>
    %cst_54 = arith.constant dense<0.000000e+00> : vector<128x169xf32>
    %123 = tpu.matmul %0, %122, %cst_54 {dimension_numbers = #tpu.dot_dimension_numbers<[1], [0], [0], [1], [0, 0, 1, 1], [], []>} : vector<128x36xbf16>, vector<36x169xbf16>, vector<128x169xf32> -> vector<128x169xf32>
    %124 = vector.extract_strided_slice %123 {offsets = [0, 0], sizes = [32, 169], strides = [1, 1]} : vector<128x169xf32> to vector<32x169xf32>
    %125 = vector.extract_strided_slice %123 {offsets = [32, 0], sizes = [32, 169], strides = [1, 1]} : vector<128x169xf32> to vector<32x169xf32>
    %126 = arith.maximumf %124, %125 : vector<32x169xf32>
    %127 = vector.extract_strided_slice %123 {offsets = [64, 0], sizes = [32, 169], strides = [1, 1]} : vector<128x169xf32> to vector<32x169xf32>
    %128 = vector.extract_strided_slice %123 {offsets = [96, 0], sizes = [32, 169], strides = [1, 1]} : vector<128x169xf32> to vector<32x169xf32>
    %129 = arith.maximumf %127, %128 : vector<32x169xf32>
    %130 = arith.maximumf %126, %129 : vector<32x169xf32>
    %131 = vector.broadcast %1 : vector<32x1xf32> to vector<32x169xf32>
    %132 = arith.addf %130, %131 : vector<32x169xf32>
    %cst_55 = arith.constant 0.000000e+00 : f32
    %133 = vector.broadcast %cst_55 : f32 to vector<32x169xf32>
    %134 = arith.maximumf %132, %133 : vector<32x169xf32>
    %c0_56 = arith.constant 0 : index
    %c7_57 = arith.constant 7 : index
    %c0_58 = arith.constant 0 : index
    %135 = vector.load %arg9[%c0_56, %c7_57, %c0_58] : memref<32x8x169xf32, #tpu.memory_space<vmem>>, vector<32x1x169xf32>
    %136 = vector.shape_cast %135 : vector<32x1x169xf32> to vector<32x169xf32>
    %137 = vector.shape_cast %134 : vector<32x169xf32> to vector<32x1x169xf32>
    tpu.vector_store %arg9[%c0_56, %c7_57, %c0_58], %137 {strides = array<i32>} : memref<32x8x169xf32, #tpu.memory_space<vmem>>, vector<32x1x169xf32>,
    %cst_59 = arith.constant 0.000000e+00 : f32
    %138 = vector.broadcast %cst_59 : f32 to vector<8x128xf32>
    %c0_60 = arith.constant 0 : index
    %c0_61 = arith.constant 0 : index
    %139 = vector.load %arg10[%c0_60, %c0_61] : memref<8x128xf32, #tpu.memory_space<vmem>>, vector<8x128xf32>
    tpu.vector_store %arg10[%c0_60, %c0_61], %138 {strides = array<i32>} : memref<8x128xf32, #tpu.memory_space<vmem>>, vector<8x128xf32>,
    %c0_i32 = arith.constant 0 : i32
    %c32_i32 = arith.constant 32 : i32
    %140 = arith.addi %c0_i32, %c32_i32 : i32
    %c1_i32 = arith.constant 1 : i32
    scf.for %arg11 = %c0_i32 to %140 step %c1_i32  : i32 {
      %c1_i32_75 = arith.constant 1 : i32
      %154 = arith.muli %arg11, %c1_i32_75 : i32
      %c0_i32_76 = arith.constant 0 : i32
      %155 = arith.addi %c0_i32_76, %154 : i32
      %c0_77 = arith.constant 0 : index
      %c0_78 = arith.constant 0 : index
      %156 = vector.load %arg10[%c0_77, %c0_78] : memref<8x128xf32, #tpu.memory_space<vmem>>, vector<8x128xf32>
      %157 = arith.index_cast %155 : i32 to index
      %c0_79 = arith.constant 0 : index
      %c0_80 = arith.constant 0 : index
      %158 = vector.load %arg9[%157, %c0_79, %c0_80] : memref<32x8x169xf32, #tpu.memory_space<vmem>>, vector<1x8x169xf32>
      %159 = vector.shape_cast %158 : vector<1x8x169xf32> to vector<8x169xf32>
      %160 = arith.truncf %159 : vector<8x169xf32> to vector<8x169xbf16>
      %161 = arith.index_cast %155 : i32 to index
      %c0_81 = arith.constant 0 : index
      %c0_82 = arith.constant 0 : index
      %162 = vector.load %arg4[%161, %c0_81, %c0_82] : memref<32x169x128xbf16, #tpu.memory_space<vmem>>, vector<1x169x128xbf16>
      %163 = vector.shape_cast %162 : vector<1x169x128xbf16> to vector<169x128xbf16>
      %cst_83 = arith.constant dense<0.000000e+00> : vector<8x128xf32>
      %164 = tpu.matmul %160, %163, %cst_83 {dimension_numbers = #tpu.dot_dimension_numbers<[1], [0], [0], [1], [0, 0, 1, 1], [], []>} : vector<8x169xbf16>, vector<169x128xbf16>, vector<8x128xf32> -> vector<8x128xf32>
      %165 = arith.addf %156, %164 : vector<8x128xf32>
      %c0_84 = arith.constant 0 : index
      %c0_85 = arith.constant 0 : index
      %166 = vector.load %arg10[%c0_84, %c0_85] : memref<8x128xf32, #tpu.memory_space<vmem>>, vector<8x128xf32>
      tpu.vector_store %arg10[%c0_84, %c0_85], %165 {strides = array<i32>} : memref<8x128xf32, #tpu.memory_space<vmem>>, vector<8x128xf32>,
    }
    %c32_i32_62 = arith.constant 32 : i32
    %c0_63 = arith.constant 0 : index
    %c0_64 = arith.constant 0 : index
    %141 = vector.load %arg10[%c0_63, %c0_64] : memref<8x128xf32, #tpu.memory_space<vmem>>, vector<8x128xf32>
    %c0_65 = arith.constant 0 : index
    %c0_66 = arith.constant 0 : index
    %142 = vector.load %arg5[%c0_65, %c0_66] : memref<1x128xf32, #tpu.memory_space<vmem>>, vector<1x128xf32>
    %143 = vector.broadcast %142 : vector<1x128xf32> to vector<8x128xf32>
    %144 = arith.addf %141, %143 : vector<8x128xf32>
    %cst_67 = arith.constant 0.000000e+00 : f32
    %145 = vector.broadcast %cst_67 : f32 to vector<8x128xf32>
    %146 = arith.maximumf %144, %145 : vector<8x128xf32>
    %147 = arith.truncf %146 : vector<8x128xf32> to vector<8x128xbf16>
    %c0_68 = arith.constant 0 : index
    %c0_69 = arith.constant 0 : index
    %148 = vector.load %arg6[%c0_68, %c0_69] : memref<128x128xbf16, #tpu.memory_space<vmem>>, vector<128x128xbf16>
    %cst_70 = arith.constant dense<0.000000e+00> : vector<8x128xf32>
    %149 = tpu.matmul %147, %148, %cst_70 {dimension_numbers = #tpu.dot_dimension_numbers<[1], [0], [0], [1], [0, 0, 1, 1], [], []>} : vector<8x128xbf16>, vector<128x128xbf16>, vector<8x128xf32> -> vector<8x128xf32>
    %c0_71 = arith.constant 0 : index
    %c0_72 = arith.constant 0 : index
    %150 = vector.load %arg7[%c0_71, %c0_72] : memref<1x128xf32, #tpu.memory_space<vmem>>, vector<1x128xf32>
    %151 = vector.broadcast %150 : vector<1x128xf32> to vector<8x128xf32>
    %152 = arith.addf %149, %151 : vector<8x128xf32>
    %c0_73 = arith.constant 0 : index
    %c0_74 = arith.constant 0 : index
    %153 = vector.load %arg8[%c0_73, %c0_74] : memref<8x128xf32, #tpu.memory_space<vmem>>, vector<8x128xf32>
    tpu.vector_store %arg8[%c0_73, %c0_74], %152 {strides = array<i32>} : memref<8x128xf32, #tpu.memory_space<vmem>>, vector<8x128xf32>,
    return
  }
  func.func @transform_0(%arg0: i32) -> (i32, i32, i32) {
    %c0_i32 = arith.constant 0 : i32
    %c0_i32_0 = arith.constant 0 : i32
    %c0_i32_1 = arith.constant 0 : i32
    return %arg0, %c0_i32, %c0_i32_0 : i32, i32, i32
  }
  func.func @transform_1(%arg0: i32) -> (i32, i32) {
    %c0_i32 = arith.constant 0 : i32
    %c0_i32_0 = arith.constant 0 : i32
    %c0_i32_1 = arith.constant 0 : i32
    return %c0_i32, %c0_i32_0 : i32, i32
  }
  func.func @transform_2(%arg0: i32) -> (i32, i32) {
    %c0_i32 = arith.constant 0 : i32
    %c0_i32_0 = arith.constant 0 : i32
    %c0_i32_1 = arith.constant 0 : i32
    return %c0_i32, %c0_i32_0 : i32, i32
  }
  func.func @transform_3(%arg0: i32) -> (i32, i32, i32) {
    %c0_i32 = arith.constant 0 : i32
    %c0_i32_0 = arith.constant 0 : i32
    %c0_i32_1 = arith.constant 0 : i32
    %c0_i32_2 = arith.constant 0 : i32
    return %c0_i32, %c0_i32_0, %c0_i32_1 : i32, i32, i32
  }
  func.func @transform_4(%arg0: i32) -> (i32, i32) {
    %c0_i32 = arith.constant 0 : i32
    %c0_i32_0 = arith.constant 0 : i32
    %c0_i32_1 = arith.constant 0 : i32
    return %c0_i32, %c0_i32_0 : i32, i32
  }
  func.func @transform_5(%arg0: i32) -> (i32, i32) {
    %c0_i32 = arith.constant 0 : i32
    %c0_i32_0 = arith.constant 0 : i32
    %c0_i32_1 = arith.constant 0 : i32
    return %c0_i32, %c0_i32_0 : i32, i32
  }
  func.func @transform_6(%arg0: i32) -> (i32, i32) {
    %c0_i32 = arith.constant 0 : i32
    %c0_i32_0 = arith.constant 0 : i32
    %c0_i32_1 = arith.constant 0 : i32
    return %c0_i32, %c0_i32_0 : i32, i32
  }
  func.func @transform_7(%arg0: i32) -> (i32, i32) {
    %c0_i32 = arith.constant 0 : i32
    %c0_i32_0 = arith.constant 0 : i32
    return %arg0, %c0_i32 : i32, i32
  }
}

</mosaic_0001>

<bundles_post_ra>
// kernel: simple_cnn_forward.1
= control target key start
LH: loop header
LB: loop body
LE: loop exit
PB: predicated region body
PF: predicated region fallthrough
CT: control target
= control target key end

     0   :  { %v4971_v1 = vmov 0   ;;  %vm142_vm0 = vcmask 1041408   ;;  %vm117_vm1 = vcmask 293888   ;;  %s6944_s0 = inlined_call_operand.vmem [shape: bf16[8,36,169], index: 0, kind: input, shape index: {}]   ;;  %s6945_s3 = inlined_call_operand.vmem [shape: bf16[32,169,128], index: 3, kind: input, shape index: {}]   ;;  %s6946_s4 = inlined_call_operand.vmem [shape: f32[1,128], index: 4, kind: input, shape index: {}]   ;;  %s6947_s5 = inlined_call_operand.vmem [shape: bf16[128,128], index: 5, kind: input, shape index: {}]   ;;  %s6948_s6 = inlined_call_operand.vmem [shape: f32[1,128], index: 6, kind: input, shape index: {}]   ;;  %s6949_s7 = inlined_call_operand.vmem [shape: f32[8,128], index: 7, kind: output, shape index: {}]   ;;  %s6950_s1 = inlined_call_operand.vmem [shape: bf16[128,36], index: 1, kind: input, shape index: {}]   ;;  %s6951_s2 = inlined_call_operand.vmem [shape: f32[32,1], index: 2, kind: input, shape index: {}]  }
   0x1   :  { %v4872_v0 = vld [vmem:[%s6944_s0 + $0x4] ss:$8 sps:$4 sm:$0xff]   ;;  %181 = vmatprep.mubr.bf16.mxu0 %v4971_v1  ;;  %730 = vmatprep.mubr.bf16.mxu1 %v4971_v1  ;;  %v4876_v3 = vld [vmem:[%s6944_s0] ss:$8 sps:$4 sm:$0xff]   ;;  %v4878_v5 = vld [vmem:[%s6944_s0 + $0x14] ss:$8 sps:$4 sm:$0xff]  }
   0x2   :  { %v4874_v2 = vld [vmem:[%s6944_s0 + $0x2c] ss:$8 sps:$4 sm:$0xff]   ;;  %4870 = vset.pattern.permute.xlu0 %v4971_v1  ;;  %4871 = vset.pattern.permute.xlu1 %v4971_v1  ;;  %v4877_v4 = vld [vmem:[%s6944_s0 + $0x28] ss:$8 sps:$4 sm:$0xff]   ;;  %v4880_v6 = vld [vmem:[%s6944_s0 + $0x3c] ss:$8 sps:$4 sm:$0xff]  }
   0x3   :  { %149 = vmatprep.subr.bf16.mxu0 %v4872_v0  ;;  %698 = vmatprep.subr.bf16.mxu1 %v4874_v2  ;;  %v4882_v7 = vld [vmem:[%s6944_s0 + $0x10] ss:$8 sps:$4 sm:$0xff]   ;;  %v51_v9 = vld [vmem:[%s6944_s0 + $0x20] sm:$0x33]  ;;  %v4664_v10 = vld [vmem:[%s6944_s0 + $0x48] sm:$0x33] }
   0x4   :  { %150 = vmatpush1.bf16.msra.mxu0 %v4876_v3  ;;  %699 = vmatpush1.bf16.msra.mxu1 %v4877_v4  ;;  %v4883_v8 = vld [vmem:[%s6944_s0 + $0x38] ss:$8 sps:$4 sm:$0xff]   ;;  %v4650_v11 = vcombine.high %v51_v9, %v51_v9  ;;  %v4670_v12 = vcombine.high %v4664_v10, %v4664_v10  ;;  %v4649_v13 = vcombine.low %v51_v9, %v51_v9  ;;  %v4891_v17 = vld [vmem:[%s6944_s0 + $0x54] ss:$8 sps:$4 sm:$0xff]   ;;  %v4899_v22 = vld [vmem:[%s6944_s0 + $0x64] ss:$8 sps:$4 sm:$0xff]  }
   0x5   :  { %151 = vmatprep.subr.bf16.mxu0 %v4878_v5  ;;  %700 = vmatprep.subr.bf16.mxu1 %v4880_v6  ;;  %v4669_v14 = vcombine.low %v4664_v10, %v4664_v10  ;;  %v4894_v18 = vld [vmem:[%s6944_s0 + $0x7c] ss:$8 sps:$4 sm:$0xff]   ;;  %v4889_v20 = vld [vmem:[%s6944_s0 + $0x50] ss:$8 sps:$4 sm:$0xff]   ;;  %v4902_v23 = vld [vmem:[%s6944_s0 + $0x8c] ss:$8 sps:$4 sm:$0xff]  }
   0x6   :  { %v144_v15 = vsel %vm142_vm0, %v4649_v13, 0  ;;  %v5064_v19 = vld [vmem:[%s6950_s1] sm:$0xff]   ;;  %v4900_v25 = vld [vmem:[%s6944_s0 + $0x88] ss:$8 sps:$4 sm:$0xff]   ;;  %v4704_v27 = vld [vmem:[%s6944_s0 + $0x98] sm:$0x33] }
   0x7   :  { %v693_v16 = vsel %vm142_vm0, %v4669_v14, 0  ;;  %v4892_v21 = vld [vmem:[%s6944_s0 + $0x78] ss:$8 sps:$4 sm:$0xff]   ;;  %v4684_v26 = vld [vmem:[%s6944_s0 + $0x70] sm:$0x33]  ;;  %v4710_v29 = vcombine.high %v4704_v27, %v4704_v27  ;;  %v5099_v31 = vld [vmem:[%s6950_s1 + $0x8] sm:$0xff]   ;;  %v4709_v32 = vcombine.low %v4704_v27, %v4704_v27 }
   0x8   :  { %152 = vmatpush1.bf16.msra.mxu0 %v4882_v7  ;;  %701 = vmatpush1.bf16.msra.mxu1 %v4883_v8  ;;  %v4897_v24 = vld [vmem:[%s6944_s0 + $0x60] ss:$8 sps:$4 sm:$0xff]   ;;  %v4690_v28 = vcombine.high %v4684_v26, %v4684_v26  ;;  %v4689_v30 = vcombine.low %v4684_v26, %v4684_v26  ;;  %v4914_v35 = vld [vmem:[%s6944_s0 + $0xa4] ss:$8 sps:$4 sm:$0xff]   ;;  %v5120_v37 = vld [vmem:[%s6950_s1 + $0x10] sm:$0xff]  }
   0x9   :  { %4651 = vmatprep.subr.msk.bf16.mxu0 %vm142_vm0, %v4650_v11  ;;  %4671 = vmatprep.subr.msk.bf16.mxu1 %vm142_vm0, %v4670_v12  ;;  %v1745_v34 = vsel %vm142_vm0, %v4709_v32, 0  ;;  %v4917_v36 = vld [vmem:[%s6944_s0 + $0xcc] ss:$8 sps:$4 sm:$0xff]   ;;  %v43_v38 = vld [vmem:[%s6951_s2] sm:$0xff]  ;;  %v46_v41 = vld [vmem:[%s6951_s2 + $0x18] sm:$0xff] }
   0xa   :  { %v1219_v33 = vsel %vm142_vm0, %v4689_v30, 0  ;;  %288 = vperm.xlu0 %4870, %v43_v38   ;;  %v44_v39 = vld [vmem:[%s6951_s2 + $0x8] sm:$0xff]  ;;  %v45_v40 = vld [vmem:[%s6951_s2 + $0x10] sm:$0xff]  ;;  %v5143_v42 = vld [vmem:[%s6950_s1 + $0x18] sm:$0xff]  }
   0xb   :  { %298 = vperm.xlu1 %4871, %v45_v40   ;;  %v5154_v43 = vld [vmem:[%s6950_s1 + $0x20] sm:$0xff]   ;;  %v5165_v44 = vld [vmem:[%s6950_s1 + $0x28] sm:$0xff]   ;;  %v5176_v45 = vld [vmem:[%s6950_s1 + $0x30] sm:$0xff]  }
   0xc   :  { %154 = vmatpush1.bf16.msra.mxu0 %v144_v15  ;;  %703 = vmatpush1.bf16.msra.mxu1 %v693_v16  ;;  %v5187_v46 = vld [vmem:[%s6950_s1 + $0x38] sm:$0xff]   ;;  %v4912_v47 = vld [vmem:[%s6944_s0 + $0xa0] ss:$8 sps:$4 sm:$0xff]   ;;  %v4936_v2 = vld [vmem:[%s6944_s0 + $0x104] ss:$8 sps:$4 sm:$0xff]  }
   0xd   :  { %1224 = vmatprep.subr.bf16.mxu0 %v4891_v17  ;;  %1750 = vmatprep.subr.bf16.mxu1 %v4894_v18  ;;  %v4915_v48 = vld [vmem:[%s6944_s0 + $0xc8] ss:$8 sps:$4 sm:$0xff]   ;;  %v4920_v49 = vld [vmem:[%s6944_s0 + $0xb4] ss:$8 sps:$4 sm:$0xff]   ;;  %v4724_v51 = vld [vmem:[%s6944_s0 + $0xc0] sm:$0x33] }
   0xe   :  { %293 = vperm.xlu0 %4870, %v44_v39   ;;  %v4923_v50 = vld [vmem:[%s6944_s0 + $0xdc] ss:$8 sps:$4 sm:$0xff]   ;;  %v4744_v52 = vld [vmem:[%s6944_s0 + $0xe8] sm:$0x33]  ;;  %v4918_v53 = vld [vmem:[%s6944_s0 + $0xb0] ss:$8 sps:$4 sm:$0xff]   ;;  %v4730_v55 = vcombine.high %v4724_v51, %v4724_v51  ;;  %v4729_v57 = vcombine.low %v4724_v51, %v4724_v51 }
   0xf   :  { %4652 = vmatmul.mubr.msk.bf16.vlgmr.msra.gmra.mrb[0].mxu0 %vm117_vm1, %v5064_v19  ;;  %4672 = vmatmul.mubr.msk.bf16.vlgmr.msra.gmra.mrb[0].mxu1 %vm117_vm1, %v5064_v19  ;;  %v4921_v54 = vld [vmem:[%s6944_s0 + $0xd8] ss:$8 sps:$4 sm:$0xff]   ;;  %v4750_v56 = vcombine.high %v4744_v52, %v4744_v52  ;;  %v4749_v58 = vcombine.low %v4744_v52, %v4744_v52  ;;  %v4930_v61 = vld [vmem:[%s6944_s0 + $0xf4] ss:$8 sps:$4 sm:$0xff]   ;;  %v4937_v7 = vld [vmem:[%s6944_s0 + $0x128] ss:$8 sps:$4 sm:$0xff]  }
  0x10   :  { %1225 = vmatpush1.bf16.msra.mxu0 %v4889_v20  ;;  %1751 = vmatpush1.bf16.msra.mxu1 %v4892_v21  ;;  %v2271_v59 = vsel %vm142_vm0, %v4729_v57, 0  ;;  %v4933_v62 = vld [vmem:[%s6944_s0 + $0x11c] ss:$8 sps:$4 sm:$0xff]   ;;  %v4928_v63 = vld [vmem:[%s6944_s0 + $0xf0] ss:$8 sps:$4 sm:$0xff]  }
  0x11   :  { %191 = vmatprep.mubr.bf16.mxu0 %v4971_v1  ;;  %740 = vmatprep.mubr.bf16.mxu1 %v4971_v1  ;;  %v2797_v60 = vsel %vm142_vm0, %v4749_v58, 0  ;;  %v4931_v0 = vld [vmem:[%s6944_s0 + $0x118] ss:$8 sps:$4 sm:$0xff]   ;;  %v4939_v3 = vld [vmem:[%s6944_s0 + $0x12c] ss:$8 sps:$4 sm:$0xff]  }
  0x12   :  { %1226 = vmatprep.subr.bf16.mxu0 %v4899_v22  ;;  %1752 = vmatprep.subr.bf16.mxu1 %v4902_v23  ;;  %v4764_v4 = vld [vmem:[%s6944_s0 + $0x110] sm:$0x33]  ;;  %v4784_v5 = vld [vmem:[%s6944_s0 + $0x138] sm:$0x33]  ;;  %v4934_v6 = vld [vmem:[%s6944_s0 + $0x100] ss:$8 sps:$4 sm:$0xff]  }
  0x13   :  { %303 = vperm.xlu1 %4871, %v46_v41   ;;  %v4770_v8 = vcombine.high %v4764_v4, %v4764_v4  ;;  %v4790_v9 = vcombine.high %v4784_v5, %v4784_v5  ;;  %v4769_v10 = vcombine.low %v4764_v4, %v4764_v4  ;;  %v4789_v11 = vcombine.low %v4784_v5, %v4784_v5  ;;  %s6872_s0 = smov 0  }
  0x14   :  { %1227 = vmatpush1.bf16.msra.mxu0 %v4897_v24  ;;  %1753 = vmatpush1.bf16.msra.mxu1 %v4900_v25 }
  0x15   :  { %4691 = vmatprep.subr.msk.bf16.mxu0 %vm142_vm0, %v4690_v28  ;;  %4711 = vmatprep.subr.msk.bf16.mxu1 %vm142_vm0, %v4710_v29  ;;  %v3323_v12 = vsel %vm142_vm0, %v4769_v10, 0  ;;  %v3849_v13 = vsel %vm142_vm0, %v4789_v11, 0 }
  0x17   :  { %4653 = vmatmul.mubr.msk.bf16.gmra.mrb[4].mxu0 %vm117_vm1, %v5099_v31  ;;  %4673 = vmatmul.mubr.msk.bf16.gmra.mrb[4].mxu1 %vm117_vm1, %v5099_v31 }
  0x18   :  { %201 = vmatprep.mubr.bf16.mxu0 %v4971_v1  ;;  %750 = vmatprep.mubr.bf16.mxu1 %v4971_v1 }
  0x19   :  { %1229 = vmatpush1.bf16.msra.mxu0 %v1219_v33  ;;  %1755 = vmatpush1.bf16.msra.mxu1 %v1745_v34 }
  0x1a   :  { %2276 = vmatprep.subr.bf16.mxu0 %v4914_v35  ;;  %2802 = vmatprep.subr.bf16.mxu1 %v4917_v36 }
  0x1f   :  { %4654 = vmatmul.mubr.msk.bf16.gmra.mrb[8].mxu0 %vm117_vm1, %v5120_v37  ;;  %4674 = vmatmul.mubr.msk.bf16.gmra.mrb[8].mxu1 %vm117_vm1, %v5120_v37 }
  0x20   :  { %211 = vmatprep.mubr.bf16.mxu0 %v4971_v1  ;;  %760 = vmatprep.mubr.bf16.mxu1 %v4971_v1 }
  0x27   :  { %4655 = vmatmul.mubr.msk.bf16.gmra.mrb[12].mxu0 %vm117_vm1, %v5143_v42  ;;  %4675 = vmatmul.mubr.msk.bf16.gmra.mrb[12].mxu1 %vm117_vm1, %v5143_v42 }
  0x28   :  { %221 = vmatprep.mubr.bf16.mxu0 %v4971_v1  ;;  %770 = vmatprep.mubr.bf16.mxu1 %v4971_v1 }
  0x2f   :  { %4656 = vmatmul.mubr.msk.bf16.gmra.mrb[16].mxu0 %vm117_vm1, %v5154_v43  ;;  %4676 = vmatmul.mubr.msk.bf16.gmra.mrb[16].mxu1 %vm117_vm1, %v5154_v43 }
  0x30   :  { %231 = vmatprep.mubr.bf16.mxu0 %v4971_v1  ;;  %780 = vmatprep.mubr.bf16.mxu1 %v4971_v1 }
  0x37   :  { %4657 = vmatmul.mubr.msk.bf16.gmra.mrb[20].mxu0 %vm117_vm1, %v5165_v44  ;;  %4677 = vmatmul.mubr.msk.bf16.gmra.mrb[20].mxu1 %vm117_vm1, %v5165_v44 }
  0x38   :  { %241 = vmatprep.mubr.bf16.mxu0 %v4971_v1  ;;  %790 = vmatprep.mubr.bf16.mxu1 %v4971_v1 }
  0x3f   :  { %4658 = vmatmul.mubr.msk.bf16.gmra.mrb[24].mxu0 %vm117_vm1, %v5176_v45  ;;  %4678 = vmatmul.mubr.msk.bf16.gmra.mrb[24].mxu1 %vm117_vm1, %v5176_v45 }
  0x40   :  { %251 = vmatprep.mubr.bf16.mxu0 %v4971_v1  ;;  %800 = vmatprep.mubr.bf16.mxu1 %v4971_v1 }
  0x47   :  { %4659 = vmatmul.mubr.msk.bf16.gmra.mrb[28].mxu0 %vm117_vm1, %v5187_v46  ;;  %4679 = vmatmul.mubr.msk.bf16.gmra.mrb[28].mxu1 %vm117_vm1, %v5187_v46 }
  0x48   :  { %1256 = vmatprep.mubr.bf16.mxu0 %v4971_v1  ;;  %1782 = vmatprep.mubr.bf16.mxu1 %v4971_v1 }
  0x4f   :  { %4692 = vmatmul.mubr.msk.bf16.vlgmr.msra.gmra.mrb[32].mxu0 %vm117_vm1, %v5064_v19  ;;  %4712 = vmatmul.mubr.msk.bf16.vlgmr.msra.gmra.mrb[32].mxu1 %vm117_vm1, %v5064_v19 }
  0x50   :  { %2277 = vmatpush1.bf16.msra.mxu0 %v4912_v47  ;;  %2803 = vmatpush1.bf16.msra.mxu1 %v4915_v48 }
  0x51   :  { %1266 = vmatprep.mubr.bf16.mxu0 %v4971_v1  ;;  %1792 = vmatprep.mubr.bf16.mxu1 %v4971_v1 }
  0x52   :  { %2278 = vmatprep.subr.bf16.mxu0 %v4920_v49  ;;  %2804 = vmatprep.subr.bf16.mxu1 %v4923_v50 }
  0x54   :  { %2279 = vmatpush1.bf16.msra.mxu0 %v4918_v53  ;;  %2805 = vmatpush1.bf16.msra.mxu1 %v4921_v54 }
  0x55   :  { %4731 = vmatprep.subr.msk.bf16.mxu0 %vm142_vm0, %v4730_v55  ;;  %4751 = vmatprep.subr.msk.bf16.mxu1 %vm142_vm0, %v4750_v56 }
  0x57   :  { %4693 = vmatmul.mubr.msk.bf16.gmra.mrb[36].mxu0 %vm117_vm1, %v5099_v31  ;;  %4713 = vmatmul.mubr.msk.bf16.gmra.mrb[36].mxu1 %vm117_vm1, %v5099_v31 }
  0x58   :  { %1276 = vmatprep.mubr.bf16.mxu0 %v4971_v1  ;;  %1802 = vmatprep.mubr.bf16.mxu1 %v4971_v1 }
  0x59   :  { %2281 = vmatpush1.bf16.msra.mxu0 %v2271_v59  ;;  %2807 = vmatpush1.bf16.msra.mxu1 %v2797_v60 }
  0x5a   :  { %3328 = vmatprep.subr.bf16.mxu0 %v4930_v61  ;;  %3854 = vmatprep.subr.bf16.mxu1 %v4933_v62  ;;  %v335_v62 = vlaneseq }
  0x5c   :  { %v336_v55 = vshrl.u32 %v335_v62, 7  ;;  %vm5529_vm2 = vcmp.lt.s32.totalorder %v335_v62, 169 }
  0x5f   :  { %4694 = vmatmul.mubr.msk.bf16.gmra.mrb[40].mxu0 %vm117_vm1, %v5120_v37  ;;  %4714 = vmatmul.mubr.msk.bf16.gmra.mrb[40].mxu1 %vm117_vm1, %v5120_v37 }
  0x60   :  { %1286 = vmatprep.mubr.bf16.mxu0 %v4971_v1  ;;  %1812 = vmatprep.mubr.bf16.mxu1 %v4971_v1 }
  0x67   :  { %4695 = vmatmul.mubr.msk.bf16.gmra.mrb[44].mxu0 %vm117_vm1, %v5143_v42  ;;  %4715 = vmatmul.mubr.msk.bf16.gmra.mrb[44].mxu1 %vm117_vm1, %v5143_v42 }
  0x68   :  { %1296 = vmatprep.mubr.bf16.mxu0 %v4971_v1  ;;  %1822 = vmatprep.mubr.bf16.mxu1 %v4971_v1 }
  0x6f   :  { %4696 = vmatmul.mubr.msk.bf16.gmra.mrb[48].mxu0 %vm117_vm1, %v5154_v43  ;;  %4716 = vmatmul.mubr.msk.bf16.gmra.mrb[48].mxu1 %vm117_vm1, %v5154_v43 }
  0x70   :  { %1306 = vmatprep.mubr.bf16.mxu0 %v4971_v1  ;;  %1832 = vmatprep.mubr.bf16.mxu1 %v4971_v1 }
  0x77   :  { %4697 = vmatmul.mubr.msk.bf16.gmra.mrb[52].mxu0 %vm117_vm1, %v5165_v44  ;;  %4717 = vmatmul.mubr.msk.bf16.gmra.mrb[52].mxu1 %vm117_vm1, %v5165_v44 }
  0x78   :  { %1316 = vmatprep.mubr.bf16.mxu0 %v4971_v1  ;;  %1842 = vmatprep.mubr.bf16.mxu1 %v4971_v1 }
  0x7f   :  { %4698 = vmatmul.mubr.msk.bf16.gmra.mrb[56].mxu0 %vm117_vm1, %v5176_v45  ;;  %4718 = vmatmul.mubr.msk.bf16.gmra.mrb[56].mxu1 %vm117_vm1, %v5176_v45 }
  0x80   :  { %1326 = vmatprep.mubr.bf16.mxu0 %v4971_v1  ;;  %1852 = vmatprep.mubr.bf16.mxu1 %v4971_v1 }
  0x87   :  { %4699 = vmatmul.mubr.msk.bf16.gmra.mrb[60].mxu0 %vm117_vm1, %v5187_v46  ;;  %4719 = vmatmul.mubr.msk.bf16.gmra.mrb[60].mxu1 %vm117_vm1, %v5187_v46 }
  0x88   :  { %2308 = vmatprep.mubr.bf16.mxu0 %v4971_v1  ;;  %2834 = vmatprep.mubr.bf16.mxu1 %v4971_v1 }
  0x8f   :  { %4732 = vmatmul.mubr.msk.bf16.vlgmr.msra.gmra.mrb[64].mxu0 %vm117_vm1, %v5064_v19  ;;  %4752 = vmatmul.mubr.msk.bf16.vlgmr.msra.gmra.mrb[64].mxu1 %vm117_vm1, %v5064_v19 }
  0x90   :  { %3329 = vmatpush1.bf16.msra.mxu0 %v4928_v63  ;;  %3855 = vmatpush1.bf16.msra.mxu1 %v4931_v0 }
  0x91   :  { %2318 = vmatprep.mubr.bf16.mxu0 %v4971_v1  ;;  %2844 = vmatprep.mubr.bf16.mxu1 %v4971_v1 }
  0x92   :  { %3330 = vmatprep.subr.bf16.mxu0 %v4936_v2  ;;  %3856 = vmatprep.subr.bf16.mxu1 %v4939_v3 }
  0x94   :  { %3331 = vmatpush1.bf16.msra.mxu0 %v4934_v6  ;;  %3857 = vmatpush1.bf16.msra.mxu1 %v4937_v7 }
  0x95   :  { %4771 = vmatprep.subr.msk.bf16.mxu0 %vm142_vm0, %v4770_v8  ;;  %4791 = vmatprep.subr.msk.bf16.mxu1 %vm142_vm0, %v4790_v9 }
  0x97   :  { %4733 = vmatmul.mubr.msk.bf16.gmra.mrb[68].mxu0 %vm117_vm1, %v5099_v31  ;;  %4753 = vmatmul.mubr.msk.bf16.gmra.mrb[68].mxu1 %vm117_vm1, %v5099_v31 }
  0x98   :  { %2328 = vmatprep.mubr.bf16.mxu0 %v4971_v1  ;;  %2854 = vmatprep.mubr.bf16.mxu1 %v4971_v1 }
  0x99   :  { %3333 = vmatpush1.bf16.msra.mxu0 %v3323_v12  ;;  %3859 = vmatpush1.bf16.msra.mxu1 %v3849_v13  ;;  %v4972_v13 = vmov 1966171168  }
  0x9a   :  { %v333_v63 = vunpack.c.l.s4 %v4972_v13 }
  0x9f   :  { %4734 = vmatmul.mubr.msk.bf16.gmra.mrb[72].mxu0 %vm117_vm1, %v5120_v37  ;;  %4754 = vmatmul.mubr.msk.bf16.gmra.mrb[72].mxu1 %vm117_vm1, %v5120_v37 }
  0xa0   :  { %2338 = vmatprep.mubr.bf16.mxu0 %v4971_v1  ;;  %2864 = vmatprep.mubr.bf16.mxu1 %v4971_v1 }
  0xa7   :  { %4735 = vmatmul.mubr.msk.bf16.gmra.mrb[76].mxu0 %vm117_vm1, %v5143_v42  ;;  %4755 = vmatmul.mubr.msk.bf16.gmra.mrb[76].mxu1 %vm117_vm1, %v5143_v42 }
  0xa8   :  { %2348 = vmatprep.mubr.bf16.mxu0 %v4971_v1  ;;  %2874 = vmatprep.mubr.bf16.mxu1 %v4971_v1 }
  0xaf   :  { %4736 = vmatmul.mubr.msk.bf16.gmra.mrb[80].mxu0 %vm117_vm1, %v5154_v43  ;;  %4756 = vmatmul.mubr.msk.bf16.gmra.mrb[80].mxu1 %vm117_vm1, %v5154_v43 }
  0xb0   :  { %2358 = vmatprep.mubr.bf16.mxu0 %v4971_v1  ;;  %2884 = vmatprep.mubr.bf16.mxu1 %v4971_v1 }
  0xb7   :  { %4737 = vmatmul.mubr.msk.bf16.gmra.mrb[84].mxu0 %vm117_vm1, %v5165_v44  ;;  %4757 = vmatmul.mubr.msk.bf16.gmra.mrb[84].mxu1 %vm117_vm1, %v5165_v44 }
  0xb8   :  { %2368 = vmatprep.mubr.bf16.mxu0 %v4971_v1  ;;  %2894 = vmatprep.mubr.bf16.mxu1 %v4971_v1 }
  0xbf   :  { %4738 = vmatmul.mubr.msk.bf16.gmra.mrb[88].mxu0 %vm117_vm1, %v5176_v45  ;;  %4758 = vmatmul.mubr.msk.bf16.gmra.mrb[88].mxu1 %vm117_vm1, %v5176_v45 }
  0xc0   :  { %2378 = vmatprep.mubr.bf16.mxu0 %v4971_v1  ;;  %2904 = vmatprep.mubr.bf16.mxu1 %v4971_v1 }
  0xc7   :  { %4739 = vmatmul.mubr.msk.bf16.gmra.mrb[92].mxu0 %vm117_vm1, %v5187_v46  ;;  %4759 = vmatmul.mubr.msk.bf16.gmra.mrb[92].mxu1 %vm117_vm1, %v5187_v46 }
  0xc8   :  { %3360 = vmatprep.mubr.bf16.mxu0 %v4971_v1  ;;  %3886 = vmatprep.mubr.bf16.mxu1 %v4971_v1 }
  0xcf   :  { %4772 = vmatmul.mubr.msk.bf16.vlgmr.msra.gmra.mrb[96].mxu0 %vm117_vm1, %v5064_v19  ;;  %4792 = vmatmul.mubr.msk.bf16.vlgmr.msra.gmra.mrb[96].mxu1 %vm117_vm1, %v5064_v19 }
  0xd0   :  { %3370 = vmatprep.mubr.bf16.mxu0 %v4971_v1  ;;  %3896 = vmatprep.mubr.bf16.mxu1 %v4971_v1 }
  0xd7   :  { %4773 = vmatmul.mubr.msk.bf16.gmra.mrb[100].mxu0 %vm117_vm1, %v5099_v31  ;;  %4793 = vmatmul.mubr.msk.bf16.gmra.mrb[100].mxu1 %vm117_vm1, %v5099_v31 }
  0xd8   :  { %3380 = vmatprep.mubr.bf16.mxu0 %v4971_v1  ;;  %3906 = vmatprep.mubr.bf16.mxu1 %v4971_v1 }
  0xdf   :  { %4774 = vmatmul.mubr.msk.bf16.gmra.mrb[104].mxu0 %vm117_vm1, %v5120_v37  ;;  %4794 = vmatmul.mubr.msk.bf16.gmra.mrb[104].mxu1 %vm117_vm1, %v5120_v37 }
  0xe0   :  { %3390 = vmatprep.mubr.bf16.mxu0 %v4971_v1  ;;  %3916 = vmatprep.mubr.bf16.mxu1 %v4971_v1 }
  0xe2   :  { %v5371_v14 = vpop.f32.mrb[0].mxu0  ;;  %v5373_v15 = vpop.f32.mrb[0].mxu1 }
  0xe3   :  { %v5375_v16 = vpop.f32.mrb[1].mxu0  ;;  %v5377_v17 = vpop.f32.mrb[1].mxu1 }
  0xe4   :  { %v5379_v18 = vpop.f32.mrb[2].mxu0  ;;  %v5381_v19 = vpop.f32.mrb[2].mxu1 }
  0xe5   :  { %v5383_v20 = vpop.f32.mrb[3].mxu0  ;;  %v5385_v21 = vpop.f32.mrb[3].mxu1 }
  0xe7   :  { %4775 = vmatmul.mubr.msk.bf16.gmra.mrb[108].mxu0 %vm117_vm1, %v5143_v42  ;;  %4795 = vmatmul.mubr.msk.bf16.gmra.mrb[108].mxu1 %vm117_vm1, %v5143_v42 }
  0xe8   :  { %3400 = vmatprep.mubr.bf16.mxu0 %v4971_v1  ;;  %3926 = vmatprep.mubr.bf16.mxu1 %v4971_v1 }
  0xea   :  { %v5393_v22 = vpop.f32.mrb[4].mxu0  ;;  %v5395_v23 = vpop.f32.mrb[4].mxu1 }
  0xeb   :  { %v5397_v24 = vpop.f32.mrb[5].mxu0  ;;  %v5399_v25 = vpop.f32.mrb[5].mxu1 }
  0xec   :  { %v5401_v26 = vpop.f32.mrb[6].mxu0  ;;  %v5403_v27 = vpop.f32.mrb[6].mxu1 }
  0xed   :  { %v5405_v28 = vpop.f32.mrb[7].mxu0  ;;  %v5407_v29 = vpop.f32.mrb[7].mxu1 }
  0xee   :  { %6967 = vst [vmem:[#allocation4_spill] sm:$0xff] %v5405_v28  ;;  %6968 = vst [vmem:[#allocation5_spill] sm:$0xff] %v5407_v29 }
  0xef   :  { %4776 = vmatmul.mubr.msk.bf16.gmra.mrb[112].mxu0 %vm117_vm1, %v5154_v43  ;;  %4796 = vmatmul.mubr.msk.bf16.gmra.mrb[112].mxu1 %vm117_vm1, %v5154_v43 }
  0xf0   :  { %3410 = vmatprep.mubr.bf16.mxu0 %v4971_v1  ;;  %3936 = vmatprep.mubr.bf16.mxu1 %v4971_v1 }
  0xf2   :  { %v5415_v30 = vpop.f32.mrb[8].mxu0  ;;  %v5417_v31 = vpop.f32.mrb[8].mxu1 }
  0xf3   :  { %v5423_v34 = vpop.f32.mrb[9].mxu0  ;;  %v5425_v35 = vpop.f32.mrb[9].mxu1 }
  0xf4   :  { %v5431_v38 = vpop.f32.mrb[10].mxu0  ;;  %v5433_v39 = vpop.f32.mrb[10].mxu1 }
  0xf5   :  { %v5439_v42 = vpop.f32.mrb[11].mxu0  ;;  %v5441_v43 = vpop.f32.mrb[11].mxu1 }
  0xf7   :  { %4777 = vmatmul.mubr.msk.bf16.gmra.mrb[116].mxu0 %vm117_vm1, %v5165_v44  ;;  %4797 = vmatmul.mubr.msk.bf16.gmra.mrb[116].mxu1 %vm117_vm1, %v5165_v44  ;;  %v5511_v44 = vpop.permute.xlu0 %288 }
  0xf8   :  { %3420 = vmatprep.mubr.bf16.mxu0 %v4971_v1  ;;  %3946 = vmatprep.mubr.bf16.mxu1 %v4971_v1 }
  0xfa   :  { %v5453_v49 = vpop.f32.mrb[12].mxu0  ;;  %v5455_v50 = vpop.f32.mrb[12].mxu1 }
  0xfb   :  { %v5461_v53 = vpop.f32.mrb[13].mxu0  ;;  %v5463_v54 = vpop.f32.mrb[13].mxu1 }
  0xfc   :  { %v5469_v56 = vpop.f32.mrb[14].mxu0  ;;  %v5471_v57 = vpop.f32.mrb[14].mxu1 }
  0xfd   :  { %6969 = vst [vmem:[#allocation6_spill] sm:$0xff] %v5471_v57  ;;  %v5477_v60 = vpop.f32.mrb[15].mxu0  ;;  %v5479_v61 = vpop.f32.mrb[15].mxu1 }
  0xfe   :  { %6970 = vst [vmem:[#allocation7_spill] sm:$0xff] %v5477_v60  ;;  %6971 = vst [vmem:[#allocation8_spill] sm:$0xff] %v5479_v61  ;;  %v6972_v61 = vmax.f32 %v5371_v14, %v5415_v30  ;;  %v5527_v14 = vpop.permute.xlu0 %293 }
  0xff   :  { %4778 = vmatmul.mubr.msk.bf16.gmra.mrb[120].mxu0 %vm117_vm1, %v5176_v45  ;;  %4798 = vmatmul.mubr.msk.bf16.gmra.mrb[120].mxu1 %vm117_vm1, %v5176_v45 }
 0x100   :  { %3430 = vmatprep.mubr.bf16.mxu0 %v4971_v1  ;;  %3956 = vmatprep.mubr.bf16.mxu1 %v4971_v1 }
 0x102   :  { %v223_v0 = vpop.f32.mrb[16].mxu0  ;;  %v772_v2 = vpop.f32.mrb[16].mxu1 }
 0x103   :  { %v225_v3 = vpop.f32.mrb[17].mxu0  ;;  %v774_v4 = vpop.f32.mrb[17].mxu1 }
 0x104   :  { %v227_v5 = vpop.f32.mrb[18].mxu0  ;;  %v776_v6 = vpop.f32.mrb[18].mxu1 }
 0x105   :  { %v229_v7 = vpop.f32.mrb[19].mxu0  ;;  %v778_v8 = vpop.f32.mrb[19].mxu1 }
 0x107   :  { %4779 = vmatmul.mubr.msk.bf16.gmra.mrb[124].mxu0 %vm117_vm1, %v5187_v46  ;;  %4799 = vmatmul.mubr.msk.bf16.gmra.mrb[124].mxu1 %vm117_vm1, %v5187_v46  ;;  %v334_v46 = vunpack.c.0.s8 %v333_v63  ;;  %v6973_v63 = vmax.f32 %v5373_v15, %v5417_v31 }
 0x109   :  { %v5513_v33 = vsub.s32 %v334_v46, %v336_v55  ;;  %v6975_v55 = vmax.f32 %v5377_v17, %v5425_v35  ;;  %v6979_v17 = vmax.f32 %v5381_v19, %v5433_v39 }
 0x10a   :  { %v5495_v9 = vpop.f32.mrb[20].mxu0  ;;  %v5497_v45 = vpop.f32.mrb[20].mxu1 }
 0x10b   :  { %v5499_v10 = vpop.f32.mrb[21].mxu0  ;;  %v5501_v1 = vpop.f32.mrb[21].mxu1 }
 0x10c   :  { %v5503_v11 = vpop.f32.mrb[22].mxu0  ;;  %v5505_v12 = vpop.f32.mrb[22].mxu1 }
 0x10d   :  { %v5507_v59 = vpop.f32.mrb[23].mxu0  ;;  %v5509_v58 = vpop.f32.mrb[23].mxu1 }
 0x112   :  { %v243_v52 = vpop.f32.mrb[24].mxu0  ;;  %v792_v51 = vpop.f32.mrb[24].mxu1 }
 0x113   :  { %v270_v48 = vmax.f32 %v223_v0, %v243_v52  ;;  %v819_v47 = vmax.f32 %v772_v2, %v792_v51  ;;  %v245_v41 = vpop.f32.mrb[25].mxu0  ;;  %v794_v40 = vpop.f32.mrb[25].mxu1 }
 0x114   :  { %v271_v37 = vmax.f32 %v225_v3, %v245_v41  ;;  %v820_v36 = vmax.f32 %v774_v4, %v794_v40  ;;  %v247_v13 = vpop.f32.mrb[26].mxu0  ;;  %v796_v32 = vpop.f32.mrb[26].mxu1  ;;  %v6974_v41 = vmax.f32 %v5375_v16, %v5423_v34  ;;  %v6978_v16 = vmax.f32 %v5379_v18, %v5431_v38 }
 0x115   :  { %v278_v29 = vmax.f32 %v6972_v61, %v270_v48  ;;  %v827_v60 = vmax.f32 %v6973_v63, %v819_v47  ;;  %v272_v28 = vmax.f32 %v227_v5, %v247_v13  ;;  %v821_v57 = vmax.f32 %v776_v6, %v796_v32  ;;  %v249_v52 = vpop.f32.mrb[27].mxu0  ;;  %v798_v51 = vpop.f32.mrb[27].mxu1 }
 0x116   :  { %v279_v40 = vmax.f32 %v6974_v41, %v271_v37  ;;  %v828_v0 = vmax.f32 %v6975_v55, %v820_v36  ;;  %v273_v2 = vmax.f32 %v229_v7, %v249_v52  ;;  %v822_v3 = vmax.f32 %v778_v8, %v798_v51 }
 0x117   :  { %v306_v15 = vadd.f32 %v5511_v44, %v278_v29  ;;  %v835_v31 = vadd.f32 %v827_v60, %v5511_v44  ;;  %v280_v32 = vmax.f32 %v6978_v16, %v272_v28  ;;  %v829_v34 = vmax.f32 %v6979_v17, %v821_v57 }
 0x118   :  { %v307_v35 = vadd.f32 %v5511_v44, %v279_v40  ;;  %v836_v36 = vadd.f32 %v828_v0, %v5511_v44  ;;  %v6980_v37 = vmax.f32 %v5383_v20, %v5439_v42  ;;  %v6981_v29 = vmax.f32 %v5385_v21, %v5441_v43 }
 0x119   :  { %v314_v60 = vmax.f32 %v306_v15, 0.0  ;;  %v843_v61 = vmax.f32 %v835_v31, 0.0  ;;  %v308_v18 = vadd.f32 %v5527_v14, %v280_v32  ;;  %v837_v28 = vadd.f32 %v829_v34, %v5527_v14 }
 0x11a   :  { %v281_v47 = vmax.f32 %v6980_v37, %v273_v2  ;;  %v830_v48 = vmax.f32 %v6981_v29, %v822_v3  ;;  %v315_v19 = vmax.f32 %v307_v35, 0.0  ;;  %v844_v38 = vmax.f32 %v836_v36, 0.0  ;;  %v253_v62 = vpop.f32.mrb[28].mxu0  ;;  %v802_v4 = vpop.f32.mrb[28].mxu1 }
 0x11b   :  { %v316_v20 = vmax.f32 %v308_v18, 0.0  ;;  %v845_v42 = vmax.f32 %v837_v28, 0.0  ;;  %v274_v5 = vmax.f32 %v5495_v9, %v253_v62  ;;  %v823_v21 = vmax.f32 %v5497_v45, %v802_v4  ;;  %v5555_v43 = vpop.f32.mrb[29].mxu0  ;;  %v5557_v6 = vpop.f32.mrb[29].mxu1 }
 0x11c   :  { %v309_v39 = vadd.f32 %v5527_v14, %v281_v47  ;;  %v838_v57 = vadd.f32 %v830_v48, %v5527_v14  ;;  %v330_v7 = vcombine.low %v314_v60, %v315_v19  ;;  %v331_v8 = vcombine.high %v314_v60, %v315_v19  ;;  %v5559_v63 = vpop.f32.mrb[30].mxu0  ;;  %v5561_v52 = vpop.f32.mrb[30].mxu1 }
 0x11d   :  { %v859_v46 = vcombine.low %v843_v61, %v844_v38  ;;  %v860_v13 = vcombine.high %v843_v61, %v844_v38  ;;  %v6982_v40 = vmax.f32 %v5393_v22, %v5453_v49  ;;  %v6983_v45 = vmax.f32 %v5395_v23, %v5455_v50  ;;  %v5573_v0 = vpop.f32.mrb[31].mxu0  ;;  %v5575_v2 = vpop.f32.mrb[31].mxu1 }
 0x11e   :  { %v317_v51 = vmax.f32 %v309_v39, 0.0  ;;  %v846_v41 = vmax.f32 %v838_v57, 0.0  ;;  %v338_v3 = vrot.slane %v330_v7, %v5513_v33  ;;  %v345_v15 = vrot.slane %v331_v8, %v5513_v33  ;;  %v5585_v48 = vpop.permute.xlu1 %298 }
 0x11f   :  { %v5566_v9 = vmax.f32 %v6982_v40, %v274_v5  ;;  %v5571_v55 = vmax.f32 %v6983_v45, %v823_v21  ;;  %v867_v31 = vrot.slane %v859_v46, %v5513_v33  ;;  %v874_v16 = vrot.slane %v860_v13, %v5513_v33 }
 0x120   :  { %v380_v22 = vcombine.low %v316_v20, %v317_v51  ;;  %v381_v49 = vcombine.high %v316_v20, %v317_v51  ;;  %v909_v32 = vcombine.low %v845_v42, %v846_v41  ;;  %v910_v17 = vcombine.high %v845_v42, %v846_v41 }
 0x121   :  { %v346_v34 = vcombine.high %v338_v3, %v338_v3  ;;  %v347_v23 = vcombine.high %v345_v15, %v345_v15  ;;  %v354_v50 = vrot.slane %v338_v3, %v5513_v33  ;;  %v361_v35 = vrot.slane %v345_v15, %v5513_v33 }
 0x122   :  { %v875_v36 = vcombine.high %v867_v31, %v867_v31  ;;  %v876_v37 = vcombine.high %v874_v16, %v874_v16  ;;  %v883_v47 = vrot.slane %v867_v31, %v5513_v33  ;;  %v890_v29 = vrot.slane %v874_v16, %v5513_v33  ;;  %v5593_v19 = vpop.f32.mrb[32].mxu0  ;;  %v5595_v38 = vpop.f32.mrb[32].mxu1 }
 0x123   :  { %v368_v60 = vrot.slane %v346_v34, %v5513_v33  ;;  %v375_v61 = vrot.slane %v347_v23, %v5513_v33  ;;  %v376_v18 = vcombine.high %v354_v50, %v354_v50  ;;  %v377_v28 = vcombine.high %v361_v35, %v361_v35  ;;  %566 = vst.msk [vmem:[#allocation2] ss:$8 sm:$0x3] %vm5529_vm2, %v354_v50  ;;  %v5603_v20 = vpop.f32.mrb[33].mxu0  ;;  %v5605_v42 = vpop.f32.mrb[33].mxu1 }
 0x124   :  { %578 = vst.msk [vmem:[#allocation2 + $0x40] ss:$8 sm:$0x3] %vm5529_vm2, %v361_v35  ;;  %v897_v39 = vrot.slane %v875_v36, %v5513_v33  ;;  %v904_v57 = vrot.slane %v876_v37, %v5513_v33  ;;  %v905_v62 = vcombine.high %v883_v47, %v883_v47  ;;  %v906_v4 = vcombine.high %v890_v29, %v890_v29  ;;  %v5617_v46 = vpop.f32.mrb[34].mxu0  ;;  %v5619_v13 = vpop.f32.mrb[34].mxu1 }
 0x125   :  { %1092 = vst.msk [vmem:[#allocation2 + $0x1] ss:$8 sm:$0x3] %vm5529_vm2, %v883_v47  ;;  %1104 = vst.msk [vmem:[#allocation2 + $0x41] ss:$8 sm:$0x3] %vm5529_vm2, %v890_v29  ;;  %v378_v5 = vcombine.high %v368_v60, %v368_v60  ;;  %v379_v21 = vcombine.high %v375_v61, %v375_v61  ;;  %v388_v7 = vrot.slane %v380_v22, %v5513_v33 }
 0x126   :  { %569 = vst.msk [vmem:[#allocation2 + $0x10] ss:$8 sm:$0x3] %vm5529_vm2, %v368_v60  ;;  %572 = vst.msk [vmem:[#allocation2 + $0x20] ss:$8 sm:$0x3] %vm5529_vm2, %v376_v18  ;;  %v395_v8 = vrot.slane %v381_v49, %v5513_v33  ;;  %v907_v51 = vcombine.high %v897_v39, %v897_v39  ;;  %v908_v41 = vcombine.high %v904_v57, %v904_v57  ;;  %v5659_v18 = vpop.permute.xlu1 %303 }
 0x127   :  { %581 = vst.msk [vmem:[#allocation2 + $0x50] ss:$8 sm:$0x3] %vm5529_vm2, %v375_v61  ;;  %584 = vst.msk [vmem:[#allocation2 + $0x60] ss:$8 sm:$0x3] %vm5529_vm2, %v377_v28  ;;  %v917_v40 = vrot.slane %v909_v32, %v5513_v33  ;;  %v924_v45 = vrot.slane %v910_v17, %v5513_v33  ;;  %v396_v31 = vcombine.high %v388_v7, %v388_v7 }
 0x128   :  { %1095 = vst.msk [vmem:[#allocation2 + $0x11] ss:$8 sm:$0x3] %vm5529_vm2, %v897_v39  ;;  %1098 = vst.msk [vmem:[#allocation2 + $0x21] ss:$8 sm:$0x3] %vm5529_vm2, %v905_v62  ;;  %v397_v16 = vcombine.high %v395_v8, %v395_v8  ;;  %v404_v22 = vrot.slane %v388_v7, %v5513_v33  ;;  %v411_v49 = vrot.slane %v395_v8, %v5513_v33 }
 0x129   :  { %1107 = vst.msk [vmem:[#allocation2 + $0x51] ss:$8 sm:$0x3] %vm5529_vm2, %v904_v57  ;;  %1110 = vst.msk [vmem:[#allocation2 + $0x61] ss:$8 sm:$0x3] %vm5529_vm2, %v906_v4  ;;  %v925_v32 = vcombine.high %v917_v40, %v917_v40  ;;  %v926_v17 = vcombine.high %v924_v45, %v924_v45  ;;  %v933_v34 = vrot.slane %v917_v40, %v5513_v33 }
 0x12a   :  { %v5631_v3 = vpop.f32.mrb[35].mxu0  ;;  %v5633_v15 = vpop.f32.mrb[35].mxu1  ;;  %575 = vst.msk [vmem:[#allocation2 + $0x30] ss:$8 sm:$0x3] %vm5529_vm2, %v378_v5  ;;  %v940_v23 = vrot.slane %v924_v45, %v5513_v33  ;;  %v418_v50 = vrot.slane %v396_v31, %v5513_v33  ;;  %v425_v35 = vrot.slane %v397_v16, %v5513_v33  ;;  %v426_v36 = vcombine.high %v404_v22, %v404_v22 }
 0x12b   :  { %587 = vst.msk [vmem:[#allocation2 + $0x70] ss:$8 sm:$0x3] %vm5529_vm2, %v379_v21  ;;  %1101 = vst.msk [vmem:[#allocation2 + $0x31] ss:$8 sm:$0x3] %vm5529_vm2, %v907_v51  ;;  %v427_v37 = vcombine.high %v411_v49, %v411_v49  ;;  %v947_v47 = vrot.slane %v925_v32, %v5513_v33  ;;  %v954_v29 = vrot.slane %v926_v17, %v5513_v33 }
 0x12c   :  { %1113 = vst.msk [vmem:[#allocation2 + $0x71] ss:$8 sm:$0x3] %vm5529_vm2, %v908_v41  ;;  %590 = vst.msk [vmem:[#allocation2 + $0x80] ss:$8 sm:$0x3] %vm5529_vm2, %v404_v22  ;;  %v955_v60 = vcombine.high %v933_v34, %v933_v34  ;;  %v956_v61 = vcombine.high %v940_v23, %v940_v23  ;;  %v428_v28 = vcombine.high %v418_v50, %v418_v50 }
 0x12d   :  { %602 = vst.msk [vmem:[#allocation2 + $0xc0] ss:$8 sm:$0x3] %vm5529_vm2, %v411_v49  ;;  %1116 = vst.msk [vmem:[#allocation2 + $0x81] ss:$8 sm:$0x3] %vm5529_vm2, %v933_v34  ;;  %v429_v39 = vcombine.high %v425_v35, %v425_v35  ;;  %v275_v57 = vmax.f32 %v5499_v10, %v5555_v43  ;;  %v824_v62 = vmax.f32 %v5501_v1, %v5557_v6 }
 0x12e   :  { %1128 = vst.msk [vmem:[#allocation2 + $0xc1] ss:$8 sm:$0x3] %vm5529_vm2, %v940_v23  ;;  %6984 = vst [vmem:[#allocation9_spill] sm:$0xff] %v5659_v18  ;;  %v5673_v4 = vpop.f32.mrb[36].mxu0  ;;  %v5675_v5 = vpop.f32.mrb[36].mxu1  ;;  %v957_v21 = vcombine.high %v947_v47, %v947_v47  ;;  %v958_v7 = vcombine.high %v954_v29, %v954_v29  ;;  %v310_v10 = vadd.f32 %v5585_v48, %v5566_v9 }
 0x12f   :  { %593 = vst.msk [vmem:[#allocation2 + $0x90] ss:$8 sm:$0x3] %vm5529_vm2, %v418_v50  ;;  %596 = vst.msk [vmem:[#allocation2 + $0xa0] ss:$8 sm:$0x3] %vm5529_vm2, %v426_v36  ;;  %v839_v1 = vadd.f32 %v5571_v55, %v5585_v48  ;;  %v6985_v8 = vmax.f32 %v5397_v24, %v5461_v53  ;;  %v6986_v9 = vmax.f32 %v5399_v25, %v5463_v54 }
 0x130   :  { %605 = vst.msk [vmem:[#allocation2 + $0xd0] ss:$8 sm:$0x3] %vm5529_vm2, %v425_v35  ;;  %608 = vst.msk [vmem:[#allocation2 + $0xe0] ss:$8 sm:$0x3] %vm5529_vm2, %v427_v37  ;;  %v276_v55 = vmax.f32 %v5503_v11, %v5559_v63  ;;  %v825_v40 = vmax.f32 %v5505_v12, %v5561_v52  ;;  %v277_v25 = vmax.f32 %v5507_v59, %v5573_v0 }
 0x131   :  { %1119 = vst.msk [vmem:[#allocation2 + $0x91] ss:$8 sm:$0x3] %vm5529_vm2, %v947_v47  ;;  %1122 = vst.msk [vmem:[#allocation2 + $0xa1] ss:$8 sm:$0x3] %vm5529_vm2, %v955_v60  ;;  %v283_v51 = vmax.f32 %v6985_v8, %v275_v57  ;;  %v832_v41 = vmax.f32 %v6986_v9, %v824_v62  ;;  %v826_v54 = vmax.f32 %v5509_v58, %v5575_v2 }
 0x132   :  { %1131 = vst.msk [vmem:[#allocation2 + $0xd1] ss:$8 sm:$0x3] %vm5529_vm2, %v954_v29  ;;  %1134 = vst.msk [vmem:[#allocation2 + $0xe1] ss:$8 sm:$0x3] %vm5529_vm2, %v956_v61  ;;  %v6988_v16 = vmax.f32 %v5401_v26, %v5469_v56 }
 0x133   :  { %v5689_v43 = vpop.f32.mrb[37].mxu0  ;;  %v5691_v6 = vpop.f32.mrb[37].mxu1  ;;  %599 = vst.msk [vmem:[#allocation2 + $0xb0] ss:$8 sm:$0x3] %vm5529_vm2, %v428_v28  ;;  %v318_v24 = vmax.f32 %v310_v10, 0.0  ;;  %v311_v63 = vadd.f32 %v5585_v48, %v283_v51  ;;  %v840_v52 = vadd.f32 %v832_v41, %v5585_v48 }
 0x134   :  { %611 = vst.msk [vmem:[#allocation2 + $0xf0] ss:$8 sm:$0x3] %vm5529_vm2, %v429_v39  ;;  %v5707_v45 = vpop.f32.mrb[38].mxu0  ;;  %v5709_v31 = vpop.f32.mrb[38].mxu1  ;;  %v847_v53 = vmax.f32 %v839_v1, 0.0  ;;  %v284_v22 = vmax.f32 %v6988_v16, %v276_v55 }
 0x135   :  { %1125 = vst.msk [vmem:[#allocation2 + $0xb1] ss:$8 sm:$0x3] %vm5529_vm2, %v957_v21  ;;  %1137 = vst.msk [vmem:[#allocation2 + $0xf1] ss:$8 sm:$0x3] %vm5529_vm2, %v958_v7 }
 0x136   :  { %v5719_v11 = vpop.f32.mrb[39].mxu0  ;;  %v5721_v12 = vpop.f32.mrb[39].mxu1  ;;  %v6989_v49 = vld [vmem:[#allocation6_spill] sm:$0xff]  ;;  %v6991_v59 = vld [vmem:[#allocation4_spill] sm:$0xff]  ;;  %v6992_v0 = vld [vmem:[#allocation7_spill] sm:$0xff]  ;;  %v319_v36 = vmax.f32 %v311_v63, 0.0  ;;  %v312_v47 = vadd.f32 %v5659_v18, %v284_v22 }
 0x137   :  { %6987 = vst [vmem:[#allocation10_spill] sm:$0xff] %v5721_v12  ;;  %v6990_v32 = vmax.f32 %v5403_v27, %v6989_v49  ;;  %v6993_v34 = vmax.f32 %v6991_v59, %v6992_v0  ;;  %v6994_v2 = vld [vmem:[#allocation5_spill] sm:$0xff]  ;;  %v6995_v23 = vld [vmem:[#allocation8_spill] sm:$0xff]  ;;  %v848_v37 = vmax.f32 %v840_v52, 0.0  ;;  %v5741_v39 = vpop.f32.mrb[40].mxu0  ;;  %v5743_v57 = vpop.f32.mrb[40].mxu1 }
 0x138   :  { %v6996_v50 = vmax.f32 %v6994_v2, %v6995_v23  ;;  %v430_v27 = vcombine.low %v318_v24, %v319_v36  ;;  %v431_v60 = vcombine.high %v318_v24, %v319_v36  ;;  %v320_v62 = vmax.f32 %v312_v47, 0.0  ;;  %v5745_v1 = vpop.f32.mrb[41].mxu0  ;;  %v5747_v8 = vpop.f32.mrb[41].mxu1 }
 0x139   :  { %v833_v17 = vmax.f32 %v6990_v32, %v825_v40  ;;  %v285_v58 = vmax.f32 %v6993_v34, %v277_v25  ;;  %v959_v61 = vcombine.low %v847_v53, %v848_v37  ;;  %v960_v28 = vcombine.high %v847_v53, %v848_v37  ;;  %v5753_v40 = vpop.f32.mrb[42].mxu0  ;;  %v5755_v24 = vpop.f32.mrb[42].mxu1 }
 0x13a   :  { %v834_v35 = vmax.f32 %v6996_v50, %v826_v54  ;;  %v438_v51 = vrot.slane %v430_v27, %v5513_v33  ;;  %v445_v9 = vrot.slane %v431_v60, %v5513_v33  ;;  %v5757_v52 = vpop.f32.mrb[43].mxu0  ;;  %v5759_v16 = vpop.f32.mrb[43].mxu1 }
 0x13b   :  { %v841_v29 = vadd.f32 %v833_v17, %v5659_v18  ;;  %v313_v26 = vadd.f32 %v5659_v18, %v285_v58  ;;  %v967_v41 = vrot.slane %v959_v61, %v5513_v33  ;;  %v974_v55 = vrot.slane %v960_v28, %v5513_v33  ;;  %v5787_v61 = vpop.f32.mrb[44].mxu0  ;;  %v5789_v28 = vpop.f32.mrb[44].mxu1 }
 0x13c   :  { %v842_v56 = vadd.f32 %v834_v35, %v5659_v18  ;;  %v446_v22 = vcombine.high %v438_v51, %v438_v51  ;;  %v447_v49 = vcombine.high %v445_v9, %v445_v9  ;;  %v454_v32 = vrot.slane %v438_v51, %v5513_v33  ;;  %v5801_v51 = vpop.f32.mrb[45].mxu0 }
 0x13d   :  { %v321_v21 = vmax.f32 %v313_v26, 0.0  ;;  %v849_v7 = vmax.f32 %v841_v29, 0.0  ;;  %v461_v17 = vrot.slane %v445_v9, %v5513_v33  ;;  %v975_v59 = vcombine.high %v967_v41, %v967_v41  ;;  %v5803_v9 = vpop.f32.mrb[45].mxu1 }
 0x13e   :  { %v850_v10 = vmax.f32 %v842_v56, 0.0  ;;  %v976_v0 = vcombine.high %v974_v55, %v974_v55  ;;  %v983_v34 = vrot.slane %v967_v41, %v5513_v33  ;;  %v990_v58 = vrot.slane %v974_v55, %v5513_v33  ;;  %614 = vst.msk [vmem:[#allocation2 + $0x100] ss:$8 sm:$0x3] %vm5529_vm2, %v454_v32 }
 0x13f   :  { %v480_v53 = vcombine.low %v320_v62, %v321_v21  ;;  %v481_v25 = vcombine.high %v320_v62, %v321_v21  ;;  %v468_v2 = vrot.slane %v446_v22, %v5513_v33  ;;  %v475_v23 = vrot.slane %v447_v49, %v5513_v33  ;;  %626 = vst.msk [vmem:[#allocation2 + $0x140] ss:$8 sm:$0x3] %vm5529_vm2, %v461_v17  ;;  %v5811_v22 = vpop.f32.mrb[46].mxu0 }
 0x140   :  { %v1009_v54 = vcombine.low %v849_v7, %v850_v10  ;;  %v1010_v63 = vcombine.high %v849_v7, %v850_v10  ;;  %v476_v50 = vcombine.high %v454_v32, %v454_v32  ;;  %v477_v35 = vcombine.high %v461_v17, %v461_v17  ;;  %1140 = vst.msk [vmem:[#allocation2 + $0x101] ss:$8 sm:$0x3] %vm5529_vm2, %v983_v34 }
 0x141   :  { %v997_v36 = vrot.slane %v975_v59, %v5513_v33  ;;  %v1004_v37 = vrot.slane %v976_v0, %v5513_v33  ;;  %v1005_v47 = vcombine.high %v983_v34, %v983_v34  ;;  %v1006_v29 = vcombine.high %v990_v58, %v990_v58  ;;  %1152 = vst.msk [vmem:[#allocation2 + $0x141] ss:$8 sm:$0x3] %vm5529_vm2, %v990_v58  ;;  %v5821_v59 = vpop.f32.mrb[47].mxu0 }
 0x142   :  { %v478_v26 = vcombine.high %v468_v2, %v468_v2  ;;  %v479_v56 = vcombine.high %v475_v23, %v475_v23  ;;  %617 = vst.msk [vmem:[#allocation2 + $0x110] ss:$8 sm:$0x3] %vm5529_vm2, %v468_v2  ;;  %620 = vst.msk [vmem:[#allocation2 + $0x120] ss:$8 sm:$0x3] %vm5529_vm2, %v476_v50  ;;  %v488_v27 = vrot.slane %v480_v53, %v5513_v33 }
 0x143   :  { %629 = vst.msk [vmem:[#allocation2 + $0x150] ss:$8 sm:$0x3] %vm5529_vm2, %v475_v23  ;;  %632 = vst.msk [vmem:[#allocation2 + $0x160] ss:$8 sm:$0x3] %vm5529_vm2, %v477_v35  ;;  %v495_v60 = vrot.slane %v481_v25, %v5513_v33  ;;  %v1007_v62 = vcombine.high %v997_v36, %v997_v36  ;;  %v1008_v21 = vcombine.high %v1004_v37, %v1004_v37 }
 0x144   :  { %1143 = vst.msk [vmem:[#allocation2 + $0x111] ss:$8 sm:$0x3] %vm5529_vm2, %v997_v36  ;;  %1146 = vst.msk [vmem:[#allocation2 + $0x121] ss:$8 sm:$0x3] %vm5529_vm2, %v1005_v47  ;;  %v1017_v7 = vrot.slane %v1009_v54, %v5513_v33  ;;  %v1024_v10 = vrot.slane %v1010_v63, %v5513_v33  ;;  %v496_v41 = vcombine.high %v488_v27, %v488_v27 }
 0x145   :  { %1155 = vst.msk [vmem:[#allocation2 + $0x151] ss:$8 sm:$0x3] %vm5529_vm2, %v1004_v37  ;;  %1158 = vst.msk [vmem:[#allocation2 + $0x161] ss:$8 sm:$0x3] %vm5529_vm2, %v1006_v29  ;;  %v497_v55 = vcombine.high %v495_v60, %v495_v60  ;;  %v504_v53 = vrot.slane %v488_v27, %v5513_v33  ;;  %v511_v25 = vrot.slane %v495_v60, %v5513_v33 }
 0x146   :  { %623 = vst.msk [vmem:[#allocation2 + $0x130] ss:$8 sm:$0x3] %vm5529_vm2, %v478_v26  ;;  %635 = vst.msk [vmem:[#allocation2 + $0x170] ss:$8 sm:$0x3] %vm5529_vm2, %v479_v56  ;;  %v1025_v63 = vcombine.high %v1017_v7, %v1017_v7  ;;  %v1026_v49 = vcombine.high %v1024_v10, %v1024_v10  ;;  %v1033_v32 = vrot.slane %v1017_v7, %v5513_v33 }
 0x147   :  { %v5813_v54 = vpop.f32.mrb[46].mxu1  ;;  %1149 = vst.msk [vmem:[#allocation2 + $0x131] ss:$8 sm:$0x3] %vm5529_vm2, %v1007_v62  ;;  %v1040_v17 = vrot.slane %v1024_v10, %v5513_v33  ;;  %v518_v34 = vrot.slane %v496_v41, %v5513_v33  ;;  %v525_v58 = vrot.slane %v497_v55, %v5513_v33  ;;  %v526_v2 = vcombine.high %v504_v53, %v504_v53 }
 0x148   :  { %1161 = vst.msk [vmem:[#allocation2 + $0x171] ss:$8 sm:$0x3] %vm5529_vm2, %v1008_v21  ;;  %v5823_v0 = vpop.f32.mrb[47].mxu1  ;;  %v527_v23 = vcombine.high %v511_v25, %v511_v25  ;;  %v1047_v50 = vrot.slane %v1025_v63, %v5513_v33  ;;  %v1054_v35 = vrot.slane %v1026_v49, %v5513_v33  ;;  %v1055_v36 = vcombine.high %v1033_v32, %v1033_v32 }
 0x149   :  { %6997 = vst [vmem:[#allocation6_spill] sm:$0xff] %v5823_v0  ;;  %638 = vst.msk [vmem:[#allocation2 + $0x180] ss:$8 sm:$0x3] %vm5529_vm2, %v504_v53  ;;  %v1056_v37 = vcombine.high %v1040_v17, %v1040_v17  ;;  %v528_v47 = vcombine.high %v518_v34, %v518_v34  ;;  %v529_v29 = vcombine.high %v525_v58, %v525_v58 }
 0x14a   :  { %650 = vst.msk [vmem:[#allocation2 + $0x1c0] ss:$8 sm:$0x3] %vm5529_vm2, %v511_v25  ;;  %1164 = vst.msk [vmem:[#allocation2 + $0x181] ss:$8 sm:$0x3] %vm5529_vm2, %v1033_v32  ;;  %v1337_v26 = vmax.f32 %v5593_v19, %v5741_v39  ;;  %v1863_v56 = vmax.f32 %v5595_v38, %v5743_v57  ;;  %v1057_v27 = vcombine.high %v1047_v50, %v1047_v50 }
 0x14b   :  { %1176 = vst.msk [vmem:[#allocation2 + $0x1c1] ss:$8 sm:$0x3] %vm5529_vm2, %v1040_v17  ;;  %641 = vst.msk [vmem:[#allocation2 + $0x190] ss:$8 sm:$0x3] %vm5529_vm2, %v518_v34  ;;  %v1058_v60 = vcombine.high %v1054_v35, %v1054_v35  ;;  %v1338_v19 = vmax.f32 %v5603_v20, %v5745_v1  ;;  %v1864_v38 = vmax.f32 %v5605_v42, %v5747_v8 }
 0x14c   :  { %644 = vst.msk [vmem:[#allocation2 + $0x1a0] ss:$8 sm:$0x3] %vm5529_vm2, %v526_v2  ;;  %653 = vst.msk [vmem:[#allocation2 + $0x1d0] ss:$8 sm:$0x3] %vm5529_vm2, %v525_v58  ;;  %v1339_v39 = vmax.f32 %v5617_v46, %v5753_v40  ;;  %v1865_v57 = vmax.f32 %v5619_v13, %v5755_v24  ;;  %v1340_v62 = vmax.f32 %v5631_v3, %v5757_v52 }
 0x14d   :  { %656 = vst.msk [vmem:[#allocation2 + $0x1e0] ss:$8 sm:$0x3] %vm5529_vm2, %v527_v23  ;;  %1167 = vst.msk [vmem:[#allocation2 + $0x191] ss:$8 sm:$0x3] %vm5529_vm2, %v1047_v50  ;;  %v1866_v20 = vmax.f32 %v5633_v15, %v5759_v16 }
 0x14e   :  { %1170 = vst.msk [vmem:[#allocation2 + $0x1a1] ss:$8 sm:$0x3] %vm5529_vm2, %v1055_v36  ;;  %1179 = vst.msk [vmem:[#allocation2 + $0x1d1] ss:$8 sm:$0x3] %vm5529_vm2, %v1054_v35 }
 0x14f   :  { %1182 = vst.msk [vmem:[#allocation2 + $0x1e1] ss:$8 sm:$0x3] %vm5529_vm2, %v1056_v37  ;;  %647 = vst.msk [vmem:[#allocation2 + $0x1b0] ss:$8 sm:$0x3] %vm5529_vm2, %v528_v47 }
 0x150   :  { %659 = vst.msk [vmem:[#allocation2 + $0x1f0] ss:$8 sm:$0x3] %vm5529_vm2, %v529_v29  ;;  %v1298_v1 = vpop.f32.mrb[48].mxu0  ;;  %v1824_v42 = vpop.f32.mrb[48].mxu1 }
 0x151   :  { %1173 = vst.msk [vmem:[#allocation2 + $0x1b1] ss:$8 sm:$0x3] %vm5529_vm2, %v1057_v27  ;;  %1185 = vst.msk [vmem:[#allocation2 + $0x1f1] ss:$8 sm:$0x3] %vm5529_vm2, %v1058_v60 }
 0x152   :  { %v1300_v8 = vpop.f32.mrb[49].mxu0  ;;  %v1826_v40 = vpop.f32.mrb[49].mxu1 }
 0x153   :  { %v1302_v7 = vpop.f32.mrb[50].mxu0  ;;  %v1828_v10 = vpop.f32.mrb[50].mxu1 }
 0x154   :  { %v1304_v41 = vpop.f32.mrb[51].mxu0  ;;  %v1830_v55 = vpop.f32.mrb[51].mxu1 }
 0x155   :  { %v1308_v53 = vpop.f32.mrb[52].mxu0  ;;  %v1834_v25 = vpop.f32.mrb[52].mxu1 }
 0x156   :  { %v5893_v63 = vpop.f32.mrb[53].mxu0  ;;  %v5895_v49 = vpop.f32.mrb[53].mxu1 }
 0x157   :  { %v5897_v32 = vpop.f32.mrb[54].mxu0  ;;  %v5899_v17 = vpop.f32.mrb[54].mxu1 }
 0x158   :  { %v5901_v34 = vpop.f32.mrb[55].mxu0  ;;  %v5903_v58 = vpop.f32.mrb[55].mxu1 }
 0x159   :  { %v1318_v2 = vpop.f32.mrb[56].mxu0  ;;  %v1844_v23 = vpop.f32.mrb[56].mxu1 }
 0x15a   :  { %v1345_v50 = vmax.f32 %v1298_v1, %v1318_v2  ;;  %v1871_v35 = vmax.f32 %v1824_v42, %v1844_v23  ;;  %v1320_v36 = vpop.f32.mrb[57].mxu0  ;;  %v1846_v37 = vpop.f32.mrb[57].mxu1 }
 0x15b   :  { %v1346_v47 = vmax.f32 %v1300_v8, %v1320_v36  ;;  %v1872_v29 = vmax.f32 %v1826_v40, %v1846_v37  ;;  %v1322_v27 = vpop.f32.mrb[58].mxu0  ;;  %v1848_v60 = vpop.f32.mrb[58].mxu1  ;;  %v6998_v36 = vmax.f32 %v5673_v4, %v5787_v61 }
 0x15c   :  { %v1353_v21 = vmax.f32 %v1337_v26, %v1345_v50  ;;  %v1879_v16 = vmax.f32 %v1863_v56, %v1871_v35  ;;  %v1347_v52 = vmax.f32 %v1302_v7, %v1322_v27  ;;  %v1873_v24 = vmax.f32 %v1828_v10, %v1848_v60  ;;  %v1324_v15 = vpop.f32.mrb[59].mxu0  ;;  %v1850_v3 = vpop.f32.mrb[59].mxu1 }
 0x15d   :  { %v1354_v13 = vmax.f32 %v1338_v19, %v1346_v47  ;;  %v1880_v46 = vmax.f32 %v1864_v38, %v1872_v29  ;;  %v1348_v18 = vmax.f32 %v1304_v41, %v1324_v15  ;;  %v1874_v0 = vmax.f32 %v1830_v55, %v1850_v3 }
 0x15e   :  { %v1361_v12 = vadd.f32 %v1353_v21, %v5511_v44  ;;  %v1887_v1 = vadd.f32 %v1879_v16, %v5511_v44  ;;  %v1355_v42 = vmax.f32 %v1339_v39, %v1347_v52  ;;  %v1881_v2 = vmax.f32 %v1865_v57, %v1873_v24  ;;  %v1328_v39 = vpop.f32.mrb[60].mxu0  ;;  %v1854_v57 = vpop.f32.mrb[60].mxu1 }
 0x15f   :  { %v1362_v8 = vadd.f32 %v1354_v13, %v5511_v44  ;;  %v1888_v40 = vadd.f32 %v1880_v46, %v5511_v44  ;;  %v1356_v26 = vmax.f32 %v1340_v62, %v1348_v18  ;;  %v1882_v56 = vmax.f32 %v1866_v20, %v1874_v0  ;;  %v5913_v18 = vpop.f32.mrb[61].mxu0 }
 0x160   :  { %v1369_v7 = vmax.f32 %v1361_v12, 0.0  ;;  %v1895_v10 = vmax.f32 %v1887_v1, 0.0  ;;  %v1363_v23 = vadd.f32 %v1355_v42, %v5527_v14  ;;  %v1889_v19 = vadd.f32 %v1881_v2, %v5527_v14  ;;  %v5915_v12 = vpop.f32.mrb[61].mxu1  ;;  %v5917_v41 = vpop.f32.mrb[62].mxu0 }
 0x161   :  { %v1370_v38 = vmax.f32 %v1362_v8, 0.0  ;;  %v1896_v3 = vmax.f32 %v1888_v40, 0.0  ;;  %v1364_v15 = vadd.f32 %v1356_v26, %v5527_v14  ;;  %v1890_v16 = vadd.f32 %v1882_v56, %v5527_v14  ;;  %v5919_v55 = vpop.f32.mrb[62].mxu1  ;;  %v5931_v47 = vpop.f32.mrb[63].mxu0 }
 0x162   :  { %v1371_v24 = vmax.f32 %v1363_v23, 0.0  ;;  %v1897_v13 = vmax.f32 %v1889_v19, 0.0  ;;  %v1349_v52 = vmax.f32 %v1308_v53, %v1328_v39  ;;  %v1875_v46 = vmax.f32 %v1834_v25, %v1854_v57  ;;  %v5933_v29 = vpop.f32.mrb[63].mxu1 }
 0x163   :  { %v1385_v0 = vcombine.low %v1369_v7, %v1370_v38  ;;  %v1386_v62 = vcombine.high %v1369_v7, %v1370_v38  ;;  %v1911_v20 = vcombine.low %v1895_v10, %v1896_v3  ;;  %v1912_v21 = vcombine.high %v1895_v10, %v1896_v3  ;;  %v5951_v39 = vpop.f32.mrb[64].mxu1 }
 0x164   :  { %v1372_v50 = vmax.f32 %v1364_v15, 0.0  ;;  %v1898_v35 = vmax.f32 %v1890_v16, 0.0  ;;  %v5924_v37 = vmax.f32 %v6998_v36, %v1349_v52  ;;  %v6999_v53 = vmax.f32 %v5675_v5, %v5789_v28  ;;  %v5949_v16 = vpop.f32.mrb[64].mxu0 }
 0x165   :  { %v1393_v27 = vrot.slane %v1385_v0, %v5513_v33  ;;  %v1400_v60 = vrot.slane %v1386_v62, %v5513_v33  ;;  %v1919_v1 = vrot.slane %v1911_v20, %v5513_v33  ;;  %v1926_v42 = vrot.slane %v1912_v21, %v5513_v33  ;;  %v5961_v0 = vpop.f32.mrb[65].mxu1 }
 0x166   :  { %v5929_v25 = vmax.f32 %v6999_v53, %v1875_v46  ;;  %v1435_v4 = vcombine.low %v1371_v24, %v1372_v50  ;;  %v1436_v61 = vcombine.high %v1371_v24, %v1372_v50  ;;  %v1961_v2 = vcombine.low %v1897_v13, %v1898_v35  ;;  %v5959_v46 = vpop.f32.mrb[65].mxu0  ;;  %v5975_v36 = vpop.f32.mrb[66].mxu1 }
 0x167   :  { %v1962_v8 = vcombine.high %v1897_v13, %v1898_v35  ;;  %v1401_v40 = vcombine.high %v1393_v27, %v1393_v27  ;;  %v1402_v5 = vcombine.high %v1400_v60, %v1400_v60  ;;  %v1409_v28 = vrot.slane %v1393_v27, %v5513_v33  ;;  %v5973_v35 = vpop.f32.mrb[66].mxu0 }
 0x168   :  { %v1416_v26 = vrot.slane %v1400_v60, %v5513_v33  ;;  %v1927_v56 = vcombine.high %v1919_v1, %v1919_v1  ;;  %v1928_v7 = vcombine.high %v1926_v42, %v1926_v42  ;;  %v1935_v10 = vrot.slane %v1919_v1, %v5513_v33 }
 0x169   :  { %v1942_v23 = vrot.slane %v1926_v42, %v5513_v33  ;;  %v1423_v19 = vrot.slane %v1401_v40, %v5513_v33  ;;  %v1430_v38 = vrot.slane %v1402_v5, %v5513_v33  ;;  %v1431_v3 = vcombine.high %v1409_v28, %v1409_v28  ;;  %1618 = vst.msk [vmem:[#allocation2 + $0x2] ss:$8 sm:$0x3] %vm5529_vm2, %v1409_v28  ;;  %v5987_v42 = vpop.f32.mrb[67].mxu0 }
 0x16a   :  { %v1432_v15 = vcombine.high %v1416_v26, %v1416_v26  ;;  %1630 = vst.msk [vmem:[#allocation2 + $0x42] ss:$8 sm:$0x3] %vm5529_vm2, %v1416_v26  ;;  %v1949_v57 = vrot.slane %v1927_v56, %v5513_v33  ;;  %v1956_v24 = vrot.slane %v1928_v7, %v5513_v33  ;;  %v1957_v13 = vcombine.high %v1935_v10, %v1935_v10 }
 0x16b   :  { %v1958_v52 = vcombine.high %v1942_v23, %v1942_v23  ;;  %2144 = vst.msk [vmem:[#allocation2 + $0x3] ss:$8 sm:$0x3] %vm5529_vm2, %v1935_v10  ;;  %2156 = vst.msk [vmem:[#allocation2 + $0x43] ss:$8 sm:$0x3] %vm5529_vm2, %v1942_v23  ;;  %v1433_v62 = vcombine.high %v1423_v19, %v1423_v19  ;;  %v1434_v20 = vcombine.high %v1430_v38, %v1430_v38 }
 0x16c   :  { %1621 = vst.msk [vmem:[#allocation2 + $0x12] ss:$8 sm:$0x3] %vm5529_vm2, %v1423_v19  ;;  %1624 = vst.msk [vmem:[#allocation2 + $0x22] ss:$8 sm:$0x3] %vm5529_vm2, %v1431_v3  ;;  %v1443_v21 = vrot.slane %v1435_v4, %v5513_v33  ;;  %v1450_v50 = vrot.slane %v1436_v61, %v5513_v33  ;;  %v1959_v53 = vcombine.high %v1949_v57, %v1949_v57 }
 0x16d   :  { %1633 = vst.msk [vmem:[#allocation2 + $0x52] ss:$8 sm:$0x3] %vm5529_vm2, %v1430_v38  ;;  %1636 = vst.msk [vmem:[#allocation2 + $0x62] ss:$8 sm:$0x3] %vm5529_vm2, %v1432_v15  ;;  %v1960_v27 = vcombine.high %v1956_v24, %v1956_v24  ;;  %v1969_v60 = vrot.slane %v1961_v2, %v5513_v33  ;;  %v1976_v1 = vrot.slane %v1962_v8, %v5513_v33 }
 0x16e   :  { %2147 = vst.msk [vmem:[#allocation2 + $0x13] ss:$8 sm:$0x3] %vm5529_vm2, %v1949_v57  ;;  %2150 = vst.msk [vmem:[#allocation2 + $0x23] ss:$8 sm:$0x3] %vm5529_vm2, %v1957_v13  ;;  %v1451_v61 = vcombine.high %v1443_v21, %v1443_v21  ;;  %v1452_v40 = vcombine.high %v1450_v50, %v1450_v50  ;;  %v1459_v5 = vrot.slane %v1443_v21, %v5513_v33 }
 0x16f   :  { %2159 = vst.msk [vmem:[#allocation2 + $0x53] ss:$8 sm:$0x3] %vm5529_vm2, %v1956_v24  ;;  %2162 = vst.msk [vmem:[#allocation2 + $0x63] ss:$8 sm:$0x3] %vm5529_vm2, %v1958_v52  ;;  %v1466_v28 = vrot.slane %v1450_v50, %v5513_v33  ;;  %v1977_v2 = vcombine.high %v1969_v60, %v1969_v60  ;;  %v1978_v8 = vcombine.high %v1976_v1, %v1976_v1 }
 0x170   :  { %v5989_v4 = vpop.f32.mrb[67].mxu1  ;;  %1627 = vst.msk [vmem:[#allocation2 + $0x32] ss:$8 sm:$0x3] %vm5529_vm2, %v1433_v62  ;;  %v1985_v26 = vrot.slane %v1969_v60, %v5513_v33  ;;  %v1992_v56 = vrot.slane %v1976_v1, %v5513_v33  ;;  %v1473_v7 = vrot.slane %v1451_v61, %v5513_v33  ;;  %v1480_v10 = vrot.slane %v1452_v40, %v5513_v33 }
 0x171   :  { %1639 = vst.msk [vmem:[#allocation2 + $0x72] ss:$8 sm:$0x3] %vm5529_vm2, %v1434_v20  ;;  %2153 = vst.msk [vmem:[#allocation2 + $0x33] ss:$8 sm:$0x3] %vm5529_vm2, %v1959_v53  ;;  %v1481_v23 = vcombine.high %v1459_v5, %v1459_v5  ;;  %v1482_v19 = vcombine.high %v1466_v28, %v1466_v28  ;;  %v1999_v38 = vrot.slane %v1977_v2, %v5513_v33 }
 0x172   :  { %2165 = vst.msk [vmem:[#allocation2 + $0x73] ss:$8 sm:$0x3] %vm5529_vm2, %v1960_v27  ;;  %1642 = vst.msk [vmem:[#allocation2 + $0x82] ss:$8 sm:$0x3] %vm5529_vm2, %v1459_v5  ;;  %v2006_v3 = vrot.slane %v1978_v8, %v5513_v33  ;;  %v2007_v15 = vcombine.high %v1985_v26, %v1985_v26  ;;  %v2008_v57 = vcombine.high %v1992_v56, %v1992_v56 }
 0x173   :  { %1654 = vst.msk [vmem:[#allocation2 + $0xc2] ss:$8 sm:$0x3] %vm5529_vm2, %v1466_v28  ;;  %2168 = vst.msk [vmem:[#allocation2 + $0x83] ss:$8 sm:$0x3] %vm5529_vm2, %v1985_v26  ;;  %v1483_v24 = vcombine.high %v1473_v7, %v1473_v7  ;;  %v1484_v13 = vcombine.high %v1480_v10, %v1480_v10  ;;  %v1365_v52 = vadd.f32 %v5924_v37, %v5585_v48 }
 0x174   :  { %2180 = vst.msk [vmem:[#allocation2 + $0xc3] ss:$8 sm:$0x3] %vm5529_vm2, %v1992_v56  ;;  %1645 = vst.msk [vmem:[#allocation2 + $0x92] ss:$8 sm:$0x3] %vm5529_vm2, %v1473_v7  ;;  %v1891_v62 = vadd.f32 %v5929_v25, %v5585_v48  ;;  %v2009_v50 = vcombine.high %v1999_v38, %v1999_v38  ;;  %v2010_v53 = vcombine.high %v2006_v3, %v2006_v3 }
 0x175   :  { %1648 = vst.msk [vmem:[#allocation2 + $0xa2] ss:$8 sm:$0x3] %vm5529_vm2, %v1481_v23  ;;  %1657 = vst.msk [vmem:[#allocation2 + $0xd2] ss:$8 sm:$0x3] %vm5529_vm2, %v1480_v10  ;;  %v1350_v37 = vmax.f32 %v5893_v63, %v5913_v18  ;;  %v1876_v25 = vmax.f32 %v5895_v49, %v5915_v12  ;;  %v1351_v1 = vmax.f32 %v5897_v32, %v5917_v41 }
 0x176   :  { %1660 = vst.msk [vmem:[#allocation2 + $0xe2] ss:$8 sm:$0x3] %vm5529_vm2, %v1482_v19  ;;  %v6027_v20 = vpop.f32.mrb[68].mxu0  ;;  %v6029_v21 = vpop.f32.mrb[68].mxu1  ;;  %v1877_v61 = vmax.f32 %v5899_v17, %v5919_v55  ;;  %v7000_v49 = vmax.f32 %v5689_v43, %v5801_v51  ;;  %v7001_v32 = vmax.f32 %v5691_v6, %v5803_v9  ;;  %v1352_v17 = vmax.f32 %v5901_v34, %v5931_v47  ;;  %v7006_v26 = vld [vmem:[#allocation6_spill] sm:$0xff] }
 0x177   :  { %2171 = vst.msk [vmem:[#allocation2 + $0x93] ss:$8 sm:$0x3] %vm5529_vm2, %v1999_v38  ;;  %2174 = vst.msk [vmem:[#allocation2 + $0xa3] ss:$8 sm:$0x3] %vm5529_vm2, %v2007_v15  ;;  %v1878_v55 = vmax.f32 %v5903_v58, %v5933_v29  ;;  %v7002_v43 = vmax.f32 %v5707_v45, %v5811_v22  ;;  %v7003_v6 = vmax.f32 %v5709_v31, %v5813_v54 }
 0x178   :  { %2183 = vst.msk [vmem:[#allocation2 + $0xd3] ss:$8 sm:$0x3] %vm5529_vm2, %v2006_v3  ;;  %2186 = vst.msk [vmem:[#allocation2 + $0xe3] ss:$8 sm:$0x3] %vm5529_vm2, %v2008_v57  ;;  %v1358_v12 = vmax.f32 %v7000_v49, %v1350_v37  ;;  %v1884_v41 = vmax.f32 %v7001_v32, %v1876_v25  ;;  %v7004_v58 = vmax.f32 %v5719_v11, %v5821_v59 }
 0x179   :  { %v6043_v27 = vpop.f32.mrb[69].mxu0  ;;  %v6045_v60 = vpop.f32.mrb[69].mxu1  ;;  %1651 = vst.msk [vmem:[#allocation2 + $0xb2] ss:$8 sm:$0x3] %vm5529_vm2, %v1483_v24  ;;  %v1373_v28 = vmax.f32 %v1365_v52, 0.0  ;;  %v1359_v51 = vmax.f32 %v7002_v43, %v1351_v1  ;;  %v1885_v9 = vmax.f32 %v7003_v6, %v1877_v61 }
 0x17a   :  { %1663 = vst.msk [vmem:[#allocation2 + $0xf2] ss:$8 sm:$0x3] %vm5529_vm2, %v1484_v13  ;;  %v6055_v63 = vpop.f32.mrb[70].mxu0  ;;  %v6057_v18 = vpop.f32.mrb[70].mxu1  ;;  %v1899_v2 = vmax.f32 %v1891_v62, 0.0  ;;  %v1366_v8 = vadd.f32 %v1358_v12, %v5585_v48  ;;  %v1892_v34 = vadd.f32 %v1884_v41, %v5585_v48  ;;  %v1360_v47 = vmax.f32 %v7004_v58, %v1352_v17 }
 0x17b   :  { %2177 = vst.msk [vmem:[#allocation2 + $0xb3] ss:$8 sm:$0x3] %vm5529_vm2, %v2009_v50  ;;  %2189 = vst.msk [vmem:[#allocation2 + $0xf3] ss:$8 sm:$0x3] %vm5529_vm2, %v2010_v53 }
 0x17c   :  { %v6073_v40 = vpop.f32.mrb[71].mxu0  ;;  %v6075_v5 = vpop.f32.mrb[71].mxu1  ;;  %v7005_v29 = vld [vmem:[#allocation10_spill] sm:$0xff]  ;;  %v7008_v10 = vld [vmem:[#allocation9_spill] sm:$0xff]  ;;  %v1374_v22 = vmax.f32 %v1366_v8, 0.0  ;;  %v1900_v19 = vmax.f32 %v1892_v34, 0.0 }
 0x17d   :  { %v7007_v56 = vmax.f32 %v7005_v29, %v7006_v26  ;;  %v1367_v23 = vadd.f32 %v1359_v51, %v7008_v10  ;;  %v1893_v45 = vadd.f32 %v1885_v9, %v7008_v10  ;;  %v1368_v31 = vadd.f32 %v1360_v47, %v7008_v10  ;;  %v6095_v15 = vpop.f32.mrb[72].mxu0  ;;  %v6097_v11 = vpop.f32.mrb[72].mxu1 }
 0x17e   :  { %v1485_v59 = vcombine.low %v1373_v28, %v1374_v22  ;;  %v1486_v57 = vcombine.high %v1373_v28, %v1374_v22  ;;  %v2011_v24 = vcombine.low %v1899_v2, %v1900_v19  ;;  %v2012_v13 = vcombine.high %v1899_v2, %v1900_v19  ;;  %v6099_v52 = vpop.f32.mrb[73].mxu0  ;;  %v6101_v62 = vpop.f32.mrb[73].mxu1 }
 0x17f   :  { %v1886_v7 = vmax.f32 %v7007_v56, %v1878_v55  ;;  %v1375_v38 = vmax.f32 %v1367_v23, 0.0  ;;  %v1901_v3 = vmax.f32 %v1893_v45, 0.0  ;;  %v1376_v50 = vmax.f32 %v1368_v31, 0.0  ;;  %v6107_v1 = vpop.f32.mrb[74].mxu0  ;;  %v6109_v61 = vpop.f32.mrb[74].mxu1 }
 0x180   :  { %v2389_v37 = vmax.f32 %v5949_v16, %v6095_v15  ;;  %v2915_v25 = vmax.f32 %v5951_v39, %v6097_v11  ;;  %v1493_v49 = vrot.slane %v1485_v59, %v5513_v33  ;;  %v1500_v12 = vrot.slane %v1486_v57, %v5513_v33  ;;  %v6115_v17 = vpop.f32.mrb[75].mxu0  ;;  %v6117_v55 = vpop.f32.mrb[75].mxu1 }
 0x181   :  { %v1894_v54 = vadd.f32 %v1886_v7, %v7008_v10  ;;  %v2019_v32 = vrot.slane %v2011_v24, %v5513_v33  ;;  %v2026_v41 = vrot.slane %v2012_v13, %v5513_v33  ;;  %v1535_v28 = vcombine.low %v1375_v38, %v1376_v50 }
 0x182   :  { %v1536_v2 = vcombine.high %v1375_v38, %v1376_v50  ;;  %v1501_v6 = vcombine.high %v1493_v49, %v1493_v49  ;;  %v1502_v9 = vcombine.high %v1500_v12, %v1500_v12  ;;  %v1509_v8 = vrot.slane %v1493_v49, %v5513_v33  ;;  %v6135_v38 = vpop.f32.mrb[76].mxu0 }
 0x183   :  { %v1902_v53 = vmax.f32 %v1894_v54, 0.0  ;;  %v1516_v34 = vrot.slane %v1500_v12, %v5513_v33  ;;  %v2027_v58 = vcombine.high %v2019_v32, %v2019_v32  ;;  %v2028_v47 = vcombine.high %v2026_v41, %v2026_v41  ;;  %v6149_v50 = vpop.f32.mrb[77].mxu0 }
 0x184   :  { %v2035_v29 = vrot.slane %v2019_v32, %v5513_v33  ;;  %v2042_v26 = vrot.slane %v2026_v41, %v5513_v33  ;;  %v1523_v56 = vrot.slane %v1501_v6, %v5513_v33  ;;  %v1530_v7 = vrot.slane %v1502_v9, %v5513_v33  ;;  %1666 = vst.msk [vmem:[#allocation2 + $0x102] ss:$8 sm:$0x3] %vm5529_vm2, %v1509_v8 }
 0x185   :  { %v2061_v43 = vcombine.low %v1901_v3, %v1902_v53  ;;  %v2062_v51 = vcombine.high %v1901_v3, %v1902_v53  ;;  %v1531_v23 = vcombine.high %v1509_v8, %v1509_v8  ;;  %v1532_v45 = vcombine.high %v1516_v34, %v1516_v34  ;;  %1678 = vst.msk [vmem:[#allocation2 + $0x142] ss:$8 sm:$0x3] %vm5529_vm2, %v1516_v34  ;;  %v6137_v3 = vpop.f32.mrb[76].mxu1 }
 0x186   :  { %v2049_v22 = vrot.slane %v2027_v58, %v5513_v33  ;;  %v2056_v19 = vrot.slane %v2028_v47, %v5513_v33  ;;  %v2057_v31 = vcombine.high %v2035_v29, %v2035_v29  ;;  %v2058_v54 = vcombine.high %v2042_v26, %v2042_v26  ;;  %2192 = vst.msk [vmem:[#allocation2 + $0x103] ss:$8 sm:$0x3] %vm5529_vm2, %v2035_v29  ;;  %v6151_v53 = vpop.f32.mrb[77].mxu1 }
 0x187   :  { %2204 = vst.msk [vmem:[#allocation2 + $0x143] ss:$8 sm:$0x3] %vm5529_vm2, %v2042_v26  ;;  %v1533_v59 = vcombine.high %v1523_v56, %v1523_v56  ;;  %v1534_v57 = vcombine.high %v1530_v7, %v1530_v7  ;;  %1669 = vst.msk [vmem:[#allocation2 + $0x112] ss:$8 sm:$0x3] %vm5529_vm2, %v1523_v56  ;;  %v1543_v24 = vrot.slane %v1535_v28, %v5513_v33 }
 0x188   :  { %1672 = vst.msk [vmem:[#allocation2 + $0x122] ss:$8 sm:$0x3] %vm5529_vm2, %v1531_v23  ;;  %1681 = vst.msk [vmem:[#allocation2 + $0x152] ss:$8 sm:$0x3] %vm5529_vm2, %v1530_v7  ;;  %v1550_v13 = vrot.slane %v1536_v2, %v5513_v33  ;;  %v2059_v49 = vcombine.high %v2049_v22, %v2049_v22  ;;  %v2060_v12 = vcombine.high %v2056_v19, %v2056_v19 }
 0x189   :  { %1684 = vst.msk [vmem:[#allocation2 + $0x162] ss:$8 sm:$0x3] %vm5529_vm2, %v1532_v45  ;;  %2195 = vst.msk [vmem:[#allocation2 + $0x113] ss:$8 sm:$0x3] %vm5529_vm2, %v2049_v22  ;;  %v2069_v32 = vrot.slane %v2061_v43, %v5513_v33  ;;  %v2076_v41 = vrot.slane %v2062_v51, %v5513_v33  ;;  %v1551_v6 = vcombine.high %v1543_v24, %v1543_v24 }
 0x18a   :  { %2198 = vst.msk [vmem:[#allocation2 + $0x123] ss:$8 sm:$0x3] %vm5529_vm2, %v2057_v31  ;;  %2207 = vst.msk [vmem:[#allocation2 + $0x153] ss:$8 sm:$0x3] %vm5529_vm2, %v2056_v19  ;;  %v1552_v9 = vcombine.high %v1550_v13, %v1550_v13  ;;  %v1559_v8 = vrot.slane %v1543_v24, %v5513_v33  ;;  %v1566_v34 = vrot.slane %v1550_v13, %v5513_v33 }
 0x18b   :  { %2210 = vst.msk [vmem:[#allocation2 + $0x163] ss:$8 sm:$0x3] %vm5529_vm2, %v2058_v54  ;;  %v6163_v28 = vpop.f32.mrb[78].mxu0  ;;  %v6165_v2 = vpop.f32.mrb[78].mxu1  ;;  %v2077_v51 = vcombine.high %v2069_v32, %v2069_v32  ;;  %v2078_v47 = vcombine.high %v2076_v41, %v2076_v41  ;;  %v2085_v29 = vrot.slane %v2069_v32, %v5513_v33  ;;  %v2092_v26 = vrot.slane %v2076_v41, %v5513_v33 }
 0x18c   :  { %1675 = vst.msk [vmem:[#allocation2 + $0x132] ss:$8 sm:$0x3] %vm5529_vm2, %v1533_v59  ;;  %1687 = vst.msk [vmem:[#allocation2 + $0x172] ss:$8 sm:$0x3] %vm5529_vm2, %v1534_v57  ;;  %v1573_v56 = vrot.slane %v1551_v6, %v5513_v33  ;;  %v1580_v7 = vrot.slane %v1552_v9, %v5513_v33  ;;  %v1581_v23 = vcombine.high %v1559_v8, %v1559_v8 }
 0x18d   :  { %v6173_v58 = vpop.f32.mrb[79].mxu0  ;;  %v6175_v43 = vpop.f32.mrb[79].mxu1  ;;  %2201 = vst.msk [vmem:[#allocation2 + $0x133] ss:$8 sm:$0x3] %vm5529_vm2, %v2059_v49  ;;  %v1582_v45 = vcombine.high %v1566_v34, %v1566_v34  ;;  %v2099_v22 = vrot.slane %v2077_v51, %v5513_v33  ;;  %v2106_v19 = vrot.slane %v2078_v47, %v5513_v33  ;;  %v2107_v31 = vcombine.high %v2085_v29, %v2085_v29 }
 0x18e   :  { %7009 = vst [vmem:[#allocation4_spill] sm:$0xff] %v6175_v43  ;;  %2213 = vst.msk [vmem:[#allocation2 + $0x173] ss:$8 sm:$0x3] %vm5529_vm2, %v2060_v12  ;;  %v2108_v54 = vcombine.high %v2092_v26, %v2092_v26  ;;  %v1583_v59 = vcombine.high %v1573_v56, %v1573_v56  ;;  %v1584_v57 = vcombine.high %v1580_v7, %v1580_v7 }
 0x18f   :  { %1690 = vst.msk [vmem:[#allocation2 + $0x182] ss:$8 sm:$0x3] %vm5529_vm2, %v1559_v8  ;;  %1702 = vst.msk [vmem:[#allocation2 + $0x1c2] ss:$8 sm:$0x3] %vm5529_vm2, %v1566_v34  ;;  %v2390_v24 = vmax.f32 %v5959_v46, %v6099_v52  ;;  %v2916_v13 = vmax.f32 %v5961_v0, %v6101_v62  ;;  %v2109_v49 = vcombine.high %v2099_v22, %v2099_v22 }
 0x190   :  { %2216 = vst.msk [vmem:[#allocation2 + $0x183] ss:$8 sm:$0x3] %vm5529_vm2, %v2085_v29  ;;  %2228 = vst.msk [vmem:[#allocation2 + $0x1c3] ss:$8 sm:$0x3] %vm5529_vm2, %v2092_v26  ;;  %v2110_v12 = vcombine.high %v2106_v19, %v2106_v19  ;;  %v2391_v46 = vmax.f32 %v5973_v35, %v6107_v1  ;;  %v2917_v0 = vmax.f32 %v5975_v36, %v6109_v61 }
 0x191   :  { %1693 = vst.msk [vmem:[#allocation2 + $0x192] ss:$8 sm:$0x3] %vm5529_vm2, %v1573_v56  ;;  %1696 = vst.msk [vmem:[#allocation2 + $0x1a2] ss:$8 sm:$0x3] %vm5529_vm2, %v1581_v23  ;;  %v2392_v32 = vmax.f32 %v5987_v42, %v6115_v17  ;;  %v2918_v41 = vmax.f32 %v5989_v4, %v6117_v55 }
 0x192   :  { %1705 = vst.msk [vmem:[#allocation2 + $0x1d2] ss:$8 sm:$0x3] %vm5529_vm2, %v1580_v7  ;;  %1708 = vst.msk [vmem:[#allocation2 + $0x1e2] ss:$8 sm:$0x3] %vm5529_vm2, %v1582_v45 }
 0x193   :  { %2219 = vst.msk [vmem:[#allocation2 + $0x193] ss:$8 sm:$0x3] %vm5529_vm2, %v2099_v22  ;;  %2222 = vst.msk [vmem:[#allocation2 + $0x1a3] ss:$8 sm:$0x3] %vm5529_vm2, %v2107_v31 }
 0x194   :  { %2231 = vst.msk [vmem:[#allocation2 + $0x1d3] ss:$8 sm:$0x3] %vm5529_vm2, %v2106_v19  ;;  %2234 = vst.msk [vmem:[#allocation2 + $0x1e3] ss:$8 sm:$0x3] %vm5529_vm2, %v2108_v54 }
 0x195   :  { %v2350_v52 = vpop.f32.mrb[80].mxu0  ;;  %v2876_v62 = vpop.f32.mrb[80].mxu1  ;;  %1699 = vst.msk [vmem:[#allocation2 + $0x1b2] ss:$8 sm:$0x3] %vm5529_vm2, %v1583_v59  ;;  %v6961_v29 = vmov 0.0  }
 0x196   :  { %1711 = vst.msk [vmem:[#allocation2 + $0x1f2] ss:$8 sm:$0x3] %vm5529_vm2, %v1584_v57  ;;  %v2352_v1 = vpop.f32.mrb[81].mxu0  ;;  %v2878_v61 = vpop.f32.mrb[81].mxu1  ;;  %4343 = vst [vmem:[#allocation3] sm:$0xff] %v6961_v29 }
 0x197   :  { %2225 = vst.msk [vmem:[#allocation2 + $0x1b3] ss:$8 sm:$0x3] %vm5529_vm2, %v2109_v49  ;;  %2237 = vst.msk [vmem:[#allocation2 + $0x1f3] ss:$8 sm:$0x3] %vm5529_vm2, %v2110_v12 }
 0x198   :  { %v2354_v6 = vpop.f32.mrb[82].mxu0  ;;  %v2880_v9 = vpop.f32.mrb[82].mxu1 }
 0x199   :  { %v2356_v51 = vpop.f32.mrb[83].mxu0  ;;  %v2882_v47 = vpop.f32.mrb[83].mxu1 }
 0x19a   :  { %v2360_v26 = vpop.f32.mrb[84].mxu0  ;;  %v2886_v56 = vpop.f32.mrb[84].mxu1 }
 0x19b   :  { %v6248_v7 = vpop.f32.mrb[85].mxu0  ;;  %v6250_v23 = vpop.f32.mrb[85].mxu1 }
 0x19c   :  { %v6252_v45 = vpop.f32.mrb[86].mxu0  ;;  %v6254_v22 = vpop.f32.mrb[86].mxu1 }
 0x19d   :  { %v6256_v19 = vpop.f32.mrb[87].mxu0  ;;  %v6258_v31 = vpop.f32.mrb[87].mxu1 }
 0x19e   :  { %v2370_v54 = vpop.f32.mrb[88].mxu0  ;;  %v2896_v59 = vpop.f32.mrb[88].mxu1 }
 0x19f   :  { %v2397_v57 = vmax.f32 %v2350_v52, %v2370_v54  ;;  %v2923_v49 = vmax.f32 %v2876_v62, %v2896_v59  ;;  %v2372_v12 = vpop.f32.mrb[89].mxu0  ;;  %v2898_v29 = vpop.f32.mrb[89].mxu1 }
 0x1a0   :  { %v2398_v34 = vmax.f32 %v2352_v1, %v2372_v12  ;;  %v2924_v8 = vmax.f32 %v2878_v61, %v2898_v29  ;;  %v2374_v55 = vpop.f32.mrb[90].mxu0  ;;  %v2900_v17 = vpop.f32.mrb[90].mxu1 }
 0x1a1   :  { %v2405_v4 = vmax.f32 %v2389_v37, %v2397_v57  ;;  %v2931_v42 = vmax.f32 %v2915_v25, %v2923_v49  ;;  %v2399_v36 = vmax.f32 %v2354_v6, %v2374_v55  ;;  %v2925_v35 = vmax.f32 %v2880_v9, %v2900_v17  ;;  %v2376_v10 = vpop.f32.mrb[91].mxu0  ;;  %v2902_v43 = vpop.f32.mrb[91].mxu1 }
 0x1a2   :  { %v2406_v52 = vmax.f32 %v2390_v24, %v2398_v34  ;;  %v2932_v62 = vmax.f32 %v2916_v13, %v2924_v8  ;;  %v2400_v54 = vmax.f32 %v2356_v51, %v2376_v10  ;;  %v2926_v59 = vmax.f32 %v2882_v47, %v2902_v43 }
 0x1a3   :  { %v2413_v1 = vadd.f32 %v2405_v4, %v5511_v44  ;;  %v2939_v61 = vadd.f32 %v2931_v42, %v5511_v44  ;;  %v2407_v29 = vmax.f32 %v2391_v46, %v2399_v36  ;;  %v2933_v12 = vmax.f32 %v2917_v0, %v2925_v35  ;;  %v2380_v46 = vpop.f32.mrb[92].mxu0  ;;  %v2906_v0 = vpop.f32.mrb[92].mxu1 }
 0x1a4   :  { %v2414_v16 = vadd.f32 %v2406_v52, %v5511_v44  ;;  %v2940_v15 = vadd.f32 %v2932_v62, %v5511_v44  ;;  %v2408_v39 = vmax.f32 %v2392_v32, %v2400_v54  ;;  %v2934_v11 = vmax.f32 %v2918_v41, %v2926_v59  ;;  %v6274_v32 = vpop.f32.mrb[93].mxu0  ;;  %v6276_v41 = vpop.f32.mrb[93].mxu1 }
 0x1a5   :  { %v2421_v37 = vmax.f32 %v2413_v1, 0.0  ;;  %v2947_v25 = vmax.f32 %v2939_v61, 0.0  ;;  %v2415_v17 = vadd.f32 %v2407_v29, %v5527_v14  ;;  %v2941_v24 = vadd.f32 %v2933_v12, %v5527_v14  ;;  %v6278_v51 = vpop.f32.mrb[94].mxu0  ;;  %v6280_v47 = vpop.f32.mrb[94].mxu1 }
 0x1a6   :  { %v2422_v10 = vmax.f32 %v2414_v16, 0.0  ;;  %v2948_v43 = vmax.f32 %v2940_v15, 0.0  ;;  %v2416_v13 = vadd.f32 %v2408_v39, %v5527_v14  ;;  %v2942_v42 = vadd.f32 %v2934_v11, %v5527_v14  ;;  %v6292_v54 = vpop.f32.mrb[95].mxu0  ;;  %v6294_v59 = vpop.f32.mrb[95].mxu1 }
 0x1a7   :  { %v2423_v35 = vmax.f32 %v2415_v17, 0.0  ;;  %v2949_v36 = vmax.f32 %v2941_v24, 0.0  ;;  %v2401_v4 = vmax.f32 %v2360_v26, %v2380_v46  ;;  %v2927_v55 = vmax.f32 %v2886_v56, %v2906_v0  ;;  %v6310_v46 = vpop.f32.mrb[96].mxu0  ;;  %v6312_v0 = vpop.f32.mrb[96].mxu1 }
 0x1a8   :  { %v2437_v6 = vcombine.low %v2421_v37, %v2422_v10  ;;  %v2438_v9 = vcombine.high %v2421_v37, %v2422_v10  ;;  %v2963_v8 = vcombine.low %v2947_v25, %v2948_v43  ;;  %v2964_v34 = vcombine.high %v2947_v25, %v2948_v43 }
 0x1a9   :  { %v2424_v57 = vmax.f32 %v2416_v13, 0.0  ;;  %v2950_v49 = vmax.f32 %v2942_v42, 0.0  ;;  %v7010_v52 = vmax.f32 %v6027_v20, %v6135_v38  ;;  %v7011_v26 = vmax.f32 %v6029_v21, %v6137_v3 }
 0x1aa   :  { %v2445_v1 = vrot.slane %v2437_v6, %v5513_v33  ;;  %v2452_v61 = vrot.slane %v2438_v9, %v5513_v33  ;;  %v2971_v29 = vrot.slane %v2963_v8, %v5513_v33  ;;  %v2978_v12 = vrot.slane %v2964_v34, %v5513_v33  ;;  %v6320_v6 = vpop.f32.mrb[97].mxu0  ;;  %v6322_v9 = vpop.f32.mrb[97].mxu1 }
 0x1ab   :  { %v6285_v62 = vmax.f32 %v7010_v52, %v2401_v4  ;;  %v6290_v56 = vmax.f32 %v7011_v26, %v2927_v55  ;;  %v2487_v20 = vcombine.low %v2423_v35, %v2424_v57  ;;  %v2488_v38 = vcombine.high %v2423_v35, %v2424_v57  ;;  %v6334_v52 = vpop.f32.mrb[98].mxu0  ;;  %v6336_v26 = vpop.f32.mrb[98].mxu1 }
 0x1ac   :  { %v3013_v16 = vcombine.low %v2949_v36, %v2950_v49  ;;  %v3014_v15 = vcombine.high %v2949_v36, %v2950_v49  ;;  %v2453_v39 = vcombine.high %v2445_v1, %v2445_v1  ;;  %v2454_v21 = vcombine.high %v2452_v61, %v2452_v61 }
 0x1ad   :  { %v2461_v3 = vrot.slane %v2445_v1, %v5513_v33  ;;  %v2468_v11 = vrot.slane %v2452_v61, %v5513_v33  ;;  %v2979_v37 = vcombine.high %v2971_v29, %v2971_v29  ;;  %v2980_v25 = vcombine.high %v2978_v12, %v2978_v12 }
 0x1ae   :  { %v2987_v17 = vrot.slane %v2971_v29, %v5513_v33  ;;  %v2994_v24 = vrot.slane %v2978_v12, %v5513_v33  ;;  %v2475_v10 = vrot.slane %v2453_v39, %v5513_v33  ;;  %v2482_v43 = vrot.slane %v2454_v21, %v5513_v33 }
 0x1af   :  { %v2483_v13 = vcombine.high %v2461_v3, %v2461_v3  ;;  %v2484_v42 = vcombine.high %v2468_v11, %v2468_v11  ;;  %2670 = vst.msk [vmem:[#allocation2 + $0x4] ss:$8 sm:$0x3] %vm5529_vm2, %v2461_v3  ;;  %2682 = vst.msk [vmem:[#allocation2 + $0x44] ss:$8 sm:$0x3] %vm5529_vm2, %v2468_v11  ;;  %v3001_v35 = vrot.slane %v2979_v37, %v5513_v33 }
 0x1b0   :  { %v3008_v36 = vrot.slane %v2980_v25, %v5513_v33  ;;  %v3009_v4 = vcombine.high %v2987_v17, %v2987_v17  ;;  %v3010_v55 = vcombine.high %v2994_v24, %v2994_v24  ;;  %3196 = vst.msk [vmem:[#allocation2 + $0x5] ss:$8 sm:$0x3] %vm5529_vm2, %v2987_v17  ;;  %3208 = vst.msk [vmem:[#allocation2 + $0x45] ss:$8 sm:$0x3] %vm5529_vm2, %v2994_v24 }
 0x1b1   :  { %v2485_v8 = vcombine.high %v2475_v10, %v2475_v10  ;;  %v2486_v34 = vcombine.high %v2482_v43, %v2482_v43  ;;  %2673 = vst.msk [vmem:[#allocation2 + $0x14] ss:$8 sm:$0x3] %vm5529_vm2, %v2475_v10  ;;  %2676 = vst.msk [vmem:[#allocation2 + $0x24] ss:$8 sm:$0x3] %vm5529_vm2, %v2483_v13  ;;  %v2495_v57 = vrot.slane %v2487_v20, %v5513_v33 }
 0x1b2   :  { %2685 = vst.msk [vmem:[#allocation2 + $0x54] ss:$8 sm:$0x3] %vm5529_vm2, %v2482_v43  ;;  %2688 = vst.msk [vmem:[#allocation2 + $0x64] ss:$8 sm:$0x3] %vm5529_vm2, %v2484_v42  ;;  %v2502_v49 = vrot.slane %v2488_v38, %v5513_v33  ;;  %v3011_v1 = vcombine.high %v3001_v35, %v3001_v35  ;;  %v3012_v61 = vcombine.high %v3008_v36, %v3008_v36 }
 0x1b3   :  { %3199 = vst.msk [vmem:[#allocation2 + $0x15] ss:$8 sm:$0x3] %vm5529_vm2, %v3001_v35  ;;  %3202 = vst.msk [vmem:[#allocation2 + $0x25] ss:$8 sm:$0x3] %vm5529_vm2, %v3009_v4  ;;  %v3021_v29 = vrot.slane %v3013_v16, %v5513_v33  ;;  %v3028_v12 = vrot.slane %v3014_v15, %v5513_v33  ;;  %v2503_v39 = vcombine.high %v2495_v57, %v2495_v57 }
 0x1b4   :  { %3211 = vst.msk [vmem:[#allocation2 + $0x55] ss:$8 sm:$0x3] %vm5529_vm2, %v3008_v36  ;;  %3214 = vst.msk [vmem:[#allocation2 + $0x65] ss:$8 sm:$0x3] %vm5529_vm2, %v3010_v55  ;;  %v2504_v21 = vcombine.high %v2502_v49, %v2502_v49  ;;  %v2511_v3 = vrot.slane %v2495_v57, %v5513_v33  ;;  %v2518_v11 = vrot.slane %v2502_v49, %v5513_v33 }
 0x1b5   :  { %v6348_v20 = vpop.f32.mrb[99].mxu0  ;;  %v6350_v38 = vpop.f32.mrb[99].mxu1  ;;  %2679 = vst.msk [vmem:[#allocation2 + $0x34] ss:$8 sm:$0x3] %vm5529_vm2, %v2485_v8  ;;  %v3029_v16 = vcombine.high %v3021_v29, %v3021_v29  ;;  %v3030_v15 = vcombine.high %v3028_v12, %v3028_v12  ;;  %v3037_v37 = vrot.slane %v3021_v29, %v5513_v33  ;;  %v3044_v25 = vrot.slane %v3028_v12, %v5513_v33 }
 0x1b6   :  { %2691 = vst.msk [vmem:[#allocation2 + $0x74] ss:$8 sm:$0x3] %vm5529_vm2, %v2486_v34  ;;  %3205 = vst.msk [vmem:[#allocation2 + $0x35] ss:$8 sm:$0x3] %vm5529_vm2, %v3011_v1  ;;  %v2525_v17 = vrot.slane %v2503_v39, %v5513_v33  ;;  %v2532_v24 = vrot.slane %v2504_v21, %v5513_v33  ;;  %v2533_v10 = vcombine.high %v2511_v3, %v2511_v3 }
 0x1b7   :  { %3217 = vst.msk [vmem:[#allocation2 + $0x75] ss:$8 sm:$0x3] %vm5529_vm2, %v3012_v61  ;;  %v2534_v43 = vcombine.high %v2518_v11, %v2518_v11  ;;  %2694 = vst.msk [vmem:[#allocation2 + $0x84] ss:$8 sm:$0x3] %vm5529_vm2, %v2511_v3  ;;  %v3051_v13 = vrot.slane %v3029_v16, %v5513_v33  ;;  %v3058_v42 = vrot.slane %v3030_v15, %v5513_v33 }
 0x1b8   :  { %2706 = vst.msk [vmem:[#allocation2 + $0xc4] ss:$8 sm:$0x3] %vm5529_vm2, %v2518_v11  ;;  %v3059_v35 = vcombine.high %v3037_v37, %v3037_v37  ;;  %v3060_v36 = vcombine.high %v3044_v25, %v3044_v25  ;;  %3220 = vst.msk [vmem:[#allocation2 + $0x85] ss:$8 sm:$0x3] %vm5529_vm2, %v3037_v37  ;;  %v2535_v4 = vcombine.high %v2525_v17, %v2525_v17 }
 0x1b9   :  { %3232 = vst.msk [vmem:[#allocation2 + $0xc5] ss:$8 sm:$0x3] %vm5529_vm2, %v3044_v25  ;;  %v2536_v55 = vcombine.high %v2532_v24, %v2532_v24  ;;  %2697 = vst.msk [vmem:[#allocation2 + $0x94] ss:$8 sm:$0x3] %vm5529_vm2, %v2525_v17  ;;  %v2417_v8 = vadd.f32 %v6285_v62, %v5585_v48  ;;  %v2943_v34 = vadd.f32 %v6290_v56, %v5585_v48 }
 0x1ba   :  { %2700 = vst.msk [vmem:[#allocation2 + $0xa4] ss:$8 sm:$0x3] %vm5529_vm2, %v2533_v10  ;;  %2709 = vst.msk [vmem:[#allocation2 + $0xd4] ss:$8 sm:$0x3] %vm5529_vm2, %v2532_v24  ;;  %v3061_v1 = vcombine.high %v3051_v13, %v3051_v13  ;;  %v3062_v61 = vcombine.high %v3058_v42, %v3058_v42  ;;  %v2402_v62 = vmax.f32 %v6248_v7, %v6274_v32 }
 0x1bb   :  { %2712 = vst.msk [vmem:[#allocation2 + $0xe4] ss:$8 sm:$0x3] %vm5529_vm2, %v2534_v43  ;;  %v6388_v57 = vpop.f32.mrb[100].mxu0  ;;  %v6390_v49 = vpop.f32.mrb[100].mxu1  ;;  %v2928_v56 = vmax.f32 %v6250_v23, %v6276_v41  ;;  %v2403_v39 = vmax.f32 %v6252_v45, %v6278_v51  ;;  %v2929_v21 = vmax.f32 %v6254_v22, %v6280_v47  ;;  %v7012_v23 = vmax.f32 %v6043_v27, %v6149_v50  ;;  %v7019_v24 = vld [vmem:[#allocation9_spill] sm:$0xff] }
 0x1bc   :  { %3223 = vst.msk [vmem:[#allocation2 + $0x95] ss:$8 sm:$0x3] %vm5529_vm2, %v3051_v13  ;;  %3226 = vst.msk [vmem:[#allocation2 + $0xa5] ss:$8 sm:$0x3] %vm5529_vm2, %v3059_v35  ;;  %v7013_v45 = vmax.f32 %v6045_v60, %v6151_v53  ;;  %v2404_v22 = vmax.f32 %v6256_v19, %v6292_v54  ;;  %v2930_v47 = vmax.f32 %v6258_v31, %v6294_v59 }
 0x1bd   :  { %3235 = vst.msk [vmem:[#allocation2 + $0xd5] ss:$8 sm:$0x3] %vm5529_vm2, %v3058_v42  ;;  %3238 = vst.msk [vmem:[#allocation2 + $0xe5] ss:$8 sm:$0x3] %vm5529_vm2, %v3060_v36  ;;  %v2410_v41 = vmax.f32 %v7012_v23, %v2402_v62  ;;  %v7014_v27 = vmax.f32 %v6055_v63, %v6163_v28  ;;  %v7015_v60 = vmax.f32 %v6057_v18, %v6165_v2 }
 0x1be   :  { %v6404_v29 = vpop.f32.mrb[101].mxu0  ;;  %v6406_v12 = vpop.f32.mrb[101].mxu1  ;;  %2703 = vst.msk [vmem:[#allocation2 + $0xb4] ss:$8 sm:$0x3] %vm5529_vm2, %v2535_v4  ;;  %v2936_v51 = vmax.f32 %v7013_v45, %v2928_v56  ;;  %v2425_v16 = vmax.f32 %v2417_v8, 0.0  ;;  %v7016_v31 = vmax.f32 %v6073_v40, %v6173_v58 }
 0x1bf   :  { %2715 = vst.msk [vmem:[#allocation2 + $0xf4] ss:$8 sm:$0x3] %vm5529_vm2, %v2536_v55  ;;  %v6416_v7 = vpop.f32.mrb[102].mxu0  ;;  %v6418_v32 = vpop.f32.mrb[102].mxu1  ;;  %v2951_v15 = vmax.f32 %v2943_v34, 0.0  ;;  %v2411_v50 = vmax.f32 %v7014_v27, %v2403_v39  ;;  %v2937_v53 = vmax.f32 %v7015_v60, %v2929_v21  ;;  %v2418_v37 = vadd.f32 %v2410_v41, %v5585_v48 }
 0x1c0   :  { %3229 = vst.msk [vmem:[#allocation2 + $0xb5] ss:$8 sm:$0x3] %vm5529_vm2, %v3061_v1  ;;  %3241 = vst.msk [vmem:[#allocation2 + $0xf5] ss:$8 sm:$0x3] %vm5529_vm2, %v3062_v61  ;;  %v2944_v19 = vadd.f32 %v2936_v51, %v5585_v48  ;;  %v2412_v54 = vmax.f32 %v7016_v31, %v2404_v22 }
 0x1c1   :  { %v6434_v3 = vpop.f32.mrb[103].mxu0  ;;  %v6436_v11 = vpop.f32.mrb[103].mxu1  ;;  %v7017_v59 = vld [vmem:[#allocation4_spill] sm:$0xff]  ;;  %v2419_v10 = vadd.f32 %v2411_v50, %v7019_v24  ;;  %v2945_v63 = vadd.f32 %v2937_v53, %v7019_v24  ;;  %v2426_v28 = vmax.f32 %v2418_v37, 0.0 }
 0x1c2   :  { %v7018_v25 = vmax.f32 %v6075_v5, %v7017_v59  ;;  %v2952_v43 = vmax.f32 %v2944_v19, 0.0  ;;  %v2420_v18 = vadd.f32 %v2412_v54, %v7019_v24  ;;  %v6456_v35 = vpop.f32.mrb[104].mxu0  ;;  %v6458_v40 = vpop.f32.mrb[104].mxu1 }
 0x1c3   :  { %v2427_v13 = vmax.f32 %v2419_v10, 0.0  ;;  %v2953_v42 = vmax.f32 %v2945_v63, 0.0  ;;  %v2537_v58 = vcombine.low %v2425_v16, %v2426_v28  ;;  %v2538_v36 = vcombine.high %v2425_v16, %v2426_v28  ;;  %v6460_v55 = vpop.f32.mrb[105].mxu0  ;;  %v6462_v8 = vpop.f32.mrb[105].mxu1 }
 0x1c4   :  { %v2938_v17 = vmax.f32 %v7018_v25, %v2930_v47  ;;  %v3063_v5 = vcombine.low %v2951_v15, %v2952_v43  ;;  %v3064_v4 = vcombine.high %v2951_v15, %v2952_v43  ;;  %v2428_v34 = vmax.f32 %v2420_v18, 0.0  ;;  %v6468_v56 = vpop.f32.mrb[106].mxu0  ;;  %v6470_v39 = vpop.f32.mrb[106].mxu1 }
 0x1c5   :  { %v3441_v61 = vmax.f32 %v6310_v46, %v6456_v35  ;;  %v3967_v62 = vmax.f32 %v6312_v0, %v6458_v40  ;;  %v2545_v21 = vrot.slane %v2537_v58, %v5513_v33  ;;  %v2552_v23 = vrot.slane %v2538_v36, %v5513_v33  ;;  %v6476_v51 = vpop.f32.mrb[107].mxu0  ;;  %v6478_v22 = vpop.f32.mrb[107].mxu1 }
 0x1c6   :  { %v2946_v2 = vadd.f32 %v2938_v17, %v7019_v24  ;;  %v3071_v41 = vrot.slane %v3063_v5, %v5513_v33  ;;  %v3078_v45 = vrot.slane %v3064_v4, %v5513_v33  ;;  %v2587_v47 = vcombine.low %v2427_v13, %v2428_v34 }
 0x1c7   :  { %v2588_v16 = vcombine.high %v2427_v13, %v2428_v34  ;;  %v2553_v50 = vcombine.high %v2545_v21, %v2545_v21  ;;  %v2554_v60 = vcombine.high %v2552_v23, %v2552_v23  ;;  %v2561_v53 = vrot.slane %v2545_v21, %v5513_v33  ;;  %v6496_v13 = vpop.f32.mrb[108].mxu0 }
 0x1c8   :  { %v2954_v1 = vmax.f32 %v2946_v2, 0.0  ;;  %v2568_v37 = vrot.slane %v2552_v23, %v5513_v33  ;;  %v3079_v19 = vcombine.high %v3071_v41, %v3071_v41  ;;  %v3080_v31 = vcombine.high %v3078_v45, %v3078_v45  ;;  %v6510_v34 = vpop.f32.mrb[109].mxu0 }
 0x1c9   :  { %v3087_v54 = vrot.slane %v3071_v41, %v5513_v33  ;;  %v3094_v59 = vrot.slane %v3078_v45, %v5513_v33  ;;  %v2575_v25 = vrot.slane %v2553_v50, %v5513_v33  ;;  %v2582_v17 = vrot.slane %v2554_v60, %v5513_v33  ;;  %2718 = vst.msk [vmem:[#allocation2 + $0x104] ss:$8 sm:$0x3] %vm5529_vm2, %v2561_v53 }
 0x1ca   :  { %v3113_v15 = vcombine.low %v2953_v42, %v2954_v1  ;;  %v3114_v27 = vcombine.high %v2953_v42, %v2954_v1  ;;  %v2583_v10 = vcombine.high %v2561_v53, %v2561_v53  ;;  %v2584_v63 = vcombine.high %v2568_v37, %v2568_v37  ;;  %2730 = vst.msk [vmem:[#allocation2 + $0x144] ss:$8 sm:$0x3] %vm5529_vm2, %v2568_v37  ;;  %v6498_v42 = vpop.f32.mrb[108].mxu1 }
 0x1cb   :  { %v3101_v28 = vrot.slane %v3079_v19, %v5513_v33  ;;  %v3108_v43 = vrot.slane %v3080_v31, %v5513_v33  ;;  %v3109_v18 = vcombine.high %v3087_v54, %v3087_v54  ;;  %v3110_v2 = vcombine.high %v3094_v59, %v3094_v59  ;;  %3244 = vst.msk [vmem:[#allocation2 + $0x105] ss:$8 sm:$0x3] %vm5529_vm2, %v3087_v54  ;;  %v6512_v1 = vpop.f32.mrb[109].mxu1 }
 0x1cc   :  { %3256 = vst.msk [vmem:[#allocation2 + $0x145] ss:$8 sm:$0x3] %vm5529_vm2, %v3094_v59  ;;  %v2585_v58 = vcombine.high %v2575_v25, %v2575_v25  ;;  %v2586_v36 = vcombine.high %v2582_v17, %v2582_v17  ;;  %2721 = vst.msk [vmem:[#allocation2 + $0x114] ss:$8 sm:$0x3] %vm5529_vm2, %v2575_v25  ;;  %v2595_v5 = vrot.slane %v2587_v47, %v5513_v33 }
 0x1cd   :  { %2724 = vst.msk [vmem:[#allocation2 + $0x124] ss:$8 sm:$0x3] %vm5529_vm2, %v2583_v10  ;;  %2733 = vst.msk [vmem:[#allocation2 + $0x154] ss:$8 sm:$0x3] %vm5529_vm2, %v2582_v17  ;;  %v2602_v4 = vrot.slane %v2588_v16, %v5513_v33  ;;  %v3111_v21 = vcombine.high %v3101_v28, %v3101_v28  ;;  %v3112_v23 = vcombine.high %v3108_v43, %v3108_v43 }
 0x1ce   :  { %2736 = vst.msk [vmem:[#allocation2 + $0x164] ss:$8 sm:$0x3] %vm5529_vm2, %v2584_v63  ;;  %3247 = vst.msk [vmem:[#allocation2 + $0x115] ss:$8 sm:$0x3] %vm5529_vm2, %v3101_v28  ;;  %v3121_v41 = vrot.slane %v3113_v15, %v5513_v33  ;;  %v3128_v45 = vrot.slane %v3114_v27, %v5513_v33  ;;  %v2603_v50 = vcombine.high %v2595_v5, %v2595_v5 }
 0x1cf   :  { %3250 = vst.msk [vmem:[#allocation2 + $0x125] ss:$8 sm:$0x3] %vm5529_vm2, %v3109_v18  ;;  %3259 = vst.msk [vmem:[#allocation2 + $0x155] ss:$8 sm:$0x3] %vm5529_vm2, %v3108_v43  ;;  %v2604_v60 = vcombine.high %v2602_v4, %v2602_v4  ;;  %v2611_v53 = vrot.slane %v2595_v5, %v5513_v33  ;;  %v2618_v37 = vrot.slane %v2602_v4, %v5513_v33 }
 0x1d0   :  { %3262 = vst.msk [vmem:[#allocation2 + $0x165] ss:$8 sm:$0x3] %vm5529_vm2, %v3110_v2  ;;  %v6524_v47 = vpop.f32.mrb[110].mxu0  ;;  %v6526_v16 = vpop.f32.mrb[110].mxu1  ;;  %v3129_v27 = vcombine.high %v3121_v41, %v3121_v41  ;;  %v3130_v31 = vcombine.high %v3128_v45, %v3128_v45  ;;  %v3137_v54 = vrot.slane %v3121_v41, %v5513_v33  ;;  %v3144_v59 = vrot.slane %v3128_v45, %v5513_v33 }
 0x1d1   :  { %2727 = vst.msk [vmem:[#allocation2 + $0x134] ss:$8 sm:$0x3] %vm5529_vm2, %v2585_v58  ;;  %2739 = vst.msk [vmem:[#allocation2 + $0x174] ss:$8 sm:$0x3] %vm5529_vm2, %v2586_v36  ;;  %v2625_v25 = vrot.slane %v2603_v50, %v5513_v33  ;;  %v2632_v17 = vrot.slane %v2604_v60, %v5513_v33  ;;  %v2633_v10 = vcombine.high %v2611_v53, %v2611_v53 }
 0x1d2   :  { %v6534_v19 = vpop.f32.mrb[111].mxu0  ;;  %v6536_v15 = vpop.f32.mrb[111].mxu1  ;;  %3253 = vst.msk [vmem:[#allocation2 + $0x135] ss:$8 sm:$0x3] %vm5529_vm2, %v3111_v21  ;;  %v2634_v63 = vcombine.high %v2618_v37, %v2618_v37  ;;  %v3151_v28 = vrot.slane %v3129_v27, %v5513_v33  ;;  %v3158_v43 = vrot.slane %v3130_v31, %v5513_v33  ;;  %v3159_v18 = vcombine.high %v3137_v54, %v3137_v54 }
 0x1d3   :  { %7020 = vst [vmem:[#allocation7_spill] sm:$0xff] %v6536_v15  ;;  %3265 = vst.msk [vmem:[#allocation2 + $0x175] ss:$8 sm:$0x3] %vm5529_vm2, %v3112_v23  ;;  %v3160_v2 = vcombine.high %v3144_v59, %v3144_v59  ;;  %v2635_v58 = vcombine.high %v2625_v25, %v2625_v25  ;;  %v2636_v36 = vcombine.high %v2632_v17, %v2632_v17 }
 0x1d4   :  { %2742 = vst.msk [vmem:[#allocation2 + $0x184] ss:$8 sm:$0x3] %vm5529_vm2, %v2611_v53  ;;  %2754 = vst.msk [vmem:[#allocation2 + $0x1c4] ss:$8 sm:$0x3] %vm5529_vm2, %v2618_v37  ;;  %v3442_v5 = vmax.f32 %v6320_v6, %v6460_v55  ;;  %v3968_v4 = vmax.f32 %v6322_v9, %v6462_v8  ;;  %v3161_v21 = vcombine.high %v3151_v28, %v3151_v28 }
 0x1d5   :  { %3268 = vst.msk [vmem:[#allocation2 + $0x185] ss:$8 sm:$0x3] %vm5529_vm2, %v3137_v54  ;;  %3280 = vst.msk [vmem:[#allocation2 + $0x1c5] ss:$8 sm:$0x3] %vm5529_vm2, %v3144_v59  ;;  %v3162_v23 = vcombine.high %v3158_v43, %v3158_v43  ;;  %v3443_v6 = vmax.f32 %v6334_v52, %v6468_v56  ;;  %v3969_v9 = vmax.f32 %v6336_v26, %v6470_v39 }
 0x1d6   :  { %2745 = vst.msk [vmem:[#allocation2 + $0x194] ss:$8 sm:$0x3] %vm5529_vm2, %v2625_v25  ;;  %2748 = vst.msk [vmem:[#allocation2 + $0x1a4] ss:$8 sm:$0x3] %vm5529_vm2, %v2633_v10  ;;  %v3444_v41 = vmax.f32 %v6348_v20, %v6476_v51  ;;  %v3970_v45 = vmax.f32 %v6350_v38, %v6478_v22 }
 0x1d7   :  { %2757 = vst.msk [vmem:[#allocation2 + $0x1d4] ss:$8 sm:$0x3] %vm5529_vm2, %v2632_v17  ;;  %2760 = vst.msk [vmem:[#allocation2 + $0x1e4] ss:$8 sm:$0x3] %vm5529_vm2, %v2634_v63 }
 0x1d8   :  { %3271 = vst.msk [vmem:[#allocation2 + $0x195] ss:$8 sm:$0x3] %vm5529_vm2, %v3151_v28  ;;  %3274 = vst.msk [vmem:[#allocation2 + $0x1a5] ss:$8 sm:$0x3] %vm5529_vm2, %v3159_v18 }
 0x1d9   :  { %3283 = vst.msk [vmem:[#allocation2 + $0x1d5] ss:$8 sm:$0x3] %vm5529_vm2, %v3158_v43  ;;  %3286 = vst.msk [vmem:[#allocation2 + $0x1e5] ss:$8 sm:$0x3] %vm5529_vm2, %v3160_v2 }
 0x1da   :  { %v3402_v55 = vpop.f32.mrb[112].mxu0  ;;  %v3928_v8 = vpop.f32.mrb[112].mxu1  ;;  %2751 = vst.msk [vmem:[#allocation2 + $0x1b4] ss:$8 sm:$0x3] %vm5529_vm2, %v2635_v58 }
 0x1db   :  { %2763 = vst.msk [vmem:[#allocation2 + $0x1f4] ss:$8 sm:$0x3] %vm5529_vm2, %v2636_v36  ;;  %v3404_v56 = vpop.f32.mrb[113].mxu0  ;;  %v3930_v39 = vpop.f32.mrb[113].mxu1 }
 0x1dc   :  { %3277 = vst.msk [vmem:[#allocation2 + $0x1b5] ss:$8 sm:$0x3] %vm5529_vm2, %v3161_v21  ;;  %3289 = vst.msk [vmem:[#allocation2 + $0x1f5] ss:$8 sm:$0x3] %vm5529_vm2, %v3162_v23 }
 0x1dd   :  { %v3406_v50 = vpop.f32.mrb[114].mxu0  ;;  %v3932_v60 = vpop.f32.mrb[114].mxu1 }
 0x1de   :  { %v3408_v27 = vpop.f32.mrb[115].mxu0  ;;  %v3934_v31 = vpop.f32.mrb[115].mxu1 }
 0x1df   :  { %v3412_v54 = vpop.f32.mrb[116].mxu0  ;;  %v3938_v59 = vpop.f32.mrb[116].mxu1 }
 0x1e0   :  { %v6608_v25 = vpop.f32.mrb[117].mxu0  ;;  %v6610_v17 = vpop.f32.mrb[117].mxu1 }
 0x1e1   :  { %v6612_v10 = vpop.f32.mrb[118].mxu0  ;;  %v6614_v63 = vpop.f32.mrb[118].mxu1 }
 0x1e2   :  { %v6616_v28 = vpop.f32.mrb[119].mxu0  ;;  %v6618_v43 = vpop.f32.mrb[119].mxu1 }
 0x1e3   :  { %v3422_v18 = vpop.f32.mrb[120].mxu0  ;;  %v3948_v2 = vpop.f32.mrb[120].mxu1 }
 0x1e4   :  { %v3449_v58 = vmax.f32 %v3402_v55, %v3422_v18  ;;  %v3975_v36 = vmax.f32 %v3928_v8, %v3948_v2  ;;  %v3424_v21 = vpop.f32.mrb[121].mxu0  ;;  %v3950_v23 = vpop.f32.mrb[121].mxu1 }
 0x1e5   :  { %v3450_v37 = vmax.f32 %v3404_v56, %v3424_v21  ;;  %v3976_v53 = vmax.f32 %v3930_v39, %v3950_v23  ;;  %v3426_v22 = vpop.f32.mrb[122].mxu0  ;;  %v3952_v51 = vpop.f32.mrb[122].mxu1 }
 0x1e6   :  { %v3457_v38 = vmax.f32 %v3441_v61, %v3449_v58  ;;  %v3983_v20 = vmax.f32 %v3967_v62, %v3975_v36  ;;  %v3451_v26 = vmax.f32 %v3406_v50, %v3426_v22  ;;  %v3977_v52 = vmax.f32 %v3932_v60, %v3952_v51  ;;  %v3428_v24 = vpop.f32.mrb[123].mxu0  ;;  %v3954_v15 = vpop.f32.mrb[123].mxu1 }
 0x1e7   :  { %v3458_v55 = vmax.f32 %v3442_v5, %v3450_v37  ;;  %v3984_v8 = vmax.f32 %v3968_v4, %v3976_v53  ;;  %v3452_v18 = vmax.f32 %v3408_v27, %v3428_v24  ;;  %v3978_v2 = vmax.f32 %v3934_v31, %v3954_v15 }
 0x1e8   :  { %v3465_v56 = vadd.f32 %v3457_v38, %v5511_v44  ;;  %v3991_v39 = vadd.f32 %v3983_v20, %v5511_v44  ;;  %v3459_v21 = vmax.f32 %v3443_v6, %v3451_v26  ;;  %v3985_v23 = vmax.f32 %v3969_v9, %v3977_v52  ;;  %v3432_v6 = vpop.f32.mrb[124].mxu0  ;;  %v3958_v9 = vpop.f32.mrb[124].mxu1 }
 0x1e9   :  { %v3466_v46 = vadd.f32 %v3458_v55, %v5511_v44  ;;  %v3992_v35 = vadd.f32 %v3984_v8, %v5511_v44  ;;  %v3460_v0 = vmax.f32 %v3444_v41, %v3452_v18  ;;  %v3986_v40 = vmax.f32 %v3970_v45, %v3978_v2  ;;  %v6634_v41 = vpop.f32.mrb[125].mxu0  ;;  %v6636_v45 = vpop.f32.mrb[125].mxu1 }
 0x1ea   :  { %v3473_v61 = vmax.f32 %v3465_v56, 0.0  ;;  %v3999_v62 = vmax.f32 %v3991_v39, 0.0  ;;  %v3467_v51 = vadd.f32 %v3459_v21, %v5527_v14  ;;  %v3993_v5 = vadd.f32 %v3985_v23, %v5527_v14  ;;  %v6638_v37 = vpop.f32.mrb[126].mxu0  ;;  %v6640_v27 = vpop.f32.mrb[126].mxu1 }
 0x1eb   :  { %v3474_v24 = vmax.f32 %v3466_v46, 0.0  ;;  %v4000_v15 = vmax.f32 %v3992_v35, 0.0  ;;  %v3468_v4 = vadd.f32 %v3460_v0, %v5527_v14  ;;  %v3994_v20 = vadd.f32 %v3986_v40, %v5527_v14  ;;  %v6652_v55 = vpop.f32.mrb[127].mxu0  ;;  %v6654_v8 = vpop.f32.mrb[127].mxu1 }
 0x1ec   :  { %v3475_v52 = vmax.f32 %v3467_v51, 0.0  ;;  %v4001_v26 = vmax.f32 %v3993_v5, 0.0  ;;  %v3453_v38 = vmax.f32 %v3412_v54, %v3432_v6  ;;  %v3979_v44 = vmax.f32 %v3938_v59, %v3958_v9 }
 0x1ed   :  { %v3489_v22 = vcombine.low %v3473_v61, %v3474_v24  ;;  %v3490_v50 = vcombine.high %v3473_v61, %v3474_v24  ;;  %v4015_v60 = vcombine.low %v3999_v62, %v4000_v15  ;;  %v4016_v53 = vcombine.high %v3999_v62, %v4000_v15 }
 0x1ee   :  { %v3476_v31 = vmax.f32 %v3468_v4, 0.0  ;;  %v4002_v14 = vmax.f32 %v3994_v20, 0.0  ;;  %v7021_v58 = vmax.f32 %v6388_v57, %v6496_v13  ;;  %v7022_v54 = vmax.f32 %v6390_v49, %v6498_v42 }
 0x1ef   :  { %v3497_v18 = vrot.slane %v3489_v22, %v5513_v33  ;;  %v3504_v2 = vrot.slane %v3490_v50, %v5513_v33  ;;  %v4023_v56 = vrot.slane %v4015_v60, %v5513_v33  ;;  %v4030_v39 = vrot.slane %v4016_v53, %v5513_v33 }
 0x1f0   :  { %v6645_v36 = vmax.f32 %v7021_v58, %v3453_v38  ;;  %v6650_v59 = vmax.f32 %v7022_v54, %v3979_v44  ;;  %v3539_v57 = vcombine.low %v3475_v52, %v3476_v31  ;;  %v3540_v13 = vcombine.high %v3475_v52, %v3476_v31 }
 0x1f1   :  { %v4065_v21 = vcombine.low %v4001_v26, %v4002_v14  ;;  %v4066_v23 = vcombine.high %v4001_v26, %v4002_v14  ;;  %v3505_v46 = vcombine.high %v3497_v18, %v3497_v18  ;;  %v3506_v49 = vcombine.high %v3504_v2, %v3504_v2 }
 0x1f2   :  { %v3513_v42 = vrot.slane %v3497_v18, %v5513_v33  ;;  %v3520_v35 = vrot.slane %v3504_v2, %v5513_v33  ;;  %v4031_v0 = vcombine.high %v4023_v56, %v4023_v56  ;;  %v4032_v40 = vcombine.high %v4030_v39, %v4030_v39 }
 0x1f3   :  { %v4039_v61 = vrot.slane %v4023_v56, %v5513_v33  ;;  %v4046_v62 = vrot.slane %v4030_v39, %v5513_v33  ;;  %v3527_v51 = vrot.slane %v3505_v46, %v5513_v33  ;;  %v3534_v5 = vrot.slane %v3506_v49, %v5513_v33 }
 0x1f4   :  { %v3535_v24 = vcombine.high %v3513_v42, %v3513_v42  ;;  %v3536_v15 = vcombine.high %v3520_v35, %v3520_v35  ;;  %3722 = vst.msk [vmem:[#allocation2 + $0x6] ss:$8 sm:$0x3] %vm5529_vm2, %v3513_v42  ;;  %3734 = vst.msk [vmem:[#allocation2 + $0x46] ss:$8 sm:$0x3] %vm5529_vm2, %v3520_v35  ;;  %v4053_v4 = vrot.slane %v4031_v0, %v5513_v33 }
 0x1f5   :  { %v4060_v20 = vrot.slane %v4032_v40, %v5513_v33  ;;  %v4061_v6 = vcombine.high %v4039_v61, %v4039_v61  ;;  %v4062_v9 = vcombine.high %v4046_v62, %v4046_v62  ;;  %4248 = vst.msk [vmem:[#allocation2 + $0x7] ss:$8 sm:$0x3] %vm5529_vm2, %v4039_v61  ;;  %4260 = vst.msk [vmem:[#allocation2 + $0x47] ss:$8 sm:$0x3] %vm5529_vm2, %v4046_v62 }
 0x1f6   :  { %v3537_v52 = vcombine.high %v3527_v51, %v3527_v51  ;;  %v3538_v26 = vcombine.high %v3534_v5, %v3534_v5  ;;  %3725 = vst.msk [vmem:[#allocation2 + $0x16] ss:$8 sm:$0x3] %vm5529_vm2, %v3527_v51  ;;  %3728 = vst.msk [vmem:[#allocation2 + $0x26] ss:$8 sm:$0x3] %vm5529_vm2, %v3535_v24  ;;  %v3547_v38 = vrot.slane %v3539_v57, %v5513_v33 }
 0x1f7   :  { %3737 = vst.msk [vmem:[#allocation2 + $0x56] ss:$8 sm:$0x3] %vm5529_vm2, %v3534_v5  ;;  %3740 = vst.msk [vmem:[#allocation2 + $0x66] ss:$8 sm:$0x3] %vm5529_vm2, %v3536_v15  ;;  %v3554_v44 = vrot.slane %v3540_v13, %v5513_v33  ;;  %v4063_v22 = vcombine.high %v4053_v4, %v4053_v4  ;;  %v4064_v50 = vcombine.high %v4060_v20, %v4060_v20 }
 0x1f8   :  { %4251 = vst.msk [vmem:[#allocation2 + $0x17] ss:$8 sm:$0x3] %vm5529_vm2, %v4053_v4  ;;  %4254 = vst.msk [vmem:[#allocation2 + $0x27] ss:$8 sm:$0x3] %vm5529_vm2, %v4061_v6  ;;  %v4073_v60 = vrot.slane %v4065_v21, %v5513_v33  ;;  %v4080_v53 = vrot.slane %v4066_v23, %v5513_v33  ;;  %v3555_v31 = vcombine.high %v3547_v38, %v3547_v38 }
 0x1f9   :  { %4263 = vst.msk [vmem:[#allocation2 + $0x57] ss:$8 sm:$0x3] %vm5529_vm2, %v4060_v20  ;;  %4266 = vst.msk [vmem:[#allocation2 + $0x67] ss:$8 sm:$0x3] %vm5529_vm2, %v4062_v9  ;;  %v3556_v14 = vcombine.high %v3554_v44, %v3554_v44  ;;  %v3563_v58 = vrot.slane %v3547_v38, %v5513_v33  ;;  %v3570_v54 = vrot.slane %v3554_v44, %v5513_v33 }
 0x1fa   :  { %3731 = vst.msk [vmem:[#allocation2 + $0x36] ss:$8 sm:$0x3] %vm5529_vm2, %v3537_v52  ;;  %3743 = vst.msk [vmem:[#allocation2 + $0x76] ss:$8 sm:$0x3] %vm5529_vm2, %v3538_v26  ;;  %v4081_v18 = vcombine.high %v4073_v60, %v4073_v60  ;;  %v4082_v2 = vcombine.high %v4080_v53, %v4080_v53  ;;  %v4089_v56 = vrot.slane %v4073_v60, %v5513_v33 }
 0x1fb   :  { %4257 = vst.msk [vmem:[#allocation2 + $0x37] ss:$8 sm:$0x3] %vm5529_vm2, %v4063_v22  ;;  %4269 = vst.msk [vmem:[#allocation2 + $0x77] ss:$8 sm:$0x3] %vm5529_vm2, %v4064_v50  ;;  %v4096_v39 = vrot.slane %v4080_v53, %v5513_v33  ;;  %v3577_v57 = vrot.slane %v3555_v31, %v5513_v33  ;;  %v3584_v13 = vrot.slane %v3556_v14, %v5513_v33 }
 0x1fc   :  { %v3585_v21 = vcombine.high %v3563_v58, %v3563_v58  ;;  %v3586_v23 = vcombine.high %v3570_v54, %v3570_v54  ;;  %3746 = vst.msk [vmem:[#allocation2 + $0x86] ss:$8 sm:$0x3] %vm5529_vm2, %v3563_v58  ;;  %3758 = vst.msk [vmem:[#allocation2 + $0xc6] ss:$8 sm:$0x3] %vm5529_vm2, %v3570_v54  ;;  %v4103_v46 = vrot.slane %v4081_v18, %v5513_v33 }
 0x1fd   :  { %v4110_v49 = vrot.slane %v4082_v2, %v5513_v33  ;;  %v4111_v42 = vcombine.high %v4089_v56, %v4089_v56  ;;  %v4112_v35 = vcombine.high %v4096_v39, %v4096_v39  ;;  %4272 = vst.msk [vmem:[#allocation2 + $0x87] ss:$8 sm:$0x3] %vm5529_vm2, %v4089_v56  ;;  %4284 = vst.msk [vmem:[#allocation2 + $0xc7] ss:$8 sm:$0x3] %vm5529_vm2, %v4096_v39 }
 0x1fe   :  { %v3587_v0 = vcombine.high %v3577_v57, %v3577_v57  ;;  %v3588_v40 = vcombine.high %v3584_v13, %v3584_v13  ;;  %3749 = vst.msk [vmem:[#allocation2 + $0x96] ss:$8 sm:$0x3] %vm5529_vm2, %v3577_v57  ;;  %3752 = vst.msk [vmem:[#allocation2 + $0xa6] ss:$8 sm:$0x3] %vm5529_vm2, %v3585_v21  ;;  %v3469_v61 = vadd.f32 %v6645_v36, %v5585_v48 }
 0x1ff   :  { %3761 = vst.msk [vmem:[#allocation2 + $0xd6] ss:$8 sm:$0x3] %vm5529_vm2, %v3584_v13  ;;  %3764 = vst.msk [vmem:[#allocation2 + $0xe6] ss:$8 sm:$0x3] %vm5529_vm2, %v3586_v23  ;;  %v3995_v62 = vadd.f32 %v6650_v59, %v5585_v48  ;;  %v4113_v51 = vcombine.high %v4103_v46, %v4103_v46  ;;  %v4114_v5 = vcombine.high %v4110_v49, %v4110_v49 }
 0x200   :  { %4275 = vst.msk [vmem:[#allocation2 + $0x97] ss:$8 sm:$0x3] %vm5529_vm2, %v4103_v46  ;;  %4278 = vst.msk [vmem:[#allocation2 + $0xa7] ss:$8 sm:$0x3] %vm5529_vm2, %v4111_v42  ;;  %v3454_v36 = vmax.f32 %v6608_v25, %v6634_v41  ;;  %v3980_v59 = vmax.f32 %v6610_v17, %v6636_v45  ;;  %v3455_v24 = vmax.f32 %v6612_v10, %v6638_v37 }
 0x201   :  { %4287 = vst.msk [vmem:[#allocation2 + $0xd7] ss:$8 sm:$0x3] %vm5529_vm2, %v4110_v49  ;;  %4290 = vst.msk [vmem:[#allocation2 + $0xe7] ss:$8 sm:$0x3] %vm5529_vm2, %v4112_v35  ;;  %v3981_v15 = vmax.f32 %v6614_v63, %v6640_v27  ;;  %v7023_v25 = vmax.f32 %v6404_v29, %v6510_v34  ;;  %v7024_v41 = vmax.f32 %v6406_v12, %v6512_v1 }
 0x202   :  { %3755 = vst.msk [vmem:[#allocation2 + $0xb6] ss:$8 sm:$0x3] %vm5529_vm2, %v3587_v0  ;;  %3767 = vst.msk [vmem:[#allocation2 + $0xf6] ss:$8 sm:$0x3] %vm5529_vm2, %v3588_v40  ;;  %v3456_v10 = vmax.f32 %v6616_v28, %v6652_v55  ;;  %v3982_v63 = vmax.f32 %v6618_v43, %v6654_v8  ;;  %v7025_v4 = vmax.f32 %v6416_v7, %v6524_v47 }
 0x203   :  { %4281 = vst.msk [vmem:[#allocation2 + $0xb7] ss:$8 sm:$0x3] %vm5529_vm2, %v4113_v51  ;;  %4293 = vst.msk [vmem:[#allocation2 + $0xf7] ss:$8 sm:$0x3] %vm5529_vm2, %v4114_v5  ;;  %v3462_v17 = vmax.f32 %v7023_v25, %v3454_v36  ;;  %v3988_v45 = vmax.f32 %v7024_v41, %v3980_v59  ;;  %v7026_v29 = vmax.f32 %v6418_v32, %v6526_v16 }
 0x204   :  { %v3477_v37 = vmax.f32 %v3469_v61, 0.0  ;;  %v4003_v27 = vmax.f32 %v3995_v62, 0.0  ;;  %v3463_v20 = vmax.f32 %v7025_v4, %v3455_v24  ;;  %v7027_v1 = vmax.f32 %v6434_v3, %v6534_v19  ;;  %v7028_v43 = vld [vmem:[#allocation7_spill] sm:$0xff]  ;;  %v7030_v9 = vld [vmem:[#allocation9_spill] sm:$0xff] }
 0x205   :  { %v3989_v34 = vmax.f32 %v7026_v29, %v3981_v15  ;;  %v3470_v6 = vadd.f32 %v3462_v17, %v5585_v48  ;;  %v3996_v12 = vadd.f32 %v3988_v45, %v5585_v48  ;;  %v7029_v55 = vmax.f32 %v6436_v11, %v7028_v43 }
 0x206   :  { %v3464_v28 = vmax.f32 %v7027_v1, %v3456_v10  ;;  %v3471_v52 = vadd.f32 %v3463_v20, %v7030_v9 }
 0x207   :  { %v3990_v8 = vmax.f32 %v7029_v55, %v3982_v63  ;;  %v3997_v7 = vadd.f32 %v3989_v34, %v7030_v9  ;;  %v3478_v47 = vmax.f32 %v3470_v6, 0.0  ;;  %v4004_v26 = vmax.f32 %v3996_v12, 0.0 }
 0x208   :  { %v3472_v32 = vadd.f32 %v3464_v28, %v7030_v9  ;;  %v3479_v38 = vmax.f32 %v3471_v52, 0.0 }
 0x209   :  { %v3998_v16 = vadd.f32 %v3990_v8, %v7030_v9  ;;  %v4005_v48 = vmax.f32 %v3997_v7, 0.0  ;;  %v3589_v44 = vcombine.low %v3477_v37, %v3478_v47  ;;  %v3590_v22 = vcombine.high %v3477_v37, %v3478_v47 }
 0x20a   :  { %v4115_v3 = vcombine.low %v4003_v27, %v4004_v26  ;;  %v4116_v19 = vcombine.high %v4003_v27, %v4004_v26  ;;  %v3480_v50 = vmax.f32 %v3472_v32, 0.0 }
 0x20b   :  { %v4006_v60 = vmax.f32 %v3998_v16, 0.0  ;;  %v3597_v11 = vrot.slane %v3589_v44, %v5513_v33  ;;  %v3604_v53 = vrot.slane %v3590_v22, %v5513_v33 }
 0x20c   :  { %v4123_v31 = vrot.slane %v4115_v3, %v5513_v33  ;;  %v4130_v14 = vrot.slane %v4116_v19, %v5513_v33  ;;  %v3639_v58 = vcombine.low %v3479_v38, %v3480_v50  ;;  %v3640_v54 = vcombine.high %v3479_v38, %v3480_v50 }
 0x20d   :  { %v4165_v18 = vcombine.low %v4005_v48, %v4006_v60  ;;  %v4166_v2 = vcombine.high %v4005_v48, %v4006_v60  ;;  %v3605_v56 = vcombine.high %v3597_v11, %v3597_v11  ;;  %v3606_v39 = vcombine.high %v3604_v53, %v3604_v53 }
 0x20e   :  { %v3613_v57 = vrot.slane %v3597_v11, %v5513_v33  ;;  %v3620_v13 = vrot.slane %v3604_v53, %v5513_v33  ;;  %v4131_v21 = vcombine.high %v4123_v31, %v4123_v31  ;;  %v4132_v23 = vcombine.high %v4130_v14, %v4130_v14 }
 0x20f   :  { %v4139_v46 = vrot.slane %v4123_v31, %v5513_v33  ;;  %v4146_v49 = vrot.slane %v4130_v14, %v5513_v33  ;;  %v3627_v42 = vrot.slane %v3605_v56, %v5513_v33  ;;  %v3634_v35 = vrot.slane %v3606_v39, %v5513_v33 }
 0x210   :  { %v3635_v0 = vcombine.high %v3613_v57, %v3613_v57  ;;  %v3636_v40 = vcombine.high %v3620_v13, %v3620_v13  ;;  %3770 = vst.msk [vmem:[#allocation2 + $0x106] ss:$8 sm:$0x3] %vm5529_vm2, %v3613_v57  ;;  %3782 = vst.msk [vmem:[#allocation2 + $0x146] ss:$8 sm:$0x3] %vm5529_vm2, %v3620_v13  ;;  %v4153_v61 = vrot.slane %v4131_v21, %v5513_v33 }
 0x211   :  { %v4160_v62 = vrot.slane %v4132_v23, %v5513_v33  ;;  %v4161_v51 = vcombine.high %v4139_v46, %v4139_v46  ;;  %v4162_v5 = vcombine.high %v4146_v49, %v4146_v49  ;;  %4296 = vst.msk [vmem:[#allocation2 + $0x107] ss:$8 sm:$0x3] %vm5529_vm2, %v4139_v46  ;;  %4308 = vst.msk [vmem:[#allocation2 + $0x147] ss:$8 sm:$0x3] %vm5529_vm2, %v4146_v49 }
 0x212   :  { %v3637_v36 = vcombine.high %v3627_v42, %v3627_v42  ;;  %v3638_v59 = vcombine.high %v3634_v35, %v3634_v35  ;;  %3773 = vst.msk [vmem:[#allocation2 + $0x116] ss:$8 sm:$0x3] %vm5529_vm2, %v3627_v42  ;;  %3776 = vst.msk [vmem:[#allocation2 + $0x126] ss:$8 sm:$0x3] %vm5529_vm2, %v3635_v0  ;;  %v3647_v24 = vrot.slane %v3639_v58, %v5513_v33 }
 0x213   :  { %3785 = vst.msk [vmem:[#allocation2 + $0x156] ss:$8 sm:$0x3] %vm5529_vm2, %v3634_v35  ;;  %3788 = vst.msk [vmem:[#allocation2 + $0x166] ss:$8 sm:$0x3] %vm5529_vm2, %v3636_v40  ;;  %v3654_v15 = vrot.slane %v3640_v54, %v5513_v33  ;;  %v4163_v25 = vcombine.high %v4153_v61, %v4153_v61  ;;  %v4164_v17 = vcombine.high %v4160_v62, %v4160_v62 }
 0x214   :  { %4299 = vst.msk [vmem:[#allocation2 + $0x117] ss:$8 sm:$0x3] %vm5529_vm2, %v4153_v61  ;;  %4302 = vst.msk [vmem:[#allocation2 + $0x127] ss:$8 sm:$0x3] %vm5529_vm2, %v4161_v51  ;;  %v4173_v41 = vrot.slane %v4165_v18, %v5513_v33  ;;  %v4180_v45 = vrot.slane %v4166_v2, %v5513_v33  ;;  %v3655_v10 = vcombine.high %v3647_v24, %v3647_v24 }
 0x215   :  { %4311 = vst.msk [vmem:[#allocation2 + $0x157] ss:$8 sm:$0x3] %vm5529_vm2, %v4160_v62  ;;  %4314 = vst.msk [vmem:[#allocation2 + $0x167] ss:$8 sm:$0x3] %vm5529_vm2, %v4162_v5  ;;  %v3656_v63 = vcombine.high %v3654_v15, %v3654_v15  ;;  %v3663_v37 = vrot.slane %v3647_v24, %v5513_v33  ;;  %v3670_v27 = vrot.slane %v3654_v15, %v5513_v33 }
 0x216   :  { %3779 = vst.msk [vmem:[#allocation2 + $0x136] ss:$8 sm:$0x3] %vm5529_vm2, %v3637_v36  ;;  %3791 = vst.msk [vmem:[#allocation2 + $0x176] ss:$8 sm:$0x3] %vm5529_vm2, %v3638_v59  ;;  %v4181_v4 = vcombine.high %v4173_v41, %v4173_v41  ;;  %v4182_v20 = vcombine.high %v4180_v45, %v4180_v45  ;;  %v4189_v29 = vrot.slane %v4173_v41, %v5513_v33 }
 0x217   :  { %4305 = vst.msk [vmem:[#allocation2 + $0x137] ss:$8 sm:$0x3] %vm5529_vm2, %v4163_v25  ;;  %4317 = vst.msk [vmem:[#allocation2 + $0x177] ss:$8 sm:$0x3] %vm5529_vm2, %v4164_v17  ;;  %v4196_v34 = vrot.slane %v4180_v45, %v5513_v33  ;;  %v3677_v6 = vrot.slane %v3655_v10, %v5513_v33  ;;  %v3684_v12 = vrot.slane %v3656_v63, %v5513_v33 }
 0x218   :  { %v3685_v1 = vcombine.high %v3663_v37, %v3663_v37  ;;  %v3686_v28 = vcombine.high %v3670_v27, %v3670_v27  ;;  %3794 = vst.msk [vmem:[#allocation2 + $0x186] ss:$8 sm:$0x3] %vm5529_vm2, %v3663_v37  ;;  %3806 = vst.msk [vmem:[#allocation2 + $0x1c6] ss:$8 sm:$0x3] %vm5529_vm2, %v3670_v27  ;;  %v4203_v43 = vrot.slane %v4181_v4, %v5513_v33 }
 0x219   :  { %v4210_v55 = vrot.slane %v4182_v20, %v5513_v33  ;;  %v4211_v8 = vcombine.high %v4189_v29, %v4189_v29  ;;  %v4212_v9 = vcombine.high %v4196_v34, %v4196_v34  ;;  %4320 = vst.msk [vmem:[#allocation2 + $0x187] ss:$8 sm:$0x3] %vm5529_vm2, %v4189_v29  ;;  %4332 = vst.msk [vmem:[#allocation2 + $0x1c7] ss:$8 sm:$0x3] %vm5529_vm2, %v4196_v34 }
 0x21a   :  { %v3687_v52 = vcombine.high %v3677_v6, %v3677_v6  ;;  %v3688_v7 = vcombine.high %v3684_v12, %v3684_v12  ;;  %3797 = vst.msk [vmem:[#allocation2 + $0x196] ss:$8 sm:$0x3] %vm5529_vm2, %v3677_v6  ;;  %3800 = vst.msk [vmem:[#allocation2 + $0x1a6] ss:$8 sm:$0x3] %vm5529_vm2, %v3685_v1  ;;  %v4213_v33 = vcombine.high %v4203_v43, %v4203_v43 }
 0x21b   :  { %3809 = vst.msk [vmem:[#allocation2 + $0x1d6] ss:$8 sm:$0x3] %vm5529_vm2, %v3684_v12  ;;  %3812 = vst.msk [vmem:[#allocation2 + $0x1e6] ss:$8 sm:$0x3] %vm5529_vm2, %v3686_v28  ;;  %v4214_v47 = vcombine.high %v4210_v55, %v4210_v55 }
 0x21c   :  { %4323 = vst.msk [vmem:[#allocation2 + $0x197] ss:$8 sm:$0x3] %vm5529_vm2, %v4203_v43  ;;  %4326 = vst.msk [vmem:[#allocation2 + $0x1a7] ss:$8 sm:$0x3] %vm5529_vm2, %v4211_v8 }
 0x21d   :  { %4335 = vst.msk [vmem:[#allocation2 + $0x1d7] ss:$8 sm:$0x3] %vm5529_vm2, %v4210_v55  ;;  %4338 = vst.msk [vmem:[#allocation2 + $0x1e7] ss:$8 sm:$0x3] %vm5529_vm2, %v4212_v9 }
 0x21e   :  { %3803 = vst.msk [vmem:[#allocation2 + $0x1b6] ss:$8 sm:$0x3] %vm5529_vm2, %v3687_v52  ;;  %3815 = vst.msk [vmem:[#allocation2 + $0x1f6] ss:$8 sm:$0x3] %vm5529_vm2, %v3688_v7 }
 0x21f   :  { %4329 = vst.msk [vmem:[#allocation2 + $0x1b7] ss:$8 sm:$0x3] %vm5529_vm2, %v4213_v33  ;;  %4341 = vst.msk [vmem:[#allocation2 + $0x1f7] ss:$8 sm:$0x3] %vm5529_vm2, %v4214_v47 }
 0x220 LB: > { %v4974_v26 = vmov 0   ;;  %s4826_s9 = smul.u32 88, %s4969_s0  ;;  %s4825_s10 = sshll.u32 %s4969_s0, 4  ;;  %vm4448_vm3 = vcmask 334848   ;;  %vm4452_vm4 = vcmask 1043456   ;;  %vm4453_vm5 = vcmask 1044480   ;;  %s4969_s0 = sphi %s6872_s0, %s4349_s0  }
 0x221   : > { %4459 = vmatprep.subr.bf16.mxu0 %v4974_v26  ;;  %s6884_s14 = scalar_lea.vmem [#allocation2], %s4825_s10  ;;  %v4975_v11 = vmov 65535   ;;  %v4350_v56 = vld [vmem:[#allocation3] sm:$0xff]  ;;  %s4349_s0 = sadd.s32 1, %s4969_s0  }
 0x222   : > { %s6882_s13 = scalar_lea.vmem %s6945_s3, %s4826_s9  ;;  %v4454_v53 = vsel %vm4452_vm4, 4294967295, %v4975_v11  ;;  %p4346_p0 = scmp.ge.s32.totalorder %s4349_s0, 32  }
 0x223   : > { %v4944_v32 = vld [vmem:[%s6882_s13] sm:$0xff]   ;;  %v4945_v38 = vld [vmem:[%s6882_s13 + $0x8] sm:$0xff]   ;;  %v4946_v48 = vld [vmem:[%s6882_s13 + $0x10] sm:$0xff]   ;;  %v4455_v58 = vsel %vm4453_vm5, %v4454_v53, 0  ;;  %v7031_v46 = vmov (%p4346_p0), 0.0   ;;  %vm4976_vm6 = vmmov (%p4346_p0), 0  }
 0x224   : > { %4460 = vmatpush1.bf16.msra.mxu0 %v4944_v32  ;;  %v4947_v44 = vld [vmem:[%s6882_s13 + $0x18] sm:$0xff]   ;;  %v4948_v22 = vld [vmem:[%s6882_s13 + $0x20] sm:$0xff]   ;;  %v4949_v3 = vld [vmem:[%s6882_s13 + $0x28] sm:$0xff]  }
 0x225   : > { %4461 = vmatprep.subr.bf16.mxu0 %v4974_v26  ;;  %v4950_v19 = vld [vmem:[%s6882_s13 + $0x30] sm:$0xff]   ;;  %v4951_v50 = vld [vmem:[%s6882_s13 + $0x38] sm:$0xff]   ;;  %v4952_v60 = vld [vmem:[%s6882_s13 + $0x40] sm:$0xff]  }
 0x226   : > { %v4355_v30 = vld [vmem:[%s6884_s14 + $0x8] sm:$0xff]  ;;  %v4954_v14 = vld [vmem:[%s6882_s13 + $0x50] sm:$0x1f]   ;;  %v4354_v18 = vld [vmem:[%s6884_s14] sm:$0xff] }
 0x227   : > { %v4357_v16 = vpack.c.bf16 %v4355_v30, %v4355_v30  ;;  %v4953_v31 = vld [vmem:[%s6882_s13 + $0x48] sm:$0xff]   ;;  %v4457_v54 = vand.u32 %v4954_v14, %v4455_v58  ;;  %v4356_v2 = vpack.c.bf16 %v4354_v18, %v4354_v18  ;;  %v4955_v49 = vld [vmem:[%s6947_s5] sm:$0xff] (%p4346_p0)   ;;  %v4957_v35 = vld [vmem:[%s6947_s5 + $0x10] sm:$0xff] (%p4346_p0)  }
 0x228   : > { %4462 = vmatpush1.bf16.msra.mxu0 %v4945_v38  ;;  %v4956_v42 = vld [vmem:[%s6947_s5 + $0x8] sm:$0xff] (%p4346_p0)   ;;  %v4958_v0 = vld [vmem:[%s6947_s5 + $0x18] sm:$0xff] (%p4346_p0)   ;;  %v4959_v40 = vld [vmem:[%s6947_s5 + $0x20] sm:$0xff] (%p4346_p0)  }
 0x229   : > { %4814 = vmatprep.mubr.msk.bf16.mxu0 %vm4448_vm3, %v4357_v16  ;;  %4463 = vmatprep.subr.bf16.mxu0 %v4974_v26  ;;  %v4960_v61 = vld [vmem:[%s6947_s5 + $0x28] sm:$0xff] (%p4346_p0)   ;;  %v4815_v51 = vld [vmem:[%s6946_s4] ss:$0 sm:$0xff] (%p4346_p0)  ;;  %v4961_v36 = vld [vmem:[%s6947_s5 + $0x30] sm:$0xff] (%p4346_p0)  }
 0x22a   :  { %v4962_v24 = vld [vmem:[%s6947_s5 + $0x38] sm:$0xff] (%p4346_p0)   ;;  %v4816_v25 = vld [vmem:[%s6948_s6] ss:$0 sm:$0xff] (%p4346_p0) }
 0x22c   : > { %4464 = vmatpush1.bf16.msra.mxu0 %v4946_v48 }
 0x22d   : > { %4465 = vmatprep.subr.bf16.mxu0 %v4974_v26 }
 0x230   : > { %4466 = vmatpush1.bf16.msra.mxu0 %v4947_v44 }
 0x231   : > { %4467 = vmatprep.subr.bf16.mxu0 %v4974_v26 }
 0x234   : > { %4468 = vmatpush1.bf16.msra.mxu0 %v4948_v22 }
 0x235   : > { %4469 = vmatprep.subr.bf16.mxu0 %v4974_v26 }
 0x238   : > { %4470 = vmatpush1.bf16.msra.mxu0 %v4949_v3 }
 0x239   : > { %4471 = vmatprep.subr.bf16.mxu0 %v4974_v26 }
 0x23c   : > { %4472 = vmatpush1.bf16.msra.mxu0 %v4950_v19 }
 0x23d   : > { %4473 = vmatprep.subr.bf16.mxu0 %v4974_v26 }
 0x240   : > { %4474 = vmatpush1.bf16.msra.mxu0 %v4951_v50 }
 0x241   : > { %4475 = vmatprep.subr.bf16.mxu0 %v4974_v26 }
 0x244   : > { %4476 = vmatpush1.bf16.msra.mxu0 %v4952_v60 }
 0x245   : > { %4477 = vmatprep.subr.bf16.mxu0 %v4974_v26 }
 0x248   : > { %4478 = vmatpush1.bf16.msra.mxu0 %v4953_v31 }
 0x249   : > { %4479 = vmatprep.subr.bf16.mxu0 %v4974_v26 }
 0x24c   : > { %4480 = vmatpush1.bf16.msra.mxu0 %v4457_v54 }
 0x24d   :  { %4836 = vmatprep.subr.bf16.mxu0 (%p4346_p0), %v7031_v46 }
 0x24f   : > { %4492 = vmatmul.mubr.bf16.vlgmr.msra.gmra.mrb[0].mxu0 %v4356_v2 }
 0x250   :  { %4852 = vmatprep.mubr.msk.bf16.mxu0 (%p4346_p0), %vm4976_vm6, %v7031_v46  ;;  %4837 = vmatpush3.bf16.msra.mxu0 (%p4346_p0), %v4955_v49 }
 0x251   :  { %4838 = vmatprep.subr.bf16.mxu0 (%p4346_p0), %v7031_v46 }
 0x254   :  { %4839 = vmatpush3.bf16.msra.mxu0 (%p4346_p0), %v4956_v42 }
 0x255   :  { %4840 = vmatprep.subr.bf16.mxu0 (%p4346_p0), %v7031_v46 }
 0x258   :  { %4841 = vmatpush3.bf16.msra.mxu0 (%p4346_p0), %v4957_v35 }
 0x259   :  { %4842 = vmatprep.subr.bf16.mxu0 (%p4346_p0), %v7031_v46 }
 0x25c   :  { %4843 = vmatpush3.bf16.msra.mxu0 (%p4346_p0), %v4958_v0 }
 0x25d   :  { %4844 = vmatprep.subr.bf16.mxu0 (%p4346_p0), %v7031_v46 }
 0x260   :  { %4845 = vmatpush3.bf16.msra.mxu0 (%p4346_p0), %v4959_v40 }
 0x261   :  { %4846 = vmatprep.subr.bf16.mxu0 (%p4346_p0), %v7031_v46 }
 0x264   :  { %4847 = vmatpush3.bf16.msra.mxu0 (%p4346_p0), %v4960_v61 }
 0x265   :  { %4848 = vmatprep.subr.bf16.mxu0 (%p4346_p0), %v7031_v46 }
 0x268   :  { %4849 = vmatpush3.bf16.msra.mxu0 (%p4346_p0), %v4961_v36 }
 0x269   :  { %4850 = vmatprep.subr.bf16.mxu0 (%p4346_p0), %v7031_v46 }
 0x26c   :  { %4851 = vmatpush3.bf16.msra.mxu0 (%p4346_p0), %v4962_v24 }
 0x31f   :  { %4348 = sbr.rel (!%p4346_p0) target bundleno = 544 (0x220), region = 319 }
 0x322   : > { %v4493_v39 = vpop.f32.mrb[0].mxu0 }
 0x323   : > { %v4499_v57 = vadd.f32 %v4493_v39, %v4350_v56  ;;  %v4495_v13 = vpop.f32.mrb[1].mxu0 }
 0x324   : > { %v4496_v21 = vpop.f32.mrb[2].mxu0 }
 0x325   : > { %4500 = vst [vmem:[#allocation3] sm:$0xff] %v4499_v57  ;;  %v4497_v23 = vpop.f32.mrb[3].mxu0 }
 0x32c   :  { %v4501_v62 = vld [vmem:[#allocation3] sm:$0xff] }
 0x32d   :  { %v4509_v5 = vadd.f32 %v4815_v51, %v4501_v62 }
 0x32f   :  { %v4510_v59 = vmax.f32 %v4509_v5, 0.0 }
 0x331   :  { %v4511_v15 = vpack.c.bf16 %v4510_v59, %v4510_v59 }
 0x333   :  { %4853 = vmatmul.mubr.bf16.vlgmr.msra.gmra.mrb[0].mxu0 %v4511_v15 }
 0x406   :  { %v4617_v17 = vpop.f32.mrb[0].mxu0 }
 0x407   :  { %v4618_v41 = vadd.f32 %v4816_v25, %v4617_v17  ;;  %v4854_v45 = vpop.f32.mrb[1].mxu0 }
 0x408   :  { %v4620_v10 = vpop.f32.mrb[2].mxu0 }
 0x409   :  { %4623 = vst [vmem:[%s6949_s7] sm:$0xff] %v4618_v41  ;;  %v4855_v63 = vpop.f32.mrb[3].mxu0 }

</bundles_post_ra>
